<compile_context>
chip_gen: v6e
topology: v6e:2x2x1
jax: 0.10.0
libtpu: 0.0.40
codegen_flags: <defaults>
</compile_context>

<pallas_src>
import functools

import jax
import jax.numpy as jnp
from jax.experimental import pallas as pl
from jax.experimental.pallas import tpu as pltpu

PAD = 2          # spatial halo: enough for the 5x5 conv and the 3x3 max-pool
NEG_PAD = -1e30  # "-inf"-like pad so the max-pool ignores the halo (finite -> no NaN/inf in bf16/f32)


def _layout(h, w):
    """Flat padded-canvas layout constants (all static Python ints)."""
    wp = w + 2 * PAD
    while (h * wp) % 128:            # make the output lane dim (H*Wp) a multiple of 128
        wp += 1
    lout = h * wp                    # lane-dense per-image output length
    center = PAD * wp + PAD          # offset of pixel (0,0) inside the padded plane
    lead = (-center) % 128           # leading gap so the in-kernel canvas store is 128-aligned
    lpad = (h + 2 * PAD + 1) * wp    # padded plane (+1 spare row so all tap slices stay in bounds)
    return dict(wp=wp, lout=lout, lcanvas=lead + lpad, start=lead + center)


# ---------------------------------------------------------------------------
# Pallas kernel
# ---------------------------------------------------------------------------

def _conv_taps(canvas_ref, w_ref, ksize, wp, lout, start):
    """'same' conv as per-tap MXU accumulation over shifted lane slices of a padded canvas.

    canvas_ref: (Cin, LCANVAS) ref (input block or VMEM scratch), zero-padded flat plane.
    w_ref:      (ksize*ksize, Cout, Cin) ref (BN scale already folded in).
    Returns the f32 accumulator of shape (Cout, LOUT).
    """
    acc = None
    t = 0
    for dy in range(ksize):
        for dx in range(ksize):
            off = start + (dy - ksize // 2) * wp + (dx - ksize // 2)
            tap = canvas_ref[:, off:off + lout]                        # (Cin, LOUT)
            p = jnp.dot(w_ref[t], tap, preferred_element_type=jnp.float32)
            acc = p if acc is None else acc + p
            t += 1
    return acc


def _inception_kernel(xpad_ref, w_lin_ref, b_lin_ref, w_pool_ref, b_pool_ref,
                      w3_ref, b3_ref, w5_ref, b5_ref, mask_ref,
                      y1_ref, y3_ref, y5_ref, yp_ref,
                      c3_canvas, c5_canvas,
                      *, wp, lout, start, c1, c3r):
    mask = mask_ref[...]                                               # (1, LOUT): 1 on real cols

    # ---- stage 1: the three 1x1 convs that read x, fused into one lane-dense matmul ----
    xc = xpad_ref[:, start:start + lout]                               # (Cin, LOUT) bf16 (centered)
    y = jnp.dot(w_lin_ref[0], xc, preferred_element_type=jnp.float32)  # (C1+C3r+C5r, LOUT) f32
    y = jnp.maximum(y + b_lin_ref[...], 0.0) * mask

    # ---- pool branch: 3x3 stride-1 max-pool = max over 9 shifted VMEM slices, + 1x1 conv ----
    pooled = None
    for dy in range(3):
        for dx in range(3):
            off = start + (dy - 1) * wp + (dx - 1)
            tap = xpad_ref[:, off:off + lout]
            pooled = tap if pooled is None else jnp.maximum(pooled, tap)
    yp = jnp.dot(w_pool_ref[0], pooled, preferred_element_type=jnp.float32)
    yp_ref[...] = jnp.maximum(yp + b_pool_ref[...], 0.0) * mask

    # branch-1 output goes straight out (f32, lane-dense store)
    y1_ref[...] = y[:c1]

    # ---- re-embed the two reduce outputs into zero-padded VMEM canvases (no HBM round trip) ----
    c3_canvas[...] = jnp.zeros_like(c3_canvas)
    c3_canvas[:, start:start + lout] = y[c1:c1 + c3r].astype(c3_canvas.dtype)
    c5_canvas[...] = jnp.zeros_like(c5_canvas)
    c5_canvas[:, start:start + lout] = y[c1 + c3r:].astype(c5_canvas.dtype)

    # ---- stage 2: 3x3 and 5x5 convs as per-tap accumulation over the canvases ----
    acc3 = _conv_taps(c3_canvas, w3_ref, 3, wp, lout, start)
    y3_ref[...] = jnp.maximum(acc3 + b3_ref[...], 0.0)
    acc5 = _conv_taps(c5_canvas, w5_ref, 5, wp, lout, start)
    y5_ref[...] = jnp.maximum(acc5 + b5_ref[...], 0.0)


# ---------------------------------------------------------------------------
# Parameters (Conv2d + folded BatchNorm + ReLU)
# ---------------------------------------------------------------------------

def _init_convblock(key, cin, cout, k):
    kw, kb = jax.random.split(key)
    fan_in = cin * k * k
    bound = 1.0 / jnp.sqrt(float(fan_in))
    w = jax.random.uniform(kw, (cout, cin, k, k), jnp.float32, -bound, bound)
    b = jax.random.uniform(kb, (cout,), jnp.float32, -bound, bound)
    # Deterministic BatchNorm parameters / running stats (inference mode).
    gamma = 1.0 + 0.1 * jnp.arange(cout, dtype=jnp.float32)
    beta = 0.05 * jnp.arange(cout, dtype=jnp.float32)
    mean = 0.01 * jnp.arange(cout, dtype=jnp.float32)
    var = 1.0 + 0.02 * jnp.arange(cout, dtype=jnp.float32)
    scale = gamma / jnp.sqrt(var + 1e-5)
    # Fold BN scale into the weights, BN shift into the bias (review item).
    w_folded = w * scale[:, None, None, None]
    # Tap-major layout: (kh*kw, Cout, Cin), tap t = dy*k + dx.
    w_taps = jnp.transpose(w_folded, (2, 3, 0, 1)).reshape(k * k, cout, cin)
    bias = beta + (b - mean) * scale
    return {"w_taps": w_taps.astype(jnp.bfloat16), "bias": bias.reshape(cout, 1), "k": k}


# ---------------------------------------------------------------------------
# Forward
# ---------------------------------------------------------------------------

def inception_forward(params, x_nchw):
    n, cin, h, w = x_nchw.shape
    lay = _layout(h, w)
    wp, lout, lcanvas, start = lay["wp"], lay["lout"], lay["lcanvas"], lay["start"]

    p1, p3r, p5r = params["b1"], params["b3_1"], params["b5_1"]
    p3, p5, pp = params["b3_2"], params["b5_2"], params["bp"]
    c1, c3r, c5r = p1["w_taps"].shape[1], p3r["w_taps"].shape[1], p5r["w_taps"].shape[1]
    c3, c5, cp = p3["w_taps"].shape[1], p5["w_taps"].shape[1], pp["w_taps"].shape[1]
    ca = c1 + c3r + c5r
    ctot = c1 + c3 + c5 + cp

    # Single spatial pad of x into the flat, lane-aligned canvas layout (channels-first, bf16).
    xp = jnp.pad(x_nchw.astype(jnp.float32),
                 ((0, 0), (0, 0), (PAD, PAD + 1), (PAD, wp - w - PAD)),
                 constant_values=NEG_PAD)
    xp = xp.reshape(n, cin, -1)
    xp = jnp.pad(xp, ((0, 0), (0, 0), (lcanvas - xp.shape[-1], 0)), constant_values=NEG_PAD)
    xp = xp.astype(jnp.bfloat16)

    # Column-validity mask (zeros out the padded-width garbage columns).
    col = jnp.arange(lout, dtype=jnp.int32) % wp
    mask = (col < w).astype(jnp.float32).reshape(1, lout)

    # Fuse the three 1x1 weight sets that read x into one (1, CA, Cin) matrix.
    w_lin = jnp.concatenate([p1["w_taps"], p3r["w_taps"], p5r["w_taps"]], axis=1)
    b_lin = jnp.concatenate([p1["bias"], p3r["bias"], p5r["bias"]], axis=0)

    kernel = functools.partial(_inception_kernel,
                               wp=wp, lout=lout, start=start, c1=c1, c3r=c3r)
    flops = 2 * n * lout * (cin * (ca + cp) + 9 * c3r * c3 + 25 * c5r * c5)
    bytes_accessed = 2 * n * cin * lcanvas + 4 * n * lout * ctot

    # NOTE: for large H*W a second ("parallel") grid axis tiling rows of the canvas would be
    # added; at inception-scale feature maps one image per grid step fits VMEM comfortably.
    y1, y3, y5, yp = pl.pallas_call(
        kernel,
        grid=(n,),
        in_specs=[
            pl.BlockSpec((None, cin, lcanvas), lambda i: (i, 0, 0)),   # padded x canvas (per image)
            pl.BlockSpec((1, ca, cin), lambda i: (0, 0, 0)),           # fused 1x1 weights
            pl.BlockSpec((ca, 1), lambda i: (0, 0)),
            pl.BlockSpec((1, cp, cin), lambda i: (0, 0, 0)),           # pool-branch 1x1 weights
            pl.BlockSpec((cp, 1), lambda i: (0, 0)),
            pl.BlockSpec((9, c3, c3r), lambda i: (0, 0, 0)),           # 3x3 tap weights
            pl.BlockSpec((c3, 1), lambda i: (0, 0)),
            pl.BlockSpec((25, c5, c5r), lambda i: (0, 0, 0)),          # 5x5 tap weights
            pl.BlockSpec((c5, 1), lambda i: (0, 0)),
            pl.BlockSpec((1, lout), lambda i: (0, 0)),                 # column validity mask
        ],
        out_specs=[
            pl.BlockSpec((None, c1, lout), lambda i: (i, 0, 0)),
            pl.BlockSpec((None, c3, lout), lambda i: (i, 0, 0)),
            pl.BlockSpec((None, c5, lout), lambda i: (i, 0, 0)),
            pl.BlockSpec((None, cp, lout), lambda i: (i, 0, 0)),
        ],
        out_shape=[
            jax.ShapeDtypeStruct((n, c1, lout), jnp.float32),
            jax.ShapeDtypeStruct((n, c3, lout), jnp.float32),
            jax.ShapeDtypeStruct((n, c5, lout), jnp.float32),
            jax.ShapeDtypeStruct((n, cp, lout), jnp.float32),
        ],
        scratch_shapes=[pltpu.VMEM((c3r, lcanvas), jnp.bfloat16),
                        pltpu.VMEM((c5r, lcanvas), jnp.bfloat16)],
        compiler_params=pltpu.CompilerParams(
            dimension_semantics=("parallel",),          # batch sharded across v7x's 2 TensorCores
            vmem_limit_bytes=32 * 1024 * 1024),
        cost_estimate=pl.CostEstimate(flops=flops, transcendentals=0,
                                      bytes_accessed=bytes_accessed),
    )(xp, w_lin, b_lin, pp["w_taps"], pp["bias"],
      p3["w_taps"], p3["bias"], p5["w_taps"], p5["bias"], mask)

    # Channel concat (order matches torch.cat([b1, b3, b5, bpool], 1)); the layout is already
    # channels-first, so only the padded-width columns need cropping -> NCHW, no transpose.
    out = jnp.concatenate([y1, y3, y5, yp], axis=1)            # (N, Ctot, H*Wp)
    out = out.reshape(n, ctot, h, wp)[:, :, :, :w]             # (N, Ctot, H, W)
    return out


if __name__ == "__main__":
    key = jax.random.PRNGKey(0)
    k_x, k_p = jax.random.split(key)

    # Small shapes consistent with the module.
    N, Cin, H, W = 2, 4, 16, 16
    in_1x1, in_3x3r, in_3x3, in_5x5r, in_5x5, in_pool = 8, 4, 8, 4, 8, 8

    x = jax.random.normal(k_x, (N, Cin, H, W), jnp.float32)    # NCHW, like PyTorch

    keys = jax.random.split(k_p, 6)
    params = {
        "b1":   _init_convblock(keys[0], Cin, in_1x1, 1),
        "b3_1": _init_convblock(keys[1], Cin, in_3x3r, 1),
        "b3_2": _init_convblock(keys[2], in_3x3r, in_3x3, 3),
        "b5_1": _init_convblock(keys[3], Cin, in_5x5r, 1),
        "b5_2": _init_convblock(keys[4], in_5x5r, in_5x5, 5),
        "bp":   _init_convblock(keys[5], Cin, in_pool, 1),
    }

    fwd = jax.jit(functools.partial(inception_forward, params))
    out = fwd(x)
    jax.block_until_ready(out)
    assert out.shape == (N, in_1x1 + in_3x3 + in_5x5 + in_pool, H, W), out.shape
    assert out.dtype == jnp.float32
    assert bool(jnp.isfinite(out).all())
    print("KERNEL_OK")
</pallas_src>

<mosaic_0001>
module attributes {stable_mosaic.version = 11 : i64} {
  func.func @_inception_kernel(%arg0: i32, %arg1: memref<1x4x582xbf16, #tpu.memory_space<vmem>>, %arg2: memref<1x16x4xbf16, #tpu.memory_space<vmem>>, %arg3: memref<16x1xf32, #tpu.memory_space<vmem>>, %arg4: memref<1x8x4xbf16, #tpu.memory_space<vmem>>, %arg5: memref<8x1xf32, #tpu.memory_space<vmem>>, %arg6: memref<9x8x4xbf16, #tpu.memory_space<vmem>>, %arg7: memref<8x1xf32, #tpu.memory_space<vmem>>, %arg8: memref<25x8x4xbf16, #tpu.memory_space<vmem>>, %arg9: memref<8x1xf32, #tpu.memory_space<vmem>>, %arg10: memref<1x384xf32, #tpu.memory_space<vmem>>, %arg11: memref<1x8x384xf32, #tpu.memory_space<vmem>>, %arg12: memref<1x8x384xf32, #tpu.memory_space<vmem>>, %arg13: memref<1x8x384xf32, #tpu.memory_space<vmem>>, %arg14: memref<1x8x384xf32, #tpu.memory_space<vmem>>, %arg15: memref<4x582xbf16, #tpu.memory_space<vmem>>, %arg16: memref<4x582xbf16, #tpu.memory_space<vmem>>) attributes {dimension_semantics = [#tpu.dimension_semantics<parallel>], iteration_bounds = array<i64: 2>, scalar_prefetch = 0 : i64, scratch_operands = 2 : i64, tpu.core_type = #tpu.core_type<tc>, window_params = [{transform_indices = @transform_0, window_bounds = array<i64: 1, 4, 582>}, {pipeline_mode = #tpu.pipeline_mode<synchronous>, transform_indices = @transform_1, window_bounds = array<i64: 1, 16, 4>}, {pipeline_mode = #tpu.pipeline_mode<synchronous>, transform_indices = @transform_2, window_bounds = array<i64: 16, 1>}, {pipeline_mode = #tpu.pipeline_mode<synchronous>, transform_indices = @transform_3, window_bounds = array<i64: 1, 8, 4>}, {pipeline_mode = #tpu.pipeline_mode<synchronous>, transform_indices = @transform_4, window_bounds = array<i64: 8, 1>}, {pipeline_mode = #tpu.pipeline_mode<synchronous>, transform_indices = @transform_5, window_bounds = array<i64: 9, 8, 4>}, {pipeline_mode = #tpu.pipeline_mode<synchronous>, transform_indices = @transform_6, window_bounds = array<i64: 8, 1>}, {pipeline_mode = #tpu.pipeline_mode<synchronous>, transform_indices = @transform_7, window_bounds = array<i64: 25, 8, 4>}, {pipeline_mode = #tpu.pipeline_mode<synchronous>, transform_indices = @transform_8, window_bounds = array<i64: 8, 1>}, {pipeline_mode = #tpu.pipeline_mode<synchronous>, transform_indices = @transform_9, window_bounds = array<i64: 1, 384>}, {transform_indices = @transform_10, window_bounds = array<i64: 1, 8, 384>}, {transform_indices = @transform_11, window_bounds = array<i64: 1, 8, 384>}, {transform_indices = @transform_12, window_bounds = array<i64: 1, 8, 384>}, {transform_indices = @transform_13, window_bounds = array<i64: 1, 8, 384>}]} {
    %c0 = arith.constant 0 : index
    %c0_0 = arith.constant 0 : index
    %0 = vector.load %arg10[%c0, %c0_0] : memref<1x384xf32, #tpu.memory_space<vmem>>, vector<1x384xf32>
    %c0_1 = arith.constant 0 : index
    %c0_2 = arith.constant 0 : index
    %c128 = arith.constant 128 : index
    %1 = vector.load %arg1[%c0_1, %c0_2, %c128] : memref<1x4x582xbf16, #tpu.memory_space<vmem>>, vector<1x4x384xbf16>
    %2 = vector.shape_cast %1 : vector<1x4x384xbf16> to vector<4x384xbf16>
    %c0_3 = arith.constant 0 : index
    %c0_4 = arith.constant 0 : index
    %c0_5 = arith.constant 0 : index
    %3 = vector.load %arg2[%c0_3, %c0_4, %c0_5] : memref<1x16x4xbf16, #tpu.memory_space<vmem>>, vector<1x16x4xbf16>
    %4 = vector.shape_cast %3 : vector<1x16x4xbf16> to vector<16x4xbf16>
    %cst = arith.constant dense<0.000000e+00> : vector<16x384xf32>
    %5 = tpu.matmul %4, %2, %cst {dimension_numbers = #tpu.dot_dimension_numbers<[1], [0], [0], [1], [0, 0, 1, 1], [], []>} : vector<16x4xbf16>, vector<4x384xbf16>, vector<16x384xf32> -> vector<16x384xf32>
    %c0_6 = arith.constant 0 : index
    %c0_7 = arith.constant 0 : index
    %6 = vector.load %arg3[%c0_6, %c0_7] : memref<16x1xf32, #tpu.memory_space<vmem>>, vector<16x1xf32>
    %7 = vector.broadcast %6 : vector<16x1xf32> to vector<16x384xf32>
    %8 = arith.addf %5, %7 : vector<16x384xf32>
    %cst_8 = arith.constant 0.000000e+00 : f32
    %9 = vector.broadcast %cst_8 : f32 to vector<16x384xf32>
    %10 = arith.maximumf %8, %9 : vector<16x384xf32>
    %11 = vector.broadcast %0 : vector<1x384xf32> to vector<16x384xf32>
    %12 = arith.mulf %10, %11 : vector<16x384xf32>
    %c0_9 = arith.constant 0 : index
    %c0_10 = arith.constant 0 : index
    %c103 = arith.constant 103 : index
    %13 = vector.load %arg1[%c0_9, %c0_10, %c103] : memref<1x4x582xbf16, #tpu.memory_space<vmem>>, vector<1x4x384xbf16>
    %14 = vector.shape_cast %13 : vector<1x4x384xbf16> to vector<4x384xbf16>
    %c0_11 = arith.constant 0 : index
    %c0_12 = arith.constant 0 : index
    %c104 = arith.constant 104 : index
    %15 = vector.load %arg1[%c0_11, %c0_12, %c104] : memref<1x4x582xbf16, #tpu.memory_space<vmem>>, vector<1x4x384xbf16>
    %16 = vector.shape_cast %15 : vector<1x4x384xbf16> to vector<4x384xbf16>
    %17 = arith.maximumf %14, %16 : vector<4x384xbf16>
    %c0_13 = arith.constant 0 : index
    %c0_14 = arith.constant 0 : index
    %c105 = arith.constant 105 : index
    %18 = vector.load %arg1[%c0_13, %c0_14, %c105] : memref<1x4x582xbf16, #tpu.memory_space<vmem>>, vector<1x4x384xbf16>
    %19 = vector.shape_cast %18 : vector<1x4x384xbf16> to vector<4x384xbf16>
    %20 = arith.maximumf %17, %19 : vector<4x384xbf16>
    %c0_15 = arith.constant 0 : index
    %c0_16 = arith.constant 0 : index
    %c127 = arith.constant 127 : index
    %21 = vector.load %arg1[%c0_15, %c0_16, %c127] : memref<1x4x582xbf16, #tpu.memory_space<vmem>>, vector<1x4x384xbf16>
    %22 = vector.shape_cast %21 : vector<1x4x384xbf16> to vector<4x384xbf16>
    %23 = arith.maximumf %20, %22 : vector<4x384xbf16>
    %c0_17 = arith.constant 0 : index
    %c0_18 = arith.constant 0 : index
    %c128_19 = arith.constant 128 : index
    %24 = vector.load %arg1[%c0_17, %c0_18, %c128_19] : memref<1x4x582xbf16, #tpu.memory_space<vmem>>, vector<1x4x384xbf16>
    %25 = vector.shape_cast %24 : vector<1x4x384xbf16> to vector<4x384xbf16>
    %26 = arith.maximumf %23, %25 : vector<4x384xbf16>
    %c0_20 = arith.constant 0 : index
    %c0_21 = arith.constant 0 : index
    %c129 = arith.constant 129 : index
    %27 = vector.load %arg1[%c0_20, %c0_21, %c129] : memref<1x4x582xbf16, #tpu.memory_space<vmem>>, vector<1x4x384xbf16>
    %28 = vector.shape_cast %27 : vector<1x4x384xbf16> to vector<4x384xbf16>
    %29 = arith.maximumf %26, %28 : vector<4x384xbf16>
    %c0_22 = arith.constant 0 : index
    %c0_23 = arith.constant 0 : index
    %c151 = arith.constant 151 : index
    %30 = vector.load %arg1[%c0_22, %c0_23, %c151] : memref<1x4x582xbf16, #tpu.memory_space<vmem>>, vector<1x4x384xbf16>
    %31 = vector.shape_cast %30 : vector<1x4x384xbf16> to vector<4x384xbf16>
    %32 = arith.maximumf %29, %31 : vector<4x384xbf16>
    %c0_24 = arith.constant 0 : index
    %c0_25 = arith.constant 0 : index
    %c152 = arith.constant 152 : index
    %33 = vector.load %arg1[%c0_24, %c0_25, %c152] : memref<1x4x582xbf16, #tpu.memory_space<vmem>>, vector<1x4x384xbf16>
    %34 = vector.shape_cast %33 : vector<1x4x384xbf16> to vector<4x384xbf16>
    %35 = arith.maximumf %32, %34 : vector<4x384xbf16>
    %c0_26 = arith.constant 0 : index
    %c0_27 = arith.constant 0 : index
    %c153 = arith.constant 153 : index
    %36 = vector.load %arg1[%c0_26, %c0_27, %c153] : memref<1x4x582xbf16, #tpu.memory_space<vmem>>, vector<1x4x384xbf16>
    %37 = vector.shape_cast %36 : vector<1x4x384xbf16> to vector<4x384xbf16>
    %38 = arith.maximumf %35, %37 : vector<4x384xbf16>
    %c0_28 = arith.constant 0 : index
    %c0_29 = arith.constant 0 : index
    %c0_30 = arith.constant 0 : index
    %39 = vector.load %arg4[%c0_28, %c0_29, %c0_30] : memref<1x8x4xbf16, #tpu.memory_space<vmem>>, vector<1x8x4xbf16>
    %40 = vector.shape_cast %39 : vector<1x8x4xbf16> to vector<8x4xbf16>
    %cst_31 = arith.constant dense<0.000000e+00> : vector<8x384xf32>
    %41 = tpu.matmul %40, %38, %cst_31 {dimension_numbers = #tpu.dot_dimension_numbers<[1], [0], [0], [1], [0, 0, 1, 1], [], []>} : vector<8x4xbf16>, vector<4x384xbf16>, vector<8x384xf32> -> vector<8x384xf32>
    %c0_32 = arith.constant 0 : index
    %c0_33 = arith.constant 0 : index
    %42 = vector.load %arg5[%c0_32, %c0_33] : memref<8x1xf32, #tpu.memory_space<vmem>>, vector<8x1xf32>
    %43 = vector.broadcast %42 : vector<8x1xf32> to vector<8x384xf32>
    %44 = arith.addf %41, %43 : vector<8x384xf32>
    %cst_34 = arith.constant 0.000000e+00 : f32
    %45 = vector.broadcast %cst_34 : f32 to vector<8x384xf32>
    %46 = arith.maximumf %44, %45 : vector<8x384xf32>
    %47 = vector.broadcast %0 : vector<1x384xf32> to vector<8x384xf32>
    %48 = arith.mulf %46, %47 : vector<8x384xf32>
    %c0_35 = arith.constant 0 : index
    %c0_36 = arith.constant 0 : index
    %c0_37 = arith.constant 0 : index
    %49 = vector.load %arg14[%c0_35, %c0_36, %c0_37] : memref<1x8x384xf32, #tpu.memory_space<vmem>>, vector<1x8x384xf32>
    %50 = vector.shape_cast %49 : vector<1x8x384xf32> to vector<8x384xf32>
    %51 = vector.shape_cast %48 : vector<8x384xf32> to vector<1x8x384xf32>
    tpu.vector_store %arg14[%c0_35, %c0_36, %c0_37], %51 {strides = array<i32>} : memref<1x8x384xf32, #tpu.memory_space<vmem>>, vector<1x8x384xf32>,
    %52 = vector.extract_strided_slice %12 {offsets = [0, 0], sizes = [8, 384], strides = [1, 1]} : vector<16x384xf32> to vector<8x384xf32>
    %c0_38 = arith.constant 0 : index
    %c0_39 = arith.constant 0 : index
    %c0_40 = arith.constant 0 : index
    %53 = vector.load %arg11[%c0_38, %c0_39, %c0_40] : memref<1x8x384xf32, #tpu.memory_space<vmem>>, vector<1x8x384xf32>
    %54 = vector.shape_cast %53 : vector<1x8x384xf32> to vector<8x384xf32>
    %55 = vector.shape_cast %52 : vector<8x384xf32> to vector<1x8x384xf32>
    tpu.vector_store %arg11[%c0_38, %c0_39, %c0_40], %55 {strides = array<i32>} : memref<1x8x384xf32, #tpu.memory_space<vmem>>, vector<1x8x384xf32>,
    %cst_41 = arith.constant 0.000000e+00 : bf16
    %56 = vector.broadcast %cst_41 : bf16 to vector<4x582xbf16>
    %c0_42 = arith.constant 0 : index
    %c0_43 = arith.constant 0 : index
    %57 = vector.load %arg15[%c0_42, %c0_43] : memref<4x582xbf16, #tpu.memory_space<vmem>>, vector<4x582xbf16>
    tpu.vector_store %arg15[%c0_42, %c0_43], %56 {strides = array<i32>} : memref<4x582xbf16, #tpu.memory_space<vmem>>, vector<4x582xbf16>,
    %58 = vector.extract_strided_slice %12 {offsets = [8, 0], sizes = [4, 384], strides = [1, 1]} : vector<16x384xf32> to vector<4x384xf32>
    %59 = arith.truncf %58 : vector<4x384xf32> to vector<4x384xbf16>
    %c0_44 = arith.constant 0 : index
    %c128_45 = arith.constant 128 : index
    %60 = vector.load %arg15[%c0_44, %c128_45] : memref<4x582xbf16, #tpu.memory_space<vmem>>, vector<4x384xbf16>
    tpu.vector_store %arg15[%c0_44, %c128_45], %59 {strides = array<i32>} : memref<4x582xbf16, #tpu.memory_space<vmem>>, vector<4x384xbf16>,
    %cst_46 = arith.constant 0.000000e+00 : bf16
    %61 = vector.broadcast %cst_46 : bf16 to vector<4x582xbf16>
    %c0_47 = arith.constant 0 : index
    %c0_48 = arith.constant 0 : index
    %62 = vector.load %arg16[%c0_47, %c0_48] : memref<4x582xbf16, #tpu.memory_space<vmem>>, vector<4x582xbf16>
    tpu.vector_store %arg16[%c0_47, %c0_48], %61 {strides = array<i32>} : memref<4x582xbf16, #tpu.memory_space<vmem>>, vector<4x582xbf16>,
    %63 = vector.extract_strided_slice %12 {offsets = [12, 0], sizes = [4, 384], strides = [1, 1]} : vector<16x384xf32> to vector<4x384xf32>
    %64 = arith.truncf %63 : vector<4x384xf32> to vector<4x384xbf16>
    %c0_49 = arith.constant 0 : index
    %c128_50 = arith.constant 128 : index
    %65 = vector.load %arg16[%c0_49, %c128_50] : memref<4x582xbf16, #tpu.memory_space<vmem>>, vector<4x384xbf16>
    tpu.vector_store %arg16[%c0_49, %c128_50], %64 {strides = array<i32>} : memref<4x582xbf16, #tpu.memory_space<vmem>>, vector<4x384xbf16>,
    %c0_51 = arith.constant 0 : index
    %c103_52 = arith.constant 103 : index
    %66 = vector.load %arg15[%c0_51, %c103_52] : memref<4x582xbf16, #tpu.memory_space<vmem>>, vector<4x384xbf16>
    %c0_53 = arith.constant 0 : index
    %c0_54 = arith.constant 0 : index
    %c0_55 = arith.constant 0 : index
    %67 = vector.load %arg6[%c0_53, %c0_54, %c0_55] : memref<9x8x4xbf16, #tpu.memory_space<vmem>>, vector<1x8x4xbf16>
    %68 = vector.shape_cast %67 : vector<1x8x4xbf16> to vector<8x4xbf16>
    %cst_56 = arith.constant dense<0.000000e+00> : vector<8x384xf32>
    %69 = tpu.matmul %68, %66, %cst_56 {dimension_numbers = #tpu.dot_dimension_numbers<[1], [0], [0], [1], [0, 0, 1, 1], [], []>} : vector<8x4xbf16>, vector<4x384xbf16>, vector<8x384xf32> -> vector<8x384xf32>
    %c0_57 = arith.constant 0 : index
    %c104_58 = arith.constant 104 : index
    %70 = vector.load %arg15[%c0_57, %c104_58] : memref<4x582xbf16, #tpu.memory_space<vmem>>, vector<4x384xbf16>
    %c1 = arith.constant 1 : index
    %c0_59 = arith.constant 0 : index
    %c0_60 = arith.constant 0 : index
    %71 = vector.load %arg6[%c1, %c0_59, %c0_60] : memref<9x8x4xbf16, #tpu.memory_space<vmem>>, vector<1x8x4xbf16>
    %72 = vector.shape_cast %71 : vector<1x8x4xbf16> to vector<8x4xbf16>
    %cst_61 = arith.constant dense<0.000000e+00> : vector<8x384xf32>
    %73 = tpu.matmul %72, %70, %cst_61 {dimension_numbers = #tpu.dot_dimension_numbers<[1], [0], [0], [1], [0, 0, 1, 1], [], []>} : vector<8x4xbf16>, vector<4x384xbf16>, vector<8x384xf32> -> vector<8x384xf32>
    %74 = arith.addf %69, %73 : vector<8x384xf32>
    %c0_62 = arith.constant 0 : index
    %c105_63 = arith.constant 105 : index
    %75 = vector.load %arg15[%c0_62, %c105_63] : memref<4x582xbf16, #tpu.memory_space<vmem>>, vector<4x384xbf16>
    %c2 = arith.constant 2 : index
    %c0_64 = arith.constant 0 : index
    %c0_65 = arith.constant 0 : index
    %76 = vector.load %arg6[%c2, %c0_64, %c0_65] : memref<9x8x4xbf16, #tpu.memory_space<vmem>>, vector<1x8x4xbf16>
    %77 = vector.shape_cast %76 : vector<1x8x4xbf16> to vector<8x4xbf16>
    %cst_66 = arith.constant dense<0.000000e+00> : vector<8x384xf32>
    %78 = tpu.matmul %77, %75, %cst_66 {dimension_numbers = #tpu.dot_dimension_numbers<[1], [0], [0], [1], [0, 0, 1, 1], [], []>} : vector<8x4xbf16>, vector<4x384xbf16>, vector<8x384xf32> -> vector<8x384xf32>
    %79 = arith.addf %74, %78 : vector<8x384xf32>
    %c0_67 = arith.constant 0 : index
    %c127_68 = arith.constant 127 : index
    %80 = vector.load %arg15[%c0_67, %c127_68] : memref<4x582xbf16, #tpu.memory_space<vmem>>, vector<4x384xbf16>
    %c3 = arith.constant 3 : index
    %c0_69 = arith.constant 0 : index
    %c0_70 = arith.constant 0 : index
    %81 = vector.load %arg6[%c3, %c0_69, %c0_70] : memref<9x8x4xbf16, #tpu.memory_space<vmem>>, vector<1x8x4xbf16>
    %82 = vector.shape_cast %81 : vector<1x8x4xbf16> to vector<8x4xbf16>
    %cst_71 = arith.constant dense<0.000000e+00> : vector<8x384xf32>
    %83 = tpu.matmul %82, %80, %cst_71 {dimension_numbers = #tpu.dot_dimension_numbers<[1], [0], [0], [1], [0, 0, 1, 1], [], []>} : vector<8x4xbf16>, vector<4x384xbf16>, vector<8x384xf32> -> vector<8x384xf32>
    %84 = arith.addf %79, %83 : vector<8x384xf32>
    %c0_72 = arith.constant 0 : index
    %c128_73 = arith.constant 128 : index
    %85 = vector.load %arg15[%c0_72, %c128_73] : memref<4x582xbf16, #tpu.memory_space<vmem>>, vector<4x384xbf16>
    %c4 = arith.constant 4 : index
    %c0_74 = arith.constant 0 : index
    %c0_75 = arith.constant 0 : index
    %86 = vector.load %arg6[%c4, %c0_74, %c0_75] : memref<9x8x4xbf16, #tpu.memory_space<vmem>>, vector<1x8x4xbf16>
    %87 = vector.shape_cast %86 : vector<1x8x4xbf16> to vector<8x4xbf16>
    %cst_76 = arith.constant dense<0.000000e+00> : vector<8x384xf32>
    %88 = tpu.matmul %87, %85, %cst_76 {dimension_numbers = #tpu.dot_dimension_numbers<[1], [0], [0], [1], [0, 0, 1, 1], [], []>} : vector<8x4xbf16>, vector<4x384xbf16>, vector<8x384xf32> -> vector<8x384xf32>
    %89 = arith.addf %84, %88 : vector<8x384xf32>
    %c0_77 = arith.constant 0 : index
    %c129_78 = arith.constant 129 : index
    %90 = vector.load %arg15[%c0_77, %c129_78] : memref<4x582xbf16, #tpu.memory_space<vmem>>, vector<4x384xbf16>
    %c5 = arith.constant 5 : index
    %c0_79 = arith.constant 0 : index
    %c0_80 = arith.constant 0 : index
    %91 = vector.load %arg6[%c5, %c0_79, %c0_80] : memref<9x8x4xbf16, #tpu.memory_space<vmem>>, vector<1x8x4xbf16>
    %92 = vector.shape_cast %91 : vector<1x8x4xbf16> to vector<8x4xbf16>
    %cst_81 = arith.constant dense<0.000000e+00> : vector<8x384xf32>
    %93 = tpu.matmul %92, %90, %cst_81 {dimension_numbers = #tpu.dot_dimension_numbers<[1], [0], [0], [1], [0, 0, 1, 1], [], []>} : vector<8x4xbf16>, vector<4x384xbf16>, vector<8x384xf32> -> vector<8x384xf32>
    %94 = arith.addf %89, %93 : vector<8x384xf32>
    %c0_82 = arith.constant 0 : index
    %c151_83 = arith.constant 151 : index
    %95 = vector.load %arg15[%c0_82, %c151_83] : memref<4x582xbf16, #tpu.memory_space<vmem>>, vector<4x384xbf16>
    %c6 = arith.constant 6 : index
    %c0_84 = arith.constant 0 : index
    %c0_85 = arith.constant 0 : index
    %96 = vector.load %arg6[%c6, %c0_84, %c0_85] : memref<9x8x4xbf16, #tpu.memory_space<vmem>>, vector<1x8x4xbf16>
    %97 = vector.shape_cast %96 : vector<1x8x4xbf16> to vector<8x4xbf16>
    %cst_86 = arith.constant dense<0.000000e+00> : vector<8x384xf32>
    %98 = tpu.matmul %97, %95, %cst_86 {dimension_numbers = #tpu.dot_dimension_numbers<[1], [0], [0], [1], [0, 0, 1, 1], [], []>} : vector<8x4xbf16>, vector<4x384xbf16>, vector<8x384xf32> -> vector<8x384xf32>
    %99 = arith.addf %94, %98 : vector<8x384xf32>
    %c0_87 = arith.constant 0 : index
    %c152_88 = arith.constant 152 : index
    %100 = vector.load %arg15[%c0_87, %c152_88] : memref<4x582xbf16, #tpu.memory_space<vmem>>, vector<4x384xbf16>
    %c7 = arith.constant 7 : index
    %c0_89 = arith.constant 0 : index
    %c0_90 = arith.constant 0 : index
    %101 = vector.load %arg6[%c7, %c0_89, %c0_90] : memref<9x8x4xbf16, #tpu.memory_space<vmem>>, vector<1x8x4xbf16>
    %102 = vector.shape_cast %101 : vector<1x8x4xbf16> to vector<8x4xbf16>
    %cst_91 = arith.constant dense<0.000000e+00> : vector<8x384xf32>
    %103 = tpu.matmul %102, %100, %cst_91 {dimension_numbers = #tpu.dot_dimension_numbers<[1], [0], [0], [1], [0, 0, 1, 1], [], []>} : vector<8x4xbf16>, vector<4x384xbf16>, vector<8x384xf32> -> vector<8x384xf32>
    %104 = arith.addf %99, %103 : vector<8x384xf32>
    %c0_92 = arith.constant 0 : index
    %c153_93 = arith.constant 153 : index
    %105 = vector.load %arg15[%c0_92, %c153_93] : memref<4x582xbf16, #tpu.memory_space<vmem>>, vector<4x384xbf16>
    %c8 = arith.constant 8 : index
    %c0_94 = arith.constant 0 : index
    %c0_95 = arith.constant 0 : index
    %106 = vector.load %arg6[%c8, %c0_94, %c0_95] : memref<9x8x4xbf16, #tpu.memory_space<vmem>>, vector<1x8x4xbf16>
    %107 = vector.shape_cast %106 : vector<1x8x4xbf16> to vector<8x4xbf16>
    %cst_96 = arith.constant dense<0.000000e+00> : vector<8x384xf32>
    %108 = tpu.matmul %107, %105, %cst_96 {dimension_numbers = #tpu.dot_dimension_numbers<[1], [0], [0], [1], [0, 0, 1, 1], [], []>} : vector<8x4xbf16>, vector<4x384xbf16>, vector<8x384xf32> -> vector<8x384xf32>
    %109 = arith.addf %104, %108 : vector<8x384xf32>
    %c0_97 = arith.constant 0 : index
    %c0_98 = arith.constant 0 : index
    %110 = vector.load %arg7[%c0_97, %c0_98] : memref<8x1xf32, #tpu.memory_space<vmem>>, vector<8x1xf32>
    %111 = vector.broadcast %110 : vector<8x1xf32> to vector<8x384xf32>
    %112 = arith.addf %109, %111 : vector<8x384xf32>
    %cst_99 = arith.constant 0.000000e+00 : f32
    %113 = vector.broadcast %cst_99 : f32 to vector<8x384xf32>
    %114 = arith.maximumf %112, %113 : vector<8x384xf32>
    %c0_100 = arith.constant 0 : index
    %c0_101 = arith.constant 0 : index
    %c0_102 = arith.constant 0 : index
    %115 = vector.load %arg12[%c0_100, %c0_101, %c0_102] : memref<1x8x384xf32, #tpu.memory_space<vmem>>, vector<1x8x384xf32>
    %116 = vector.shape_cast %115 : vector<1x8x384xf32> to vector<8x384xf32>
    %117 = vector.shape_cast %114 : vector<8x384xf32> to vector<1x8x384xf32>
    tpu.vector_store %arg12[%c0_100, %c0_101, %c0_102], %117 {strides = array<i32>} : memref<1x8x384xf32, #tpu.memory_space<vmem>>, vector<1x8x384xf32>,
    %c0_103 = arith.constant 0 : index
    %c78 = arith.constant 78 : index
    %118 = vector.load %arg16[%c0_103, %c78] : memref<4x582xbf16, #tpu.memory_space<vmem>>, vector<4x384xbf16>
    %c0_104 = arith.constant 0 : index
    %c0_105 = arith.constant 0 : index
    %c0_106 = arith.constant 0 : index
    %119 = vector.load %arg8[%c0_104, %c0_105, %c0_106] : memref<25x8x4xbf16, #tpu.memory_space<vmem>>, vector<1x8x4xbf16>
    %120 = vector.shape_cast %119 : vector<1x8x4xbf16> to vector<8x4xbf16>
    %cst_107 = arith.constant dense<0.000000e+00> : vector<8x384xf32>
    %121 = tpu.matmul %120, %118, %cst_107 {dimension_numbers = #tpu.dot_dimension_numbers<[1], [0], [0], [1], [0, 0, 1, 1], [], []>} : vector<8x4xbf16>, vector<4x384xbf16>, vector<8x384xf32> -> vector<8x384xf32>
    %c0_108 = arith.constant 0 : index
    %c79 = arith.constant 79 : index
    %122 = vector.load %arg16[%c0_108, %c79] : memref<4x582xbf16, #tpu.memory_space<vmem>>, vector<4x384xbf16>
    %c1_109 = arith.constant 1 : index
    %c0_110 = arith.constant 0 : index
    %c0_111 = arith.constant 0 : index
    %123 = vector.load %arg8[%c1_109, %c0_110, %c0_111] : memref<25x8x4xbf16, #tpu.memory_space<vmem>>, vector<1x8x4xbf16>
    %124 = vector.shape_cast %123 : vector<1x8x4xbf16> to vector<8x4xbf16>
    %cst_112 = arith.constant dense<0.000000e+00> : vector<8x384xf32>
    %125 = tpu.matmul %124, %122, %cst_112 {dimension_numbers = #tpu.dot_dimension_numbers<[1], [0], [0], [1], [0, 0, 1, 1], [], []>} : vector<8x4xbf16>, vector<4x384xbf16>, vector<8x384xf32> -> vector<8x384xf32>
    %126 = arith.addf %121, %125 : vector<8x384xf32>
    %c0_113 = arith.constant 0 : index
    %c80 = arith.constant 80 : index
    %127 = vector.load %arg16[%c0_113, %c80] : memref<4x582xbf16, #tpu.memory_space<vmem>>, vector<4x384xbf16>
    %c2_114 = arith.constant 2 : index
    %c0_115 = arith.constant 0 : index
    %c0_116 = arith.constant 0 : index
    %128 = vector.load %arg8[%c2_114, %c0_115, %c0_116] : memref<25x8x4xbf16, #tpu.memory_space<vmem>>, vector<1x8x4xbf16>
    %129 = vector.shape_cast %128 : vector<1x8x4xbf16> to vector<8x4xbf16>
    %cst_117 = arith.constant dense<0.000000e+00> : vector<8x384xf32>
    %130 = tpu.matmul %129, %127, %cst_117 {dimension_numbers = #tpu.dot_dimension_numbers<[1], [0], [0], [1], [0, 0, 1, 1], [], []>} : vector<8x4xbf16>, vector<4x384xbf16>, vector<8x384xf32> -> vector<8x384xf32>
    %131 = arith.addf %126, %130 : vector<8x384xf32>
    %c0_118 = arith.constant 0 : index
    %c81 = arith.constant 81 : index
    %132 = vector.load %arg16[%c0_118, %c81] : memref<4x582xbf16, #tpu.memory_space<vmem>>, vector<4x384xbf16>
    %c3_119 = arith.constant 3 : index
    %c0_120 = arith.constant 0 : index
    %c0_121 = arith.constant 0 : index
    %133 = vector.load %arg8[%c3_119, %c0_120, %c0_121] : memref<25x8x4xbf16, #tpu.memory_space<vmem>>, vector<1x8x4xbf16>
    %134 = vector.shape_cast %133 : vector<1x8x4xbf16> to vector<8x4xbf16>
    %cst_122 = arith.constant dense<0.000000e+00> : vector<8x384xf32>
    %135 = tpu.matmul %134, %132, %cst_122 {dimension_numbers = #tpu.dot_dimension_numbers<[1], [0], [0], [1], [0, 0, 1, 1], [], []>} : vector<8x4xbf16>, vector<4x384xbf16>, vector<8x384xf32> -> vector<8x384xf32>
    %136 = arith.addf %131, %135 : vector<8x384xf32>
    %c0_123 = arith.constant 0 : index
    %c82 = arith.constant 82 : index
    %137 = vector.load %arg16[%c0_123, %c82] : memref<4x582xbf16, #tpu.memory_space<vmem>>, vector<4x384xbf16>
    %c4_124 = arith.constant 4 : index
    %c0_125 = arith.constant 0 : index
    %c0_126 = arith.constant 0 : index
    %138 = vector.load %arg8[%c4_124, %c0_125, %c0_126] : memref<25x8x4xbf16, #tpu.memory_space<vmem>>, vector<1x8x4xbf16>
    %139 = vector.shape_cast %138 : vector<1x8x4xbf16> to vector<8x4xbf16>
    %cst_127 = arith.constant dense<0.000000e+00> : vector<8x384xf32>
    %140 = tpu.matmul %139, %137, %cst_127 {dimension_numbers = #tpu.dot_dimension_numbers<[1], [0], [0], [1], [0, 0, 1, 1], [], []>} : vector<8x4xbf16>, vector<4x384xbf16>, vector<8x384xf32> -> vector<8x384xf32>
    %141 = arith.addf %136, %140 : vector<8x384xf32>
    %c0_128 = arith.constant 0 : index
    %c102 = arith.constant 102 : index
    %142 = vector.load %arg16[%c0_128, %c102] : memref<4x582xbf16, #tpu.memory_space<vmem>>, vector<4x384xbf16>
    %c5_129 = arith.constant 5 : index
    %c0_130 = arith.constant 0 : index
    %c0_131 = arith.constant 0 : index
    %143 = vector.load %arg8[%c5_129, %c0_130, %c0_131] : memref<25x8x4xbf16, #tpu.memory_space<vmem>>, vector<1x8x4xbf16>
    %144 = vector.shape_cast %143 : vector<1x8x4xbf16> to vector<8x4xbf16>
    %cst_132 = arith.constant dense<0.000000e+00> : vector<8x384xf32>
    %145 = tpu.matmul %144, %142, %cst_132 {dimension_numbers = #tpu.dot_dimension_numbers<[1], [0], [0], [1], [0, 0, 1, 1], [], []>} : vector<8x4xbf16>, vector<4x384xbf16>, vector<8x384xf32> -> vector<8x384xf32>
    %146 = arith.addf %141, %145 : vector<8x384xf32>
    %c0_133 = arith.constant 0 : index
    %c103_134 = arith.constant 103 : index
    %147 = vector.load %arg16[%c0_133, %c103_134] : memref<4x582xbf16, #tpu.memory_space<vmem>>, vector<4x384xbf16>
    %c6_135 = arith.constant 6 : index
    %c0_136 = arith.constant 0 : index
    %c0_137 = arith.constant 0 : index
    %148 = vector.load %arg8[%c6_135, %c0_136, %c0_137] : memref<25x8x4xbf16, #tpu.memory_space<vmem>>, vector<1x8x4xbf16>
    %149 = vector.shape_cast %148 : vector<1x8x4xbf16> to vector<8x4xbf16>
    %cst_138 = arith.constant dense<0.000000e+00> : vector<8x384xf32>
    %150 = tpu.matmul %149, %147, %cst_138 {dimension_numbers = #tpu.dot_dimension_numbers<[1], [0], [0], [1], [0, 0, 1, 1], [], []>} : vector<8x4xbf16>, vector<4x384xbf16>, vector<8x384xf32> -> vector<8x384xf32>
    %151 = arith.addf %146, %150 : vector<8x384xf32>
    %c0_139 = arith.constant 0 : index
    %c104_140 = arith.constant 104 : index
    %152 = vector.load %arg16[%c0_139, %c104_140] : memref<4x582xbf16, #tpu.memory_space<vmem>>, vector<4x384xbf16>
    %c7_141 = arith.constant 7 : index
    %c0_142 = arith.constant 0 : index
    %c0_143 = arith.constant 0 : index
    %153 = vector.load %arg8[%c7_141, %c0_142, %c0_143] : memref<25x8x4xbf16, #tpu.memory_space<vmem>>, vector<1x8x4xbf16>
    %154 = vector.shape_cast %153 : vector<1x8x4xbf16> to vector<8x4xbf16>
    %cst_144 = arith.constant dense<0.000000e+00> : vector<8x384xf32>
    %155 = tpu.matmul %154, %152, %cst_144 {dimension_numbers = #tpu.dot_dimension_numbers<[1], [0], [0], [1], [0, 0, 1, 1], [], []>} : vector<8x4xbf16>, vector<4x384xbf16>, vector<8x384xf32> -> vector<8x384xf32>
    %156 = arith.addf %151, %155 : vector<8x384xf32>
    %c0_145 = arith.constant 0 : index
    %c105_146 = arith.constant 105 : index
    %157 = vector.load %arg16[%c0_145, %c105_146] : memref<4x582xbf16, #tpu.memory_space<vmem>>, vector<4x384xbf16>
    %c8_147 = arith.constant 8 : index
    %c0_148 = arith.constant 0 : index
    %c0_149 = arith.constant 0 : index
    %158 = vector.load %arg8[%c8_147, %c0_148, %c0_149] : memref<25x8x4xbf16, #tpu.memory_space<vmem>>, vector<1x8x4xbf16>
    %159 = vector.shape_cast %158 : vector<1x8x4xbf16> to vector<8x4xbf16>
    %cst_150 = arith.constant dense<0.000000e+00> : vector<8x384xf32>
    %160 = tpu.matmul %159, %157, %cst_150 {dimension_numbers = #tpu.dot_dimension_numbers<[1], [0], [0], [1], [0, 0, 1, 1], [], []>} : vector<8x4xbf16>, vector<4x384xbf16>, vector<8x384xf32> -> vector<8x384xf32>
    %161 = arith.addf %156, %160 : vector<8x384xf32>
    %c0_151 = arith.constant 0 : index
    %c106 = arith.constant 106 : index
    %162 = vector.load %arg16[%c0_151, %c106] : memref<4x582xbf16, #tpu.memory_space<vmem>>, vector<4x384xbf16>
    %c9 = arith.constant 9 : index
    %c0_152 = arith.constant 0 : index
    %c0_153 = arith.constant 0 : index
    %163 = vector.load %arg8[%c9, %c0_152, %c0_153] : memref<25x8x4xbf16, #tpu.memory_space<vmem>>, vector<1x8x4xbf16>
    %164 = vector.shape_cast %163 : vector<1x8x4xbf16> to vector<8x4xbf16>
    %cst_154 = arith.constant dense<0.000000e+00> : vector<8x384xf32>
    %165 = tpu.matmul %164, %162, %cst_154 {dimension_numbers = #tpu.dot_dimension_numbers<[1], [0], [0], [1], [0, 0, 1, 1], [], []>} : vector<8x4xbf16>, vector<4x384xbf16>, vector<8x384xf32> -> vector<8x384xf32>
    %166 = arith.addf %161, %165 : vector<8x384xf32>
    %c0_155 = arith.constant 0 : index
    %c126 = arith.constant 126 : index
    %167 = vector.load %arg16[%c0_155, %c126] : memref<4x582xbf16, #tpu.memory_space<vmem>>, vector<4x384xbf16>
    %c10 = arith.constant 10 : index
    %c0_156 = arith.constant 0 : index
    %c0_157 = arith.constant 0 : index
    %168 = vector.load %arg8[%c10, %c0_156, %c0_157] : memref<25x8x4xbf16, #tpu.memory_space<vmem>>, vector<1x8x4xbf16>
    %169 = vector.shape_cast %168 : vector<1x8x4xbf16> to vector<8x4xbf16>
    %cst_158 = arith.constant dense<0.000000e+00> : vector<8x384xf32>
    %170 = tpu.matmul %169, %167, %cst_158 {dimension_numbers = #tpu.dot_dimension_numbers<[1], [0], [0], [1], [0, 0, 1, 1], [], []>} : vector<8x4xbf16>, vector<4x384xbf16>, vector<8x384xf32> -> vector<8x384xf32>
    %171 = arith.addf %166, %170 : vector<8x384xf32>
    %c0_159 = arith.constant 0 : index
    %c127_160 = arith.constant 127 : index
    %172 = vector.load %arg16[%c0_159, %c127_160] : memref<4x582xbf16, #tpu.memory_space<vmem>>, vector<4x384xbf16>
    %c11 = arith.constant 11 : index
    %c0_161 = arith.constant 0 : index
    %c0_162 = arith.constant 0 : index
    %173 = vector.load %arg8[%c11, %c0_161, %c0_162] : memref<25x8x4xbf16, #tpu.memory_space<vmem>>, vector<1x8x4xbf16>
    %174 = vector.shape_cast %173 : vector<1x8x4xbf16> to vector<8x4xbf16>
    %cst_163 = arith.constant dense<0.000000e+00> : vector<8x384xf32>
    %175 = tpu.matmul %174, %172, %cst_163 {dimension_numbers = #tpu.dot_dimension_numbers<[1], [0], [0], [1], [0, 0, 1, 1], [], []>} : vector<8x4xbf16>, vector<4x384xbf16>, vector<8x384xf32> -> vector<8x384xf32>
    %176 = arith.addf %171, %175 : vector<8x384xf32>
    %c0_164 = arith.constant 0 : index
    %c128_165 = arith.constant 128 : index
    %177 = vector.load %arg16[%c0_164, %c128_165] : memref<4x582xbf16, #tpu.memory_space<vmem>>, vector<4x384xbf16>
    %c12 = arith.constant 12 : index
    %c0_166 = arith.constant 0 : index
    %c0_167 = arith.constant 0 : index
    %178 = vector.load %arg8[%c12, %c0_166, %c0_167] : memref<25x8x4xbf16, #tpu.memory_space<vmem>>, vector<1x8x4xbf16>
    %179 = vector.shape_cast %178 : vector<1x8x4xbf16> to vector<8x4xbf16>
    %cst_168 = arith.constant dense<0.000000e+00> : vector<8x384xf32>
    %180 = tpu.matmul %179, %177, %cst_168 {dimension_numbers = #tpu.dot_dimension_numbers<[1], [0], [0], [1], [0, 0, 1, 1], [], []>} : vector<8x4xbf16>, vector<4x384xbf16>, vector<8x384xf32> -> vector<8x384xf32>
    %181 = arith.addf %176, %180 : vector<8x384xf32>
    %c0_169 = arith.constant 0 : index
    %c129_170 = arith.constant 129 : index
    %182 = vector.load %arg16[%c0_169, %c129_170] : memref<4x582xbf16, #tpu.memory_space<vmem>>, vector<4x384xbf16>
    %c13 = arith.constant 13 : index
    %c0_171 = arith.constant 0 : index
    %c0_172 = arith.constant 0 : index
    %183 = vector.load %arg8[%c13, %c0_171, %c0_172] : memref<25x8x4xbf16, #tpu.memory_space<vmem>>, vector<1x8x4xbf16>
    %184 = vector.shape_cast %183 : vector<1x8x4xbf16> to vector<8x4xbf16>
    %cst_173 = arith.constant dense<0.000000e+00> : vector<8x384xf32>
    %185 = tpu.matmul %184, %182, %cst_173 {dimension_numbers = #tpu.dot_dimension_numbers<[1], [0], [0], [1], [0, 0, 1, 1], [], []>} : vector<8x4xbf16>, vector<4x384xbf16>, vector<8x384xf32> -> vector<8x384xf32>
    %186 = arith.addf %181, %185 : vector<8x384xf32>
    %c0_174 = arith.constant 0 : index
    %c130 = arith.constant 130 : index
    %187 = vector.load %arg16[%c0_174, %c130] : memref<4x582xbf16, #tpu.memory_space<vmem>>, vector<4x384xbf16>
    %c14 = arith.constant 14 : index
    %c0_175 = arith.constant 0 : index
    %c0_176 = arith.constant 0 : index
    %188 = vector.load %arg8[%c14, %c0_175, %c0_176] : memref<25x8x4xbf16, #tpu.memory_space<vmem>>, vector<1x8x4xbf16>
    %189 = vector.shape_cast %188 : vector<1x8x4xbf16> to vector<8x4xbf16>
    %cst_177 = arith.constant dense<0.000000e+00> : vector<8x384xf32>
    %190 = tpu.matmul %189, %187, %cst_177 {dimension_numbers = #tpu.dot_dimension_numbers<[1], [0], [0], [1], [0, 0, 1, 1], [], []>} : vector<8x4xbf16>, vector<4x384xbf16>, vector<8x384xf32> -> vector<8x384xf32>
    %191 = arith.addf %186, %190 : vector<8x384xf32>
    %c0_178 = arith.constant 0 : index
    %c150 = arith.constant 150 : index
    %192 = vector.load %arg16[%c0_178, %c150] : memref<4x582xbf16, #tpu.memory_space<vmem>>, vector<4x384xbf16>
    %c15 = arith.constant 15 : index
    %c0_179 = arith.constant 0 : index
    %c0_180 = arith.constant 0 : index
    %193 = vector.load %arg8[%c15, %c0_179, %c0_180] : memref<25x8x4xbf16, #tpu.memory_space<vmem>>, vector<1x8x4xbf16>
    %194 = vector.shape_cast %193 : vector<1x8x4xbf16> to vector<8x4xbf16>
    %cst_181 = arith.constant dense<0.000000e+00> : vector<8x384xf32>
    %195 = tpu.matmul %194, %192, %cst_181 {dimension_numbers = #tpu.dot_dimension_numbers<[1], [0], [0], [1], [0, 0, 1, 1], [], []>} : vector<8x4xbf16>, vector<4x384xbf16>, vector<8x384xf32> -> vector<8x384xf32>
    %196 = arith.addf %191, %195 : vector<8x384xf32>
    %c0_182 = arith.constant 0 : index
    %c151_183 = arith.constant 151 : index
    %197 = vector.load %arg16[%c0_182, %c151_183] : memref<4x582xbf16, #tpu.memory_space<vmem>>, vector<4x384xbf16>
    %c16 = arith.constant 16 : index
    %c0_184 = arith.constant 0 : index
    %c0_185 = arith.constant 0 : index
    %198 = vector.load %arg8[%c16, %c0_184, %c0_185] : memref<25x8x4xbf16, #tpu.memory_space<vmem>>, vector<1x8x4xbf16>
    %199 = vector.shape_cast %198 : vector<1x8x4xbf16> to vector<8x4xbf16>
    %cst_186 = arith.constant dense<0.000000e+00> : vector<8x384xf32>
    %200 = tpu.matmul %199, %197, %cst_186 {dimension_numbers = #tpu.dot_dimension_numbers<[1], [0], [0], [1], [0, 0, 1, 1], [], []>} : vector<8x4xbf16>, vector<4x384xbf16>, vector<8x384xf32> -> vector<8x384xf32>
    %201 = arith.addf %196, %200 : vector<8x384xf32>
    %c0_187 = arith.constant 0 : index
    %c152_188 = arith.constant 152 : index
    %202 = vector.load %arg16[%c0_187, %c152_188] : memref<4x582xbf16, #tpu.memory_space<vmem>>, vector<4x384xbf16>
    %c17 = arith.constant 17 : index
    %c0_189 = arith.constant 0 : index
    %c0_190 = arith.constant 0 : index
    %203 = vector.load %arg8[%c17, %c0_189, %c0_190] : memref<25x8x4xbf16, #tpu.memory_space<vmem>>, vector<1x8x4xbf16>
    %204 = vector.shape_cast %203 : vector<1x8x4xbf16> to vector<8x4xbf16>
    %cst_191 = arith.constant dense<0.000000e+00> : vector<8x384xf32>
    %205 = tpu.matmul %204, %202, %cst_191 {dimension_numbers = #tpu.dot_dimension_numbers<[1], [0], [0], [1], [0, 0, 1, 1], [], []>} : vector<8x4xbf16>, vector<4x384xbf16>, vector<8x384xf32> -> vector<8x384xf32>
    %206 = arith.addf %201, %205 : vector<8x384xf32>
    %c0_192 = arith.constant 0 : index
    %c153_193 = arith.constant 153 : index
    %207 = vector.load %arg16[%c0_192, %c153_193] : memref<4x582xbf16, #tpu.memory_space<vmem>>, vector<4x384xbf16>
    %c18 = arith.constant 18 : index
    %c0_194 = arith.constant 0 : index
    %c0_195 = arith.constant 0 : index
    %208 = vector.load %arg8[%c18, %c0_194, %c0_195] : memref<25x8x4xbf16, #tpu.memory_space<vmem>>, vector<1x8x4xbf16>
    %209 = vector.shape_cast %208 : vector<1x8x4xbf16> to vector<8x4xbf16>
    %cst_196 = arith.constant dense<0.000000e+00> : vector<8x384xf32>
    %210 = tpu.matmul %209, %207, %cst_196 {dimension_numbers = #tpu.dot_dimension_numbers<[1], [0], [0], [1], [0, 0, 1, 1], [], []>} : vector<8x4xbf16>, vector<4x384xbf16>, vector<8x384xf32> -> vector<8x384xf32>
    %211 = arith.addf %206, %210 : vector<8x384xf32>
    %c0_197 = arith.constant 0 : index
    %c154 = arith.constant 154 : index
    %212 = vector.load %arg16[%c0_197, %c154] : memref<4x582xbf16, #tpu.memory_space<vmem>>, vector<4x384xbf16>
    %c19 = arith.constant 19 : index
    %c0_198 = arith.constant 0 : index
    %c0_199 = arith.constant 0 : index
    %213 = vector.load %arg8[%c19, %c0_198, %c0_199] : memref<25x8x4xbf16, #tpu.memory_space<vmem>>, vector<1x8x4xbf16>
    %214 = vector.shape_cast %213 : vector<1x8x4xbf16> to vector<8x4xbf16>
    %cst_200 = arith.constant dense<0.000000e+00> : vector<8x384xf32>
    %215 = tpu.matmul %214, %212, %cst_200 {dimension_numbers = #tpu.dot_dimension_numbers<[1], [0], [0], [1], [0, 0, 1, 1], [], []>} : vector<8x4xbf16>, vector<4x384xbf16>, vector<8x384xf32> -> vector<8x384xf32>
    %216 = arith.addf %211, %215 : vector<8x384xf32>
    %c0_201 = arith.constant 0 : index
    %c174 = arith.constant 174 : index
    %217 = vector.load %arg16[%c0_201, %c174] : memref<4x582xbf16, #tpu.memory_space<vmem>>, vector<4x384xbf16>
    %c20 = arith.constant 20 : index
    %c0_202 = arith.constant 0 : index
    %c0_203 = arith.constant 0 : index
    %218 = vector.load %arg8[%c20, %c0_202, %c0_203] : memref<25x8x4xbf16, #tpu.memory_space<vmem>>, vector<1x8x4xbf16>
    %219 = vector.shape_cast %218 : vector<1x8x4xbf16> to vector<8x4xbf16>
    %cst_204 = arith.constant dense<0.000000e+00> : vector<8x384xf32>
    %220 = tpu.matmul %219, %217, %cst_204 {dimension_numbers = #tpu.dot_dimension_numbers<[1], [0], [0], [1], [0, 0, 1, 1], [], []>} : vector<8x4xbf16>, vector<4x384xbf16>, vector<8x384xf32> -> vector<8x384xf32>
    %221 = arith.addf %216, %220 : vector<8x384xf32>
    %c0_205 = arith.constant 0 : index
    %c175 = arith.constant 175 : index
    %222 = vector.load %arg16[%c0_205, %c175] : memref<4x582xbf16, #tpu.memory_space<vmem>>, vector<4x384xbf16>
    %c21 = arith.constant 21 : index
    %c0_206 = arith.constant 0 : index
    %c0_207 = arith.constant 0 : index
    %223 = vector.load %arg8[%c21, %c0_206, %c0_207] : memref<25x8x4xbf16, #tpu.memory_space<vmem>>, vector<1x8x4xbf16>
    %224 = vector.shape_cast %223 : vector<1x8x4xbf16> to vector<8x4xbf16>
    %cst_208 = arith.constant dense<0.000000e+00> : vector<8x384xf32>
    %225 = tpu.matmul %224, %222, %cst_208 {dimension_numbers = #tpu.dot_dimension_numbers<[1], [0], [0], [1], [0, 0, 1, 1], [], []>} : vector<8x4xbf16>, vector<4x384xbf16>, vector<8x384xf32> -> vector<8x384xf32>
    %226 = arith.addf %221, %225 : vector<8x384xf32>
    %c0_209 = arith.constant 0 : index
    %c176 = arith.constant 176 : index
    %227 = vector.load %arg16[%c0_209, %c176] : memref<4x582xbf16, #tpu.memory_space<vmem>>, vector<4x384xbf16>
    %c22 = arith.constant 22 : index
    %c0_210 = arith.constant 0 : index
    %c0_211 = arith.constant 0 : index
    %228 = vector.load %arg8[%c22, %c0_210, %c0_211] : memref<25x8x4xbf16, #tpu.memory_space<vmem>>, vector<1x8x4xbf16>
    %229 = vector.shape_cast %228 : vector<1x8x4xbf16> to vector<8x4xbf16>
    %cst_212 = arith.constant dense<0.000000e+00> : vector<8x384xf32>
    %230 = tpu.matmul %229, %227, %cst_212 {dimension_numbers = #tpu.dot_dimension_numbers<[1], [0], [0], [1], [0, 0, 1, 1], [], []>} : vector<8x4xbf16>, vector<4x384xbf16>, vector<8x384xf32> -> vector<8x384xf32>
    %231 = arith.addf %226, %230 : vector<8x384xf32>
    %c0_213 = arith.constant 0 : index
    %c177 = arith.constant 177 : index
    %232 = vector.load %arg16[%c0_213, %c177] : memref<4x582xbf16, #tpu.memory_space<vmem>>, vector<4x384xbf16>
    %c23 = arith.constant 23 : index
    %c0_214 = arith.constant 0 : index
    %c0_215 = arith.constant 0 : index
    %233 = vector.load %arg8[%c23, %c0_214, %c0_215] : memref<25x8x4xbf16, #tpu.memory_space<vmem>>, vector<1x8x4xbf16>
    %234 = vector.shape_cast %233 : vector<1x8x4xbf16> to vector<8x4xbf16>
    %cst_216 = arith.constant dense<0.000000e+00> : vector<8x384xf32>
    %235 = tpu.matmul %234, %232, %cst_216 {dimension_numbers = #tpu.dot_dimension_numbers<[1], [0], [0], [1], [0, 0, 1, 1], [], []>} : vector<8x4xbf16>, vector<4x384xbf16>, vector<8x384xf32> -> vector<8x384xf32>
    %236 = arith.addf %231, %235 : vector<8x384xf32>
    %c0_217 = arith.constant 0 : index
    %c178 = arith.constant 178 : index
    %237 = vector.load %arg16[%c0_217, %c178] : memref<4x582xbf16, #tpu.memory_space<vmem>>, vector<4x384xbf16>
    %c24 = arith.constant 24 : index
    %c0_218 = arith.constant 0 : index
    %c0_219 = arith.constant 0 : index
    %238 = vector.load %arg8[%c24, %c0_218, %c0_219] : memref<25x8x4xbf16, #tpu.memory_space<vmem>>, vector<1x8x4xbf16>
    %239 = vector.shape_cast %238 : vector<1x8x4xbf16> to vector<8x4xbf16>
    %cst_220 = arith.constant dense<0.000000e+00> : vector<8x384xf32>
    %240 = tpu.matmul %239, %237, %cst_220 {dimension_numbers = #tpu.dot_dimension_numbers<[1], [0], [0], [1], [0, 0, 1, 1], [], []>} : vector<8x4xbf16>, vector<4x384xbf16>, vector<8x384xf32> -> vector<8x384xf32>
    %241 = arith.addf %236, %240 : vector<8x384xf32>
    %c0_221 = arith.constant 0 : index
    %c0_222 = arith.constant 0 : index
    %242 = vector.load %arg9[%c0_221, %c0_222] : memref<8x1xf32, #tpu.memory_space<vmem>>, vector<8x1xf32>
    %243 = vector.broadcast %242 : vector<8x1xf32> to vector<8x384xf32>
    %244 = arith.addf %241, %243 : vector<8x384xf32>
    %cst_223 = arith.constant 0.000000e+00 : f32
    %245 = vector.broadcast %cst_223 : f32 to vector<8x384xf32>
    %246 = arith.maximumf %244, %245 : vector<8x384xf32>
    %c0_224 = arith.constant 0 : index
    %c0_225 = arith.constant 0 : index
    %c0_226 = arith.constant 0 : index
    %247 = vector.load %arg13[%c0_224, %c0_225, %c0_226] : memref<1x8x384xf32, #tpu.memory_space<vmem>>, vector<1x8x384xf32>
    %248 = vector.shape_cast %247 : vector<1x8x384xf32> to vector<8x384xf32>
    %249 = vector.shape_cast %246 : vector<8x384xf32> to vector<1x8x384xf32>
    tpu.vector_store %arg13[%c0_224, %c0_225, %c0_226], %249 {strides = array<i32>} : memref<1x8x384xf32, #tpu.memory_space<vmem>>, vector<1x8x384xf32>,
    return
  }
  func.func @transform_0(%arg0: i32) -> (i32, i32, i32) {
    %c0_i32 = arith.constant 0 : i32
    %c0_i32_0 = arith.constant 0 : i32
    %c0_i32_1 = arith.constant 0 : i32
    return %arg0, %c0_i32, %c0_i32_0 : i32, i32, i32
  }
  func.func @transform_1(%arg0: i32) -> (i32, i32, i32) {
    %c0_i32 = arith.constant 0 : i32
    %c0_i32_0 = arith.constant 0 : i32
    %c0_i32_1 = arith.constant 0 : i32
    %c0_i32_2 = arith.constant 0 : i32
    return %c0_i32, %c0_i32_0, %c0_i32_1 : i32, i32, i32
  }
  func.func @transform_2(%arg0: i32) -> (i32, i32) {
    %c0_i32 = arith.constant 0 : i32
    %c0_i32_0 = arith.constant 0 : i32
    %c0_i32_1 = arith.constant 0 : i32
    return %c0_i32, %c0_i32_0 : i32, i32
  }
  func.func @transform_3(%arg0: i32) -> (i32, i32, i32) {
    %c0_i32 = arith.constant 0 : i32
    %c0_i32_0 = arith.constant 0 : i32
    %c0_i32_1 = arith.constant 0 : i32
    %c0_i32_2 = arith.constant 0 : i32
    return %c0_i32, %c0_i32_0, %c0_i32_1 : i32, i32, i32
  }
  func.func @transform_4(%arg0: i32) -> (i32, i32) {
    %c0_i32 = arith.constant 0 : i32
    %c0_i32_0 = arith.constant 0 : i32
    %c0_i32_1 = arith.constant 0 : i32
    return %c0_i32, %c0_i32_0 : i32, i32
  }
  func.func @transform_5(%arg0: i32) -> (i32, i32, i32) {
    %c0_i32 = arith.constant 0 : i32
    %c0_i32_0 = arith.constant 0 : i32
    %c0_i32_1 = arith.constant 0 : i32
    %c0_i32_2 = arith.constant 0 : i32
    return %c0_i32, %c0_i32_0, %c0_i32_1 : i32, i32, i32
  }
  func.func @transform_6(%arg0: i32) -> (i32, i32) {
    %c0_i32 = arith.constant 0 : i32
    %c0_i32_0 = arith.constant 0 : i32
    %c0_i32_1 = arith.constant 0 : i32
    return %c0_i32, %c0_i32_0 : i32, i32
  }
  func.func @transform_7(%arg0: i32) -> (i32, i32, i32) {
    %c0_i32 = arith.constant 0 : i32
    %c0_i32_0 = arith.constant 0 : i32
    %c0_i32_1 = arith.constant 0 : i32
    %c0_i32_2 = arith.constant 0 : i32
    return %c0_i32, %c0_i32_0, %c0_i32_1 : i32, i32, i32
  }
  func.func @transform_8(%arg0: i32) -> (i32, i32) {
    %c0_i32 = arith.constant 0 : i32
    %c0_i32_0 = arith.constant 0 : i32
    %c0_i32_1 = arith.constant 0 : i32
    return %c0_i32, %c0_i32_0 : i32, i32
  }
  func.func @transform_9(%arg0: i32) -> (i32, i32) {
    %c0_i32 = arith.constant 0 : i32
    %c0_i32_0 = arith.constant 0 : i32
    %c0_i32_1 = arith.constant 0 : i32
    return %c0_i32, %c0_i32_0 : i32, i32
  }
  func.func @transform_10(%arg0: i32) -> (i32, i32, i32) {
    %c0_i32 = arith.constant 0 : i32
    %c0_i32_0 = arith.constant 0 : i32
    %c0_i32_1 = arith.constant 0 : i32
    return %arg0, %c0_i32, %c0_i32_0 : i32, i32, i32
  }
  func.func @transform_11(%arg0: i32) -> (i32, i32, i32) {
    %c0_i32 = arith.constant 0 : i32
    %c0_i32_0 = arith.constant 0 : i32
    %c0_i32_1 = arith.constant 0 : i32
    return %arg0, %c0_i32, %c0_i32_0 : i32, i32, i32
  }
  func.func @transform_12(%arg0: i32) -> (i32, i32, i32) {
    %c0_i32 = arith.constant 0 : i32
    %c0_i32_0 = arith.constant 0 : i32
    %c0_i32_1 = arith.constant 0 : i32
    return %arg0, %c0_i32, %c0_i32_0 : i32, i32, i32
  }
  func.func @transform_13(%arg0: i32) -> (i32, i32, i32) {
    %c0_i32 = arith.constant 0 : i32
    %c0_i32_0 = arith.constant 0 : i32
    %c0_i32_1 = arith.constant 0 : i32
    return %arg0, %c0_i32, %c0_i32_0 : i32, i32, i32
  }
}

</mosaic_0001>

<bundles_post_ra>
// kernel: inception_forward.1
= control target key start
LH: loop header
LB: loop body
LE: loop exit
PB: predicated region body
PF: predicated region fallthrough
CT: control target
= control target key end

     0   :  { %s5947_s25 = smov 0   ;;  %s6872_s0 = inlined_call_operand.vmem [shape: bf16[2,4,582], index: 0, kind: input, shape index: {}]   ;;  %s6873_s1 = inlined_call_operand.vmem [shape: bf16[1,16,4], index: 1, kind: input, shape index: {}]   ;;  %s6874_s2 = inlined_call_operand.vmem [shape: f32[16,1], index: 2, kind: input, shape index: {}]   ;;  %s6875_s3 = inlined_call_operand.vmem [shape: bf16[1,8,4], index: 3, kind: input, shape index: {}]   ;;  %s6876_s4 = inlined_call_operand.vmem [shape: f32[8,1], index: 4, kind: input, shape index: {}]   ;;  %s6877_s5 = inlined_call_operand.vmem [shape: bf16[9,8,4], index: 5, kind: input, shape index: {}]   ;;  %s6878_s6 = inlined_call_operand.vmem [shape: f32[8,1], index: 6, kind: input, shape index: {}]   ;;  %s6879_s7 = inlined_call_operand.vmem [shape: bf16[25,8,4], index: 7, kind: input, shape index: {}]   ;;  %s6880_s8 = inlined_call_operand.vmem [shape: f32[8,1], index: 8, kind: input, shape index: {}]   ;;  %s6881_s9 = inlined_call_operand.vmem [shape: f32[1,384], index: 9, kind: input, shape index: {}]   ;;  %s6882_s10 = inlined_call_operand.vmem [shape: f32[2,8,384], index: 10, kind: output, shape index: {0}]   ;;  %s6883_s11 = inlined_call_operand.vmem [shape: f32[2,8,384], index: 11, kind: output, shape index: {1}]   ;;  %s6884_s12 = inlined_call_operand.vmem [shape: f32[2,8,384], index: 12, kind: output, shape index: {2}]   ;;  %s6885_s13 = inlined_call_operand.vmem [shape: f32[2,8,384], index: 13, kind: output, shape index: {3}]  }
   0x1 LB: > { %s5352_s26 = sadd.s32 4294967295, %s5847_s25   ;;  %p5356_p0 = scmp.ge.s32.totalorder %s5847_s25, 1  ;;  %s5847_s25 = sphi %s5947_s25, %s24_s25  }
   0x2   : > { %p394_p1 = scmp.lt.s32.totalorder %s5847_s25, 3 }
   0x4   : > { %p395_p2 = pnand %p5356_p0, %p394_p1 }
   0x5   : > { %p453_p3 = scmp.lt.s32.totalorder (!%p395_p2), %s5352_s26, 1  ;;  %s5853_s14 = smov (!%p395_p2), 127  }
   0x6   : > { %398 = sbr.rel (%p395_p2) target bundleno = 838 (0x346), region = 60  ;;  %s5854_s15 = smov (!%p395_p2), 126  }
   0x7   : > { %s5855_s20 = smov (!%p395_p2), 104   ;;  %s5856_s21 = smov (!%p395_p2), 102  }
   0x8   : > { %s5857_s22 = smov (!%p395_p2), 103   ;;  %s6888_s23 = smov (!%p395_p2), 79  }
   0x9   : > { %s5859_s24 = smov (!%p395_p2), 80   ;;  %s5861_s28 = smov (!%p395_p2), 25  }
   0xa   : > { %s5862_s16 = smov (!%p395_p2), 24   ;;  %s5863_s17 = smov (!%p395_p2), 23  }
   0xb   : > { %v505_v0 = vlaneseq  ;;  %v5849_v1 = vmov 1983009808   ;;  %v5850_v3 = vmov 0.0   ;;  %s6901_s26 = smov (!%p453_p3, %s5352_s26), 1  ;;  %v5851_v5 = vmov 0   ;;  %v484_v12 = vld [vmem:[%s6874_s2 + $0x8] sm:$0xff] }
   0xc   : > { %v503_v2 = vunpack.c.l.s4 %v5849_v1  ;;  %5578 = vmatprep.subr.bf16.mxu1 %v5850_v3  ;;  %563 = vmatprep.mubr.bf16.mxu0 %v5851_v5  ;;  %845 = vst [vmem:[#allocation2] sm:$0xff] %v5851_v5  ;;  %872 = vst [vmem:[#allocation3] sm:$0xff] %v5851_v5  ;;  %vm5852_vm0 = vmmov 0   ;;  %s5794_s27 = smul.u32 10, %s6901_s26  ;;  %vm521_vm1 = vcmask 1041408   ;;  %v5835_v17 = vld [vmem:[%s6873_s1] sm:$0xff]  }
   0xd   : > { %v5958_v4 = vshrl.u32 %v505_v0, 7  ;;  %5580 = vmatprep.mubr.msk.bf16.mxu1 %vm5852_vm0, %v5850_v3  ;;  %5832 = vset.pattern.permute.xlu0 %v5851_v5  ;;  %vm517_vm2 = vcmask 31744   ;;  %vm846_vm3 = vcmask 566272   ;;  %vm648_vm4 = vcmask 1039360   ;;  %v479_v62 = vld [vmem:[%s6881_s9] sm:$0x7] }
   0xe   : > { %v504_v6 = vunpack.c.0.s8 %v503_v2  ;;  %5833 = vset.pattern.permute.xlu1 %v5851_v5  ;;  %s457_s30 = scalar_lea.vmem %s6872_s0, %s5794_s27  ;;  %s6886_s27 = smov 78   ;;  %847 = vst.msk [vmem:[#allocation2 + $0x8] sm:$0x3] %vm846_vm3, %v5851_v5  ;;  %873 = vst.msk [vmem:[#allocation3 + $0x8] sm:$0x3] %vm846_vm3, %v5851_v5  ;;  %vm655_vm5 = vcmask 1031168  }
   0xf   : > { %v480_v8 = vld [vmem:[%s457_s30 + $0x2] sm:$0x3f]  ;;  %vm662_vm6 = vcmask 850944   ;;  %vm669_vm7 = vcmask 842752   ;;  %vm678_vm8 = vcmask 834560   ;;  %vm685_vm9 = vcmask 654336  }
  0x10   : > { %v5969_v7 = vsub.s32 %v504_v6, %v5958_v4  ;;  %v643_v9 = vld [vmem:[%s457_s30] sm:$0xff]  ;;  %v501_v11 = vcombine.high %v480_v8, %v480_v8  ;;  %vm6891_vm10 = vcmask 646144   ;;  %vm6890_vm11 = vcmask 637952   ;;  %s5864_s18 = smov 1   ;;  %s5866_s19 = smov 49  }
  0x11   : > { %645 = vrot.lane.b32.xlu0 %v643_v9, %s5853_s14  ;;  %652 = vrot.lane.b32.xlu1 %v643_v9, %s5854_s15  ;;  %v673_v18 = vld [vmem:[%s457_s30 + $0x2] sm:$0xff]  ;;  %v632_v59 = vsub.s32 2, %v5958_v4  ;;  %v624_v63 = vsub.s32 0, %v5958_v4  ;;  %v628_v0 = vsub.s32 1, %v5958_v4  ;;  %vm736_vm12 = vcmask 203776   ;;  %s5865_s30 = smov 105  }
  0x12   : > { %v508_v10 = vrot.slane %v480_v8, %v5969_v7  ;;  %v515_v15 = vrot.slane %v501_v11, %v5969_v7  ;;  %s5867_s29 = smov 50   ;;  %vm907_vm13 = vcmask 195584   ;;  %vm1137_vm14 = vcmask 187392  }
  0x13   : > { %vm1266_vm15 = vcmask 7168   ;;  %vm1639_vm3 = vcmask 859136  }
  0x14   : > { %v516_v13 = vcombine.high %v508_v10, %v508_v10  ;;  %v523_v14 = vsel %vm521_vm1, %v508_v10, 0  ;;  %v529_v16 = vsel %vm521_vm1, %v515_v15, 0  ;;  %v6029_v10 = vrot.slane %v479_v62, %v624_v63 }
  0x15   : > { %492 = vperm.xlu0 %5832, %v484_v12   ;;  %5579 = vmatpush3.bf16.msra.mxu1 %v529_v16  ;;  %v6031_v16 = vrot.slane %v479_v62, %v628_v0 }
  0x16   : > { %5363 = vmatprep.subr.msk.bf16.mxu0 %vm521_vm1, %v516_v13  ;;  %659 = vrot.lane.b32.xlu1 %v643_v9, %s5855_s20 }
  0x17   : > { %546 = vmatpush1.bf16.msra.mxu0 %v523_v14  ;;  %5584 = vmatprep.subr.bf16.mxu1 %v5850_v3 }
  0x18   : > { %5581 = vmatmul.mubr.msk.bf16.vlgmr.msra.gmra.mxu1 %vm517_vm2, %v5835_v17 }
  0x19   : > { %675 = vrot.lane.b32.xlu0 %v673_v18, %s5856_s21  ;;  %5586 = vmatprep.mubr.msk.bf16.mxu1 %vm5852_vm0, %v5850_v3 }
  0x1a   : > { %5364 = vmatmul.mubr.msk.bf16.vlgmr.msra.gmra.mxu0 %vm517_vm2, %v5835_v17  ;;  %666 = vrot.lane.b32.xlu1 %v480_v8, %s5857_s22 }
  0x1b   : > { %784 = vmatprep.mubr.bf16.mxu0 %v5851_v5 }
  0x1d   : > { %689 = vrot.lane.b32.xlu0 %v673_v18, %s6888_s23  ;;  %s5869_s23 = smov 47  }
  0x1e   : > { %682 = vrot.lane.b32.xlu1 %v673_v18, %s5859_s24 }
  0x22   : > { %696 = vrot.lane.b32.xlu1 %v673_v18, %s6886_s27  ;;  %s5868_s27 = smov 48  }
  0x83   : > { %v653_v19 = vpop.permute.xlu1 %652  ;;  %v646_v20 = vpop.permute.xlu0 %645 }
  0x84   : > { %v647_v21 = vrot.slane %v646_v20, 2  ;;  %v654_v22 = vrot.slane %v653_v19, 2 }
  0x86   : > { %v649_v23 = vsel %vm648_vm4, %v646_v20, %v647_v21  ;;  %v656_v25 = vsel %vm655_vm5, %v653_v19, %v654_v22 }
  0x87   : > { %v651_v24 = vmax.bf16 %v649_v23, %v643_v9  ;;  %v6027_v9 = vrot.slane %v479_v62, %v632_v59 }
  0x88   : > { %v660_v26 = vpop.permute.xlu1 %659 }
  0x89   : > { %v661_v27 = vrot.slane %v660_v26, 2  ;;  %v658_v28 = vmax.bf16 %v656_v25, %v651_v24 }
  0x8b   : > { %v663_v29 = vsel %vm662_vm6, %v660_v26, %v661_v27 }
  0x8c   : > { %v667_v30 = vpop.permute.xlu1 %666  ;;  %v665_v32 = vmax.bf16 %v663_v29, %v658_v28 }
  0x8d   : > { %v668_v31 = vrot.slane %v667_v30, 6 }
  0x8f   : > { %v670_v34 = vsel %vm669_vm7, %v668_v31, %v667_v30 }
  0x90   : > { %v493_v33 = vpop.permute.xlu0 %492  ;;  %v683_v35 = vpop.permute.xlu1 %682  ;;  %v672_v37 = vmax.bf16 %v670_v34, %v665_v32 }
  0x91   : > { %v684_v36 = vrot.slane %v683_v35, 6 }
  0x93   : > { %v686_v42 = vsel %vm685_vm9, %v684_v36, %v683_v35 }
  0x94   : > { %v676_v38 = vpop.permute.xlu0 %675  ;;  %v697_v40 = vpop.permute.xlu1 %696 }
  0x95   : > { %v677_v39 = vrot.slane %v676_v38, 6  ;;  %v698_v43 = vrot.slane %v697_v40, 6 }
  0x97   : > { %v679_v41 = vsel %vm678_vm8, %v677_v39, %v676_v38  ;;  %v700_v49 = vsel %vm6890_vm11, %v698_v43, %v697_v40  ;;  %vm2040_vm11 = vcmask 400384  }
  0x98   : > { %v681_v44 = vmax.bf16 %v679_v41, %v672_v37  ;;  %v690_v45 = vpop.permute.xlu0 %689 }
  0x99   : > { %v691_v46 = vrot.slane %v690_v45, 6 }
  0x9a   : > { %v688_v47 = vmax.bf16 %v686_v42, %v681_v44 }
  0x9b   : > { %v693_v48 = vsel %vm6891_vm10, %v691_v46, %v690_v45  ;;  %v703_v46 = vld [vmem:[%s6875_s3] sm:$0xf]  ;;  %vm2145_vm10 = vcmask 408576  }
  0x9c   : > { %v695_v50 = vmax.bf16 %v693_v48, %v688_v47 }
  0x9e   : > { %v702_v51 = vmax.bf16 %v700_v49, %v695_v50 }
  0xa0   : > { %v718_v52 = vrot.slane %v702_v51, %v5969_v7  ;;  %v711_v53 = vcombine.high %v702_v51, %v702_v51 }
  0xa2   : > { %728 = vrot.lane.b32.xlu0 %v718_v52, %s5861_s28  ;;  %v726_v54 = vcombine.high %v718_v52, %v718_v52  ;;  %v725_v55 = vrot.slane %v711_v53, %v5969_v7 }
  0xa4   : > { %730 = vrot.lane.b32.xlu1 %v726_v54, %s5861_s28  ;;  %v727_v56 = vcombine.high %v725_v55, %v725_v55 }
  0xa6   : > { %732 = vrot.lane.b32.xlu0 %v725_v55, %s5861_s28 }
  0xa8   : > { %734 = vrot.lane.b32.xlu1 %v727_v56, %s5861_s28 }
  0xd8   : > { %v6017_v58 = vpop.f32.mrf.mxu1 }
  0xda   : > { %v6015_v57 = vpop.f32.mrf.mxu0  ;;  %v5582_v61 = vpop.f32.mrf.mxu1 }
  0xdc   : > { %v6020_v60 = vpop.f32.mrf.mxu0  ;;  %v611_v2 = vpop.f32.mrf.mxu1 }
  0xdd   : > { %v612_v8 = vadd.f32 %v611_v2, %v493_v33 }
  0xde   : > { %v569_v1 = vpop.f32.mrf.mxu0  ;;  %v5583_v12 = vpop.f32.mrf.mxu1 }
  0xdf   : > { %v570_v6 = vadd.f32 %v569_v1, %v493_v33  ;;  %v620_v14 = vmax.f32 %v612_v8, 0.0  ;;  %v5370_v1 = vld [vmem:[%s6877_s5 + $0x4] sm:$0xf] }
  0xe0   : > { %v571_v11 = vpop.f32.mrf.mxu0 }
  0xe1   : > { %v618_v13 = vmax.f32 %v570_v6, 0.0  ;;  %v572_v15 = vadd.f32 %v571_v11, %v493_v33  ;;  %v642_v17 = vmul.f32 %v6027_v9, %v620_v14 }
  0xe3   : > { %v619_v18 = vmax.f32 %v572_v15, 0.0  ;;  %v640_v4 = vmul.f32 %v6029_v10, %v618_v13  ;;  %v850_v19 = vpack.c.bf16 %v642_v17, %v642_v17 }
  0xe5   : > { %v641_v20 = vmul.f32 %v6031_v16, %v619_v18  ;;  %v868_v22 = vrot.slane %v850_v19, %v5969_v7  ;;  %v878_v18 = vld [vmem:[%s6877_s5] sm:$0xf] }
  0xe7   : > { %v5369_v21 = vpack.c.bf16 %v641_v20, %v640_v4 }
  0xe9   : > { %v861_v23 = vrot.slane %v5369_v21, %v5969_v7 }
  0xeb   : > { %v869_v24 = vcombine.low %v861_v23, %v868_v22  ;;  %v874_v25 = vcombine.high %v861_v23, %v868_v22 }
  0xed   : > { %871 = vst [vmem:[#allocation2 + $0x2] sm:$0x3f] %v869_v24  ;;  %876 = vst [vmem:[#allocation3 + $0x2] sm:$0x3f] %v874_v25 }
  0xf4   : > { %v877_v26 = vld [vmem:[#allocation2] sm:$0xff]  ;;  %v2010_v48 = vld [vmem:[#allocation3] sm:$0xff] }
  0xf5   : > { %v889_v27 = vrot.slane %v877_v26, %v5969_v7  ;;  %v882_v28 = vcombine.high %v877_v26, %v877_v26  ;;  %v1482_v32 = vld [vmem:[#allocation2 + $0x2] sm:$0xff]  ;;  %v6089_v49 = vrot.slane %v2010_v48, %v5969_v7  ;;  %v2015_v50 = vcombine.high %v2010_v48, %v2010_v48 }
  0xf6   : > { %v1493_v33 = vrot.slane %v1482_v32, %v5969_v7  ;;  %v1486_v34 = vcombine.high %v1482_v32, %v1482_v32 }
  0xf7   : > { %899 = vrot.lane.b32.xlu0 %v889_v27, %s5862_s16  ;;  %v897_v29 = vcombine.high %v889_v27, %v889_v27  ;;  %v896_v30 = vrot.slane %v882_v28, %v5969_v7  ;;  %v6095_v51 = vcombine.high %v6089_v49, %v6089_v49  ;;  %v6098_v52 = vrot.slane %v2015_v50, %v5969_v7  ;;  %v1366_v28 = vld [vmem:[#allocation2 + $0x2] sm:$0x3f] }
  0xf8   : > { %v1501_v36 = vcombine.high %v1493_v33, %v1493_v33  ;;  %v1500_v37 = vrot.slane %v1486_v34, %v5969_v7  ;;  %v1377_v32 = vrot.slane %v1366_v28, %v5969_v7 }
  0xf9   : > { %901 = vrot.lane.b32.xlu1 %v897_v29, %s5862_s16  ;;  %v898_v31 = vcombine.high %v896_v30, %v896_v30  ;;  %v6104_v53 = vcombine.high %v6098_v52, %v6098_v52 }
  0xfa   : > { %v1502_v43 = vcombine.high %v1500_v37, %v1500_v37 }
  0xfb   : > { %903 = vrot.lane.b32.xlu0 %v896_v30, %s5862_s16 }
  0xfd   : > { %905 = vrot.lane.b32.xlu1 %v898_v31, %s5862_s16 }
  0xff   : > { %1004 = vrot.lane.b32.xlu0 %v889_v27, %s5861_s28 }
 0x101   : > { %1006 = vrot.lane.b32.xlu1 %v897_v29, %s5861_s28 }
 0x103   : > { %1008 = vrot.lane.b32.xlu0 %v896_v30, %s5861_s28 }
 0x105   : > { %1010 = vrot.lane.b32.xlu1 %v898_v31, %s5861_s28 }
 0x107   : > { %1129 = vrot.lane.b32.xlu0 %v889_v27, %s5863_s17 }
 0x109   : > { %1131 = vrot.lane.b32.xlu1 %v897_v29, %s5863_s17 }
 0x10b   : > { %1133 = vrot.lane.b32.xlu0 %v896_v30, %s5863_s17 }
 0x10d   : > { %1135 = vrot.lane.b32.xlu1 %v898_v31, %s5863_s17 }
 0x10f   : > { %1258 = vrot.lane.b32.xlu0 %v889_v27, %s5864_s18  ;;  %v5377_v27 = vld [vmem:[%s6877_s5 + $0x8] sm:$0xf] }
 0x111   : > { %1260 = vrot.lane.b32.xlu1 %v897_v29, %s5864_s18 }
 0x113   : > { %1262 = vrot.lane.b32.xlu0 %v896_v30, %s5864_s18 }
 0x114   : > { %v729_v35 = vpop.permute.xlu0 %728 }
 0x115   : > { %1264 = vrot.lane.b32.xlu1 %v898_v31, %s5864_s18 }
 0x116   : > { %v731_v38 = vpop.permute.xlu1 %730 }
 0x117   : > { %1503 = vrot.lane.b32.xlu0 %v1493_v33, %s5853_s14  ;;  %v737_v39 = vsel %vm736_vm12, %v729_v35, %v731_v38  ;;  %v1370_v35 = vcombine.high %v1366_v28, %v1366_v28 }
 0x118   : > { %v733_v40 = vpop.permute.xlu0 %732  ;;  %v744_v41 = vsel %vm521_vm1, %v737_v39, 0  ;;  %v1385_v39 = vcombine.high %v1377_v32, %v1377_v32 }
 0x119   : > { %1505 = vrot.lane.b32.xlu1 %v1501_v36, %s5853_s14  ;;  %v738_v42 = vsel %vm736_vm12, %v731_v38, %v733_v40 }
 0x11a   : > { %v735_v44 = vpop.permute.xlu1 %734  ;;  %5366 = vmatprep.subr.msk.bf16.mxu0 %vm521_vm1, %v738_v42 }
 0x11b   : > { %1507 = vrot.lane.b32.xlu0 %v1500_v37, %s5853_s14  ;;  %v739_v45 = vsel %vm736_vm12, %v733_v40, %v735_v44  ;;  %767 = vmatpush1.bf16.msra.mxu0 %v744_v41  ;;  %v5381_v41 = vld [vmem:[%s6877_s5 + $0xc] sm:$0xf]  ;;  %v1384_v44 = vrot.slane %v1370_v35, %v5969_v7 }
 0x11c   : > { %v750_v47 = vsel %vm521_vm1, %v739_v45, 0 }
 0x11d   : > { %1509 = vrot.lane.b32.xlu1 %v1502_v43, %s5853_s14  ;;  %5585 = vmatpush3.bf16.msra.mxu1 %v750_v47  ;;  %v1396_v48 = vsel %vm521_vm1, %v1384_v44, 0 }
 0x11e   : > { %5367 = vmatmul.mubr.msk.bf16.vlgmr.msra.gmra.mxu0 %vm517_vm2, %v703_v46  ;;  %5590 = vmatprep.subr.bf16.mxu1 %v5850_v3 }
 0x11f   : > { %1631 = vrot.lane.b32.xlu0 %v1493_v33, %s5865_s30  ;;  %955 = vmatprep.mubr.bf16.mxu0 %v5851_v5 }
 0x120   : > { %5587 = vmatmul.mubr.msk.bf16.vlgmr.msra.gmra.mxu1 %vm517_vm2, %v703_v46  ;;  %v1390_v46 = vsel %vm521_vm1, %v1377_v32, 0 }
 0x121   : > { %1633 = vrot.lane.b32.xlu1 %v1501_v36, %s5865_s30  ;;  %5592 = vmatprep.mubr.msk.bf16.mxu1 %vm5852_vm0, %v5850_v3 }
 0x123   : > { %1635 = vrot.lane.b32.xlu0 %v1500_v37, %s5865_s30 }
 0x125   : > { %1637 = vrot.lane.b32.xlu1 %v1502_v43, %s5865_s30 }
 0x127   : > { %1760 = vrot.lane.b32.xlu0 %v1493_v33, %s5855_s20 }
 0x129   : > { %1762 = vrot.lane.b32.xlu1 %v1501_v36, %s5855_s20 }
 0x12b   : > { %1764 = vrot.lane.b32.xlu0 %v1500_v37, %s5855_s20 }
 0x12d   : > { %1766 = vrot.lane.b32.xlu1 %v1502_v43, %s5855_s20 }
 0x12f   : > { %1888 = vrot.lane.b32.xlu0 %v1493_v33, %s5857_s22 }
 0x131   : > { %1890 = vrot.lane.b32.xlu1 %v1501_v36, %s5857_s22 }
 0x133   : > { %1892 = vrot.lane.b32.xlu0 %v1500_v37, %s5857_s22 }
 0x135   : > { %1894 = vrot.lane.b32.xlu1 %v1502_v43, %s5857_s22 }
 0x137   : > { %2032 = vrot.lane.b32.xlu0 %v6089_v49, %s5866_s19 }
 0x139   : > { %2034 = vrot.lane.b32.xlu1 %v6095_v51, %s5866_s19 }
 0x13b   : > { %2036 = vrot.lane.b32.xlu0 %v6098_v52, %s5866_s19 }
 0x13d   : > { %2038 = vrot.lane.b32.xlu1 %v6104_v53, %s5866_s19  ;;  %s5870_s19 = smov 46  }
 0x13f   : > { %2137 = vrot.lane.b32.xlu0 %v6089_v49, %s5867_s29 }
 0x141   : > { %2139 = vrot.lane.b32.xlu1 %v6095_v51, %s5867_s29 }
 0x143   : > { %2141 = vrot.lane.b32.xlu0 %v6098_v52, %s5867_s29 }
 0x145   : > { %2143 = vrot.lane.b32.xlu1 %v6104_v53, %s5867_s29  ;;  %s5871_s29 = smov 26  }
 0x147   : > { %2263 = vrot.lane.b32.xlu0 %v6089_v49, %s5868_s27 }
 0x149   : > { %2265 = vrot.lane.b32.xlu1 %v6095_v51, %s5868_s27 }
 0x14b   : > { %2267 = vrot.lane.b32.xlu0 %v6098_v52, %s5868_s27 }
 0x14d   : > { %2269 = vrot.lane.b32.xlu1 %v6104_v53, %s5868_s27 }
 0x14f   : > { %2392 = vrot.lane.b32.xlu0 %v6089_v49, %s5869_s23 }
 0x151   : > { %2394 = vrot.lane.b32.xlu1 %v6095_v51, %s5869_s23 }
 0x153   : > { %2396 = vrot.lane.b32.xlu0 %v6098_v52, %s5869_s23 }
 0x155   : > { %2398 = vrot.lane.b32.xlu1 %v6104_v53, %s5869_s23  ;;  %s5873_s23 = smov 2  }
 0x157   : > { %2521 = vrot.lane.b32.xlu0 %v6089_v49, %s5870_s19 }
 0x159   : > { %2523 = vrot.lane.b32.xlu1 %v6095_v51, %s5870_s19 }
 0x15b   : > { %2525 = vrot.lane.b32.xlu0 %v6098_v52, %s5870_s19 }
 0x15d   : > { %2527 = vrot.lane.b32.xlu1 %v6104_v53, %s5870_s19  ;;  %s5872_s19 = smov 22  }
 0x15f   : > { %2650 = vrot.lane.b32.xlu0 %v6089_v49, %s5871_s29 }
 0x161   : > { %2652 = vrot.lane.b32.xlu1 %v6095_v51, %s5871_s29 }
 0x163   : > { %2654 = vrot.lane.b32.xlu0 %v6098_v52, %s5871_s29 }
 0x165   : > { %2656 = vrot.lane.b32.xlu1 %v6104_v53, %s5871_s29 }
 0x167   : > { %2779 = vrot.lane.b32.xlu0 %v6089_v49, %s5861_s28 }
 0x169   : > { %v900_v54 = vpop.permute.xlu0 %899  ;;  %2781 = vrot.lane.b32.xlu1 %v6095_v51, %s5861_s28 }
 0x16b   : > { %v902_v55 = vpop.permute.xlu1 %901  ;;  %2783 = vrot.lane.b32.xlu0 %v6098_v52, %s5861_s28 }
 0x16c   : > { %v908_v56 = vsel %vm907_vm13, %v900_v54, %v902_v55 }
 0x16d   : > { %v904_v59 = vpop.permute.xlu0 %903  ;;  %2785 = vrot.lane.b32.xlu1 %v6104_v53, %s5861_s28  ;;  %v915_v63 = vsel %vm521_vm1, %v908_v56, 0  ;;  %v5385_v56 = vld [vmem:[%s6877_s5 + $0x10] sm:$0xf] }
 0x16e   : > { %v909_v61 = vsel %vm907_vm13, %v902_v55, %v904_v59 }
 0x16f   : > { %2907 = vrot.lane.b32.xlu0 %v6089_v49, %s5862_s16  ;;  %5371 = vmatprep.subr.msk.bf16.mxu0 %vm521_vm1, %v909_v61  ;;  %v906_v62 = vpop.permute.xlu1 %905 }
 0x170   : > { %v910_v0 = vsel %vm907_vm13, %v904_v59, %v906_v62  ;;  %938 = vmatpush1.bf16.msra.mxu0 %v915_v63  ;;  %v3644_v59 = vld [vmem:[#allocation3 + $0x2] sm:$0xff] }
 0x171   : > { %v921_v2 = vsel %vm521_vm1, %v910_v0, 0  ;;  %v1005_v6 = vpop.permute.xlu0 %1004  ;;  %2909 = vrot.lane.b32.xlu1 %v6095_v51, %s5862_s16  ;;  %v6241_v0 = vrot.slane %v3644_v59, %v5969_v7 }
 0x172   : > { %5591 = vmatpush3.bf16.msra.mxu1 %v921_v2 }
 0x173   : > { %2911 = vrot.lane.b32.xlu0 %v6098_v52, %s5862_s16  ;;  %5372 = vmatmul.mubr.msk.bf16.vlgmr.msra.gmra.mxu0 %vm517_vm2, %v5370_v1  ;;  %v1007_v8 = vpop.permute.xlu1 %1006 }
 0x174   : > { %v1012_v11 = vsel %vm736_vm12, %v1005_v6, %v1007_v8  ;;  %5596 = vmatprep.subr.bf16.mxu1 %v5850_v3  ;;  %1059 = vmatprep.mubr.bf16.mxu0 %v5851_v5 }
 0x175   : > { %v1009_v12 = vpop.permute.xlu0 %1008  ;;  %2913 = vrot.lane.b32.xlu1 %v6104_v53, %s5862_s16  ;;  %5593 = vmatmul.mubr.msk.bf16.vlgmr.msra.gmra.mxu1 %vm517_vm2, %v5370_v1  ;;  %v1019_v15 = vsel %vm521_vm1, %v1012_v11, 0  ;;  %v3648_v1 = vcombine.high %v3644_v59, %v3644_v59  ;;  %v5405_v59 = vld [vmem:[%s6879_s7 + $0x4] sm:$0xf] }
 0x176   : > { %v1013_v13 = vsel %vm736_vm12, %v1007_v8, %v1009_v12  ;;  %5598 = vmatprep.mubr.msk.bf16.mxu1 %vm5852_vm0, %v5850_v3  ;;  %v6256_v8 = vcombine.high %v6241_v0, %v6241_v0 }
 0x177   : > { %3035 = vrot.lane.b32.xlu0 %v6089_v49, %s5863_s17  ;;  %5374 = vmatprep.subr.msk.bf16.mxu0 %vm521_vm1, %v1013_v13  ;;  %v1011_v14 = vpop.permute.xlu1 %1010 }
 0x178   : > { %v1014_v17 = vsel %vm736_vm12, %v1009_v12, %v1011_v14  ;;  %1042 = vmatpush1.bf16.msra.mxu0 %v1019_v15  ;;  %v5389_v12 = vld [vmem:[%s6877_s5 + $0x14] sm:$0xf] }
 0x179   : > { %v1025_v4 = vsel %vm521_vm1, %v1014_v17, 0  ;;  %v1130_v19 = vpop.permute.xlu0 %1129  ;;  %3037 = vrot.lane.b32.xlu1 %v6095_v51, %s5863_s17 }
 0x17a   : > { %5597 = vmatpush3.bf16.msra.mxu1 %v1025_v4 }
 0x17b   : > { %3039 = vrot.lane.b32.xlu0 %v6098_v52, %s5863_s17  ;;  %5375 = vmatmul.mubr.msk.bf16.vlgmr.msra.gmra.mxu0 %vm517_vm2, %v878_v18  ;;  %v1132_v20 = vpop.permute.xlu1 %1131 }
 0x17c   : > { %v1138_v21 = vsel %vm1137_vm14, %v1130_v19, %v1132_v20  ;;  %5602 = vmatprep.subr.bf16.mxu1 %v5850_v3  ;;  %1185 = vmatprep.mubr.bf16.mxu0 %v5851_v5 }
 0x17d   : > { %v1134_v22 = vpop.permute.xlu0 %1133  ;;  %3041 = vrot.lane.b32.xlu1 %v6104_v53, %s5863_s17  ;;  %5599 = vmatmul.mubr.msk.bf16.vlgmr.msra.gmra.mxu1 %vm517_vm2, %v878_v18  ;;  %v1145_v25 = vsel %vm521_vm1, %v1138_v21, 0 }
 0x17e   : > { %v1139_v23 = vsel %vm1137_vm14, %v1132_v20, %v1134_v22  ;;  %5604 = vmatprep.mubr.msk.bf16.mxu1 %vm5852_vm0, %v5850_v3 }
 0x17f   : > { %3163 = vrot.lane.b32.xlu0 %v6089_v49, %s5872_s19  ;;  %5378 = vmatprep.subr.msk.bf16.mxu0 %vm521_vm1, %v1139_v23  ;;  %v1136_v24 = vpop.permute.xlu1 %1135  ;;  %v5393_v23 = vld [vmem:[%s6877_s5 + $0x18] sm:$0xf] }
 0x180   : > { %v1140_v26 = vsel %vm1137_vm14, %v1134_v22, %v1136_v24  ;;  %1168 = vmatpush1.bf16.msra.mxu0 %v1145_v25 }
 0x181   : > { %v1151_v29 = vsel %vm521_vm1, %v1140_v26, 0  ;;  %v1259_v30 = vpop.permute.xlu0 %1258  ;;  %3165 = vrot.lane.b32.xlu1 %v6095_v51, %s5872_s19 }
 0x182   : > { %5603 = vmatpush3.bf16.msra.mxu1 %v1151_v29 }
 0x183   : > { %3167 = vrot.lane.b32.xlu0 %v6098_v52, %s5872_s19  ;;  %5379 = vmatmul.mubr.msk.bf16.vlgmr.msra.gmra.mxu0 %vm517_vm2, %v5377_v27  ;;  %v1261_v31 = vpop.permute.xlu1 %1260 }
 0x184   : > { %v1267_v33 = vsel %vm1266_vm15, %v1259_v30, %v1261_v31  ;;  %5608 = vmatprep.subr.bf16.mxu1 %v5850_v3  ;;  %1314 = vmatprep.mubr.bf16.mxu0 %v5851_v5 }
 0x185   : > { %v1263_v34 = vpop.permute.xlu0 %1262  ;;  %3169 = vrot.lane.b32.xlu1 %v6104_v53, %s5872_s19  ;;  %5605 = vmatmul.mubr.msk.bf16.vlgmr.msra.gmra.mxu1 %vm517_vm2, %v5377_v27  ;;  %v1274_v38 = vsel %vm521_vm1, %v1267_v33, 0  ;;  %v5397_v33 = vld [vmem:[%s6877_s5 + $0x1c] sm:$0xf]  ;;  %s6892_s19 = smov 79  }
 0x186   : > { %v1268_v36 = vsel %vm1266_vm15, %v1261_v31, %v1263_v34  ;;  %5610 = vmatprep.mubr.msk.bf16.mxu1 %vm5852_vm0, %v5850_v3 }
 0x187   : > { %3292 = vrot.lane.b32.xlu0 %v6089_v49, %s5873_s23  ;;  %5382 = vmatprep.subr.msk.bf16.mxu0 %vm521_vm1, %v1268_v36  ;;  %v1265_v37 = vpop.permute.xlu1 %1264 }
 0x188   : > { %v1269_v40 = vsel %vm1266_vm15, %v1263_v34, %v1265_v37  ;;  %1297 = vmatpush1.bf16.msra.mxu0 %v1274_v38 }
 0x189   : > { %v1280_v42 = vsel %vm521_vm1, %v1269_v40, 0  ;;  %v1504_v43 = vpop.permute.xlu0 %1503  ;;  %3294 = vrot.lane.b32.xlu1 %v6095_v51, %s5873_s23  ;;  %5386 = vmatprep.subr.msk.bf16.mxu0 %vm521_vm1, %v1385_v39 }
 0x18a   : > { %5609 = vmatpush3.bf16.msra.mxu1 %v1280_v42 }
 0x18b   : > { %3296 = vrot.lane.b32.xlu0 %v6098_v52, %s5873_s23  ;;  %5383 = vmatmul.mubr.msk.bf16.vlgmr.msra.gmra.mxu0 %vm517_vm2, %v5381_v41  ;;  %v1506_v45 = vpop.permute.xlu1 %1505 }
 0x18c   : > { %1413 = vmatpush1.bf16.msra.mxu0 %v1390_v46  ;;  %5614 = vmatprep.subr.bf16.mxu1 %v5850_v3  ;;  %v1511_v55 = vsel %vm648_vm4, %v1504_v43, %v1506_v45  ;;  %v5401_v43 = vld [vmem:[%s6877_s5 + $0x20] sm:$0xf] }
 0x18d   : > { %v1508_v47 = vpop.permute.xlu0 %1507  ;;  %3298 = vrot.lane.b32.xlu1 %v6104_v53, %s5873_s23  ;;  %5611 = vmatmul.mubr.msk.bf16.vlgmr.msra.gmra.mxu1 %vm517_vm2, %v5381_v41  ;;  %v1518_v62 = vsel %vm521_vm1, %v1511_v55, 0 }
 0x18e   : > { %5615 = vmatpush3.bf16.msra.mxu1 %v1396_v48  ;;  %v1512_v50 = vsel %vm648_vm4, %v1506_v45, %v1508_v47  ;;  %1430 = vmatprep.mubr.bf16.mxu0 %v5851_v5 }
 0x18f   : > { %3421 = vrot.lane.b32.xlu0 %v6089_v49, %s5864_s18  ;;  %5390 = vmatprep.subr.msk.bf16.mxu0 %vm521_vm1, %v1512_v50  ;;  %v1510_v54 = vpop.permute.xlu1 %1509 }
 0x190   : > { %5616 = vmatprep.mubr.msk.bf16.mxu1 %vm5852_vm0, %v5850_v3  ;;  %5620 = vmatprep.subr.bf16.mxu1 %v5850_v3  ;;  %v1513_v49 = vsel %vm648_vm4, %v1508_v47, %v1510_v54 }
 0x191   : > { %v1632_v61 = vpop.permute.xlu0 %1631  ;;  %3423 = vrot.lane.b32.xlu1 %v6095_v51, %s5864_s18  ;;  %v1524_v2 = vsel %vm521_vm1, %v1513_v49, 0 }
 0x193   : > { %3425 = vrot.lane.b32.xlu0 %v6098_v52, %s5864_s18  ;;  %5387 = vmatmul.mubr.msk.bf16.vlgmr.msra.gmra.mxu0 %vm517_vm2, %v5385_v56  ;;  %v1634_v63 = vpop.permute.xlu1 %1633 }
 0x194   : > { %1541 = vmatpush1.bf16.msra.mxu0 %v1518_v62  ;;  %1558 = vmatprep.mubr.bf16.mxu0 %v5851_v5  ;;  %v1640_v11 = vsel %vm1639_vm3, %v1632_v61, %v1634_v63 }
 0x195   : > { %v1636_v51 = vpop.permute.xlu0 %1635  ;;  %3427 = vrot.lane.b32.xlu1 %v6104_v53, %s5864_s18  ;;  %5617 = vmatmul.mubr.msk.bf16.vlgmr.msra.gmra.mxu1 %vm517_vm2, %v5385_v56  ;;  %v6259_v53 = vrot.slane %v3648_v1, %v5969_v7  ;;  %v1647_v15 = vsel %vm521_vm1, %v1640_v11, 0  ;;  %v2011_v11 = vld [vmem:[%s6879_s7] sm:$0xf]  ;;  %s6815_s18 = smul.u32 24, %s6901_s26 }
 0x196   : > { %5621 = vmatpush3.bf16.msra.mxu1 %v1524_v2  ;;  %v1641_v52 = vsel %vm1639_vm3, %v1634_v63, %v1636_v51  ;;  %5622 = vmatprep.mubr.msk.bf16.mxu1 %vm5852_vm0, %v5850_v3 }
 0x197   : > { %3665 = vrot.lane.b32.xlu0 %v6241_v0, %s5853_s14  ;;  %5394 = vmatprep.subr.msk.bf16.mxu0 %vm521_vm1, %v1641_v52  ;;  %v1638_v6 = vpop.permute.xlu1 %1637  ;;  %v6275_v18 = vcombine.high %v6259_v53, %v6259_v53  ;;  %s477_s17 = scalar_lea.vmem %s6885_s13, %s6815_s18  ;;  %s467_s27 = scalar_lea.vmem %s6883_s11, %s6815_s18 }
 0x198   : > { %5626 = vmatprep.subr.bf16.mxu1 %v5850_v3  ;;  %v1642_v14 = vsel %vm1639_vm3, %v1636_v51, %v1638_v6  ;;  %s472_s16 = scalar_lea.vmem %s6884_s12, %s6815_s18 }
 0x199   : > { %v1761_v13 = vpop.permute.xlu0 %1760  ;;  %3667 = vrot.lane.b32.xlu1 %v6256_v8, %s5853_s14  ;;  %v1653_v4 = vsel %vm521_vm1, %v1642_v14, 0 }
 0x19b   : > { %3669 = vrot.lane.b32.xlu0 %v6259_v53, %s5853_s14  ;;  %5391 = vmatmul.mubr.msk.bf16.vlgmr.msra.gmra.mxu0 %vm517_vm2, %v5389_v12  ;;  %v1763_v17 = vpop.permute.xlu1 %1762 }
 0x19c   : > { %1670 = vmatpush1.bf16.msra.mxu0 %v1647_v15  ;;  %1687 = vmatprep.mubr.bf16.mxu0 %v5851_v5  ;;  %v1768_v22 = vsel %vm662_vm6, %v1761_v13, %v1763_v17 }
 0x19d   : > { %v1765_v19 = vpop.permute.xlu0 %1764  ;;  %3671 = vrot.lane.b32.xlu1 %v6275_v18, %s5853_s14  ;;  %5623 = vmatmul.mubr.msk.bf16.vlgmr.msra.gmra.mxu1 %vm517_vm2, %v5389_v12  ;;  %v1775_v26 = vsel %vm521_vm1, %v1768_v22, 0  ;;  %s5874_s14 = smov 106   ;;  %v5412_v22 = vld [vmem:[%s6879_s7 + $0x8] sm:$0xf] }
 0x19e   : > { %5627 = vmatpush3.bf16.msra.mxu1 %v1653_v4  ;;  %v1769_v20 = vsel %vm662_vm6, %v1763_v17, %v1765_v19  ;;  %5628 = vmatprep.mubr.msk.bf16.mxu1 %vm5852_vm0, %v5850_v3 }
 0x19f   : > { %3793 = vrot.lane.b32.xlu0 %v6241_v0, %s5854_s15  ;;  %5398 = vmatprep.subr.msk.bf16.mxu0 %vm521_vm1, %v1769_v20  ;;  %v1767_v21 = vpop.permute.xlu1 %1766 }
 0x1a0   : > { %5632 = vmatprep.subr.bf16.mxu1 %v5850_v3  ;;  %v1770_v25 = vsel %vm662_vm6, %v1765_v19, %v1767_v21 }
 0x1a1   : > { %v1889_v24 = vpop.permute.xlu0 %1888  ;;  %3795 = vrot.lane.b32.xlu1 %v6256_v8, %s5854_s15  ;;  %v1781_v28 = vsel %vm521_vm1, %v1770_v25, 0 }
 0x1a3   : > { %3797 = vrot.lane.b32.xlu0 %v6259_v53, %s5854_s15  ;;  %5395 = vmatmul.mubr.msk.bf16.vlgmr.msra.gmra.mxu0 %vm517_vm2, %v5393_v23  ;;  %v1891_v27 = vpop.permute.xlu1 %1890 }
 0x1a4   : > { %1798 = vmatpush1.bf16.msra.mxu0 %v1775_v26  ;;  %1815 = vmatprep.mubr.bf16.mxu0 %v5851_v5  ;;  %v1896_v32 = vsel %vm669_vm7, %v1889_v24, %v1891_v27 }
 0x1a5   : > { %v1893_v29 = vpop.permute.xlu0 %1892  ;;  %3799 = vrot.lane.b32.xlu1 %v6275_v18, %s5854_s15  ;;  %5629 = vmatmul.mubr.msk.bf16.vlgmr.msra.gmra.mxu1 %vm517_vm2, %v5393_v23  ;;  %v1903_v36 = vsel %vm521_vm1, %v1896_v32, 0  ;;  %v5416_v32 = vld [vmem:[%s6879_s7 + $0xc] sm:$0xf] }
 0x1a6   : > { %5633 = vmatpush3.bf16.msra.mxu1 %v1781_v28  ;;  %v1897_v30 = vsel %vm669_vm7, %v1891_v27, %v1893_v29  ;;  %5634 = vmatprep.mubr.msk.bf16.mxu1 %vm5852_vm0, %v5850_v3 }
 0x1a7   : > { %3921 = vrot.lane.b32.xlu0 %v6241_v0, %s5874_s14  ;;  %5402 = vmatprep.subr.msk.bf16.mxu0 %vm521_vm1, %v1897_v30  ;;  %v1895_v31 = vpop.permute.xlu1 %1894 }
 0x1a8   : > { %5638 = vmatprep.subr.bf16.mxu1 %v5850_v3  ;;  %v1898_v35 = vsel %vm669_vm7, %v1893_v29, %v1895_v31 }
 0x1a9   : > { %v2033_v34 = vpop.permute.xlu0 %2032  ;;  %3923 = vrot.lane.b32.xlu1 %v6256_v8, %s5874_s14  ;;  %v1909_v38 = vsel %vm521_vm1, %v1898_v35, 0 }
 0x1ab   : > { %3925 = vrot.lane.b32.xlu0 %v6259_v53, %s5874_s14  ;;  %5399 = vmatmul.mubr.msk.bf16.vlgmr.msra.gmra.mxu0 %vm517_vm2, %v5397_v33  ;;  %v2035_v37 = vpop.permute.xlu1 %2034 }
 0x1ac   : > { %1926 = vmatpush1.bf16.msra.mxu0 %v1903_v36  ;;  %1943 = vmatprep.mubr.bf16.mxu0 %v5851_v5  ;;  %v2041_v42 = vsel %vm2040_vm11, %v2033_v34, %v2035_v37 }
 0x1ad   : > { %v2037_v39 = vpop.permute.xlu0 %2036  ;;  %3927 = vrot.lane.b32.xlu1 %v6275_v18, %s5874_s14  ;;  %5635 = vmatmul.mubr.msk.bf16.vlgmr.msra.gmra.mxu1 %vm517_vm2, %v5397_v33  ;;  %v2048_v46 = vsel %vm521_vm1, %v2041_v42, 0  ;;  %v5420_v42 = vld [vmem:[%s6879_s7 + $0x10] sm:$0xf] }
 0x1ae   : > { %v2042_v40 = vsel %vm2040_vm11, %v2035_v37, %v2037_v39  ;;  %5639 = vmatpush3.bf16.msra.mxu1 %v1909_v38  ;;  %5640 = vmatprep.mubr.msk.bf16.mxu1 %vm5852_vm0, %v5850_v3 }
 0x1af   : > { %4050 = vrot.lane.b32.xlu0 %v6241_v0, %s5865_s30  ;;  %5406 = vmatprep.subr.msk.bf16.mxu0 %vm521_vm1, %v2042_v40  ;;  %v2039_v41 = vpop.permute.xlu1 %2038 }
 0x1b0   : > { %5644 = vmatprep.subr.bf16.mxu1 %v5850_v3  ;;  %v2043_v45 = vsel %vm2040_vm11, %v2037_v39, %v2039_v41  ;;  %vm2271_vm11 = vcmask 392192  }
 0x1b1   : > { %v2138_v44 = vpop.permute.xlu0 %2137  ;;  %4052 = vrot.lane.b32.xlu1 %v6256_v8, %s5865_s30  ;;  %v2054_v48 = vsel %vm521_vm1, %v2043_v45, 0 }
 0x1b3   : > { %4054 = vrot.lane.b32.xlu0 %v6259_v53, %s5865_s30  ;;  %5403 = vmatmul.mubr.msk.bf16.vlgmr.msra.gmra.mxu0 %vm517_vm2, %v5401_v43  ;;  %v2140_v47 = vpop.permute.xlu1 %2139 }
 0x1b4   : > { %2071 = vmatpush1.bf16.msra.mxu0 %v2048_v46  ;;  %2088 = vmatprep.mubr.bf16.mxu0 %v5851_v5  ;;  %v2146_v56 = vsel %vm2145_vm10, %v2138_v44, %v2140_v47 }
 0x1b5   : > { %v2142_v50 = vpop.permute.xlu0 %2141  ;;  %4056 = vrot.lane.b32.xlu1 %v6275_v18, %s5865_s30  ;;  %5641 = vmatmul.mubr.msk.bf16.vlgmr.msra.gmra.mxu1 %vm517_vm2, %v5401_v43  ;;  %v2153_v62 = vsel %vm521_vm1, %v2146_v56, 0  ;;  %s6893_s30 = smov 78  }
 0x1b6   : > { %v2147_v54 = vsel %vm2145_vm10, %v2140_v47, %v2142_v50  ;;  %5645 = vmatpush3.bf16.msra.mxu1 %v2054_v48  ;;  %5646 = vmatprep.mubr.msk.bf16.mxu1 %vm5852_vm0, %v5850_v3 }
 0x1b7   : > { %4178 = vrot.lane.b32.xlu0 %v6241_v0, %s5855_s20  ;;  %5409 = vmatprep.subr.msk.bf16.mxu0 %vm521_vm1, %v2147_v54  ;;  %v2144_v55 = vpop.permute.xlu1 %2143 }
 0x1b8   : > { %5650 = vmatprep.subr.bf16.mxu1 %v5850_v3  ;;  %v2148_v49 = vsel %vm2145_vm10, %v2142_v50, %v2144_v55  ;;  %vm2400_vm10 = vcmask 384000  }
 0x1b9   : > { %v2264_v61 = vpop.permute.xlu0 %2263  ;;  %4180 = vrot.lane.b32.xlu1 %v6256_v8, %s5855_s20  ;;  %v2159_v1 = vsel %vm521_vm1, %v2148_v49, 0 }
 0x1bb   : > { %4182 = vrot.lane.b32.xlu0 %v6259_v53, %s5855_s20  ;;  %5407 = vmatmul.mubr.msk.bf16.vlgmr.msra.gmra.mxu0 %vm517_vm2, %v5405_v59  ;;  %v2266_v63 = vpop.permute.xlu1 %2265 }
 0x1bc   : > { %2176 = vmatpush1.bf16.msra.mxu0 %v2153_v62  ;;  %2193 = vmatprep.mubr.bf16.mxu0 %v5851_v5  ;;  %v2272_v6 = vsel %vm2271_vm11, %v2264_v61, %v2266_v63 }
 0x1bd   : > { %v2268_v2 = vpop.permute.xlu0 %2267  ;;  %4184 = vrot.lane.b32.xlu1 %v6275_v18, %s5855_s20  ;;  %5647 = vmatmul.mubr.msk.bf16.vlgmr.msra.gmra.mxu1 %vm517_vm2, %v5405_v59  ;;  %v2279_v14 = vsel %vm521_vm1, %v2272_v6, 0  ;;  %v5424_v59 = vld [vmem:[%s6879_s7 + $0x14] sm:$0xf] }
 0x1be   : > { %v2273_v51 = vsel %vm2271_vm11, %v2266_v63, %v2268_v2  ;;  %5651 = vmatpush3.bf16.msra.mxu1 %v2159_v1  ;;  %5652 = vmatprep.mubr.msk.bf16.mxu1 %vm5852_vm0, %v5850_v3 }
 0x1bf   : > { %4306 = vrot.lane.b32.xlu0 %v6241_v0, %s5857_s22  ;;  %5413 = vmatprep.subr.msk.bf16.mxu0 %vm521_vm1, %v2273_v51  ;;  %v2270_v52 = vpop.permute.xlu1 %2269 }
 0x1c0   : > { %5656 = vmatprep.subr.bf16.mxu1 %v5850_v3  ;;  %v2274_v13 = vsel %vm2271_vm11, %v2268_v2, %v2270_v52  ;;  %vm2529_vm11 = vcmask 375808  }
 0x1c1   : > { %v2393_v12 = vpop.permute.xlu0 %2392  ;;  %4308 = vrot.lane.b32.xlu1 %v6256_v8, %s5857_s22  ;;  %v2285_v17 = vsel %vm521_vm1, %v2274_v13, 0 }
 0x1c3   : > { %4310 = vrot.lane.b32.xlu0 %v6259_v53, %s5857_s22  ;;  %5410 = vmatmul.mubr.msk.bf16.vlgmr.msra.gmra.mxu0 %vm517_vm2, %v2011_v11  ;;  %v2395_v15 = vpop.permute.xlu1 %2394 }
 0x1c4   : > { %2302 = vmatpush1.bf16.msra.mxu0 %v2279_v14  ;;  %2319 = vmatprep.mubr.bf16.mxu0 %v5851_v5  ;;  %v2401_v21 = vsel %vm2400_vm10, %v2393_v12, %v2395_v15 }
 0x1c5   : > { %v2397_v4 = vpop.permute.xlu0 %2396  ;;  %4312 = vrot.lane.b32.xlu1 %v6275_v18, %s5857_s22  ;;  %5653 = vmatmul.mubr.msk.bf16.vlgmr.msra.gmra.mxu1 %vm517_vm2, %v2011_v11  ;;  %v2408_v25 = vsel %vm521_vm1, %v2401_v21, 0  ;;  %s5875_s22 = smov 82  }
 0x1c6   : > { %v2402_v19 = vsel %vm2400_vm10, %v2395_v15, %v2397_v4  ;;  %5657 = vmatpush3.bf16.msra.mxu1 %v2285_v17  ;;  %5658 = vmatprep.mubr.msk.bf16.mxu1 %vm5852_vm0, %v5850_v3 }
 0x1c7   : > { %4434 = vrot.lane.b32.xlu0 %v6241_v0, %s5856_s21  ;;  %5417 = vmatprep.subr.msk.bf16.mxu0 %vm521_vm1, %v2402_v19  ;;  %v2399_v20 = vpop.permute.xlu1 %2398 }
 0x1c8   : > { %5662 = vmatprep.subr.bf16.mxu1 %v5850_v3  ;;  %v2403_v24 = vsel %vm2400_vm10, %v2397_v4, %v2399_v20  ;;  %vm2658_vm10 = vcmask 211968   ;;  %v5428_v4 = vld [vmem:[%s6879_s7 + $0x18] sm:$0xf] }
 0x1c9   : > { %v2522_v23 = vpop.permute.xlu0 %2521  ;;  %4436 = vrot.lane.b32.xlu1 %v6256_v8, %s5856_s21  ;;  %v2414_v27 = vsel %vm521_vm1, %v2403_v24, 0 }
 0x1cb   : > { %4438 = vrot.lane.b32.xlu0 %v6259_v53, %s5856_s21  ;;  %5414 = vmatmul.mubr.msk.bf16.vlgmr.msra.gmra.mxu0 %vm517_vm2, %v5412_v22  ;;  %v2524_v26 = vpop.permute.xlu1 %2523 }
 0x1cc   : > { %2431 = vmatpush1.bf16.msra.mxu0 %v2408_v25  ;;  %2448 = vmatprep.mubr.bf16.mxu0 %v5851_v5  ;;  %v2530_v31 = vsel %vm2529_vm11, %v2522_v23, %v2524_v26 }
 0x1cd   : > { %v2526_v28 = vpop.permute.xlu0 %2525  ;;  %4440 = vrot.lane.b32.xlu1 %v6275_v18, %s5856_s21  ;;  %5659 = vmatmul.mubr.msk.bf16.vlgmr.msra.gmra.mxu1 %vm517_vm2, %v5412_v22  ;;  %v2537_v35 = vsel %vm521_vm1, %v2530_v31, 0  ;;  %s5876_s21 = smov 81  }
 0x1ce   : > { %v2531_v29 = vsel %vm2529_vm11, %v2524_v26, %v2526_v28  ;;  %5663 = vmatpush3.bf16.msra.mxu1 %v2414_v27  ;;  %5664 = vmatprep.mubr.msk.bf16.mxu1 %vm5852_vm0, %v5850_v3 }
 0x1cf   : > { %4562 = vrot.lane.b32.xlu0 %v6241_v0, %s5875_s22  ;;  %5421 = vmatprep.subr.msk.bf16.mxu0 %vm521_vm1, %v2531_v29  ;;  %v2528_v30 = vpop.permute.xlu1 %2527  ;;  %v5432_v29 = vld [vmem:[%s6879_s7 + $0x1c] sm:$0xf] }
 0x1d0   : > { %5668 = vmatprep.subr.bf16.mxu1 %v5850_v3  ;;  %v2532_v34 = vsel %vm2529_vm11, %v2526_v28, %v2528_v30 }
 0x1d1   : > { %v2651_v33 = vpop.permute.xlu0 %2650  ;;  %4564 = vrot.lane.b32.xlu1 %v6256_v8, %s5875_s22  ;;  %v2543_v37 = vsel %vm521_vm1, %v2532_v34, 0 }
 0x1d3   : > { %4566 = vrot.lane.b32.xlu0 %v6259_v53, %s5875_s22  ;;  %5418 = vmatmul.mubr.msk.bf16.vlgmr.msra.gmra.mxu0 %vm517_vm2, %v5416_v32  ;;  %v2653_v36 = vpop.permute.xlu1 %2652 }
 0x1d4   : > { %2560 = vmatpush1.bf16.msra.mxu0 %v2537_v35  ;;  %2577 = vmatprep.mubr.bf16.mxu0 %v5851_v5  ;;  %v2659_v41 = vsel %vm2658_vm10, %v2651_v33, %v2653_v36  ;;  %v483_v33 = vld [vmem:[%s6874_s2] sm:$0xff] }
 0x1d5   : > { %v2655_v38 = vpop.permute.xlu0 %2654  ;;  %4568 = vrot.lane.b32.xlu1 %v6275_v18, %s5875_s22  ;;  %5665 = vmatmul.mubr.msk.bf16.vlgmr.msra.gmra.mxu1 %vm517_vm2, %v5416_v32  ;;  %v2666_v45 = vsel %vm521_vm1, %v2659_v41, 0  ;;  %v704_v35 = vld [vmem:[%s6876_s4] sm:$0xff] }
 0x1d6   : > { %v2660_v39 = vsel %vm2658_vm10, %v2653_v36, %v2655_v38  ;;  %5669 = vmatpush3.bf16.msra.mxu1 %v2543_v37  ;;  %5670 = vmatprep.mubr.msk.bf16.mxu1 %vm5852_vm0, %v5850_v3 }
 0x1d7   : > { %4691 = vrot.lane.b32.xlu0 %v6241_v0, %s5876_s21  ;;  %5425 = vmatprep.subr.msk.bf16.mxu0 %vm521_vm1, %v2660_v39  ;;  %v2657_v40 = vpop.permute.xlu1 %2656 }
 0x1d8   : > { %5674 = vmatprep.subr.bf16.mxu1 %v5850_v3  ;;  %v2661_v44 = vsel %vm2658_vm10, %v2655_v38, %v2657_v40  ;;  %v5436_v38 = vld [vmem:[%s6879_s7 + $0x20] sm:$0xf] }
 0x1d9   : > { %v2780_v43 = vpop.permute.xlu0 %2779  ;;  %4693 = vrot.lane.b32.xlu1 %v6256_v8, %s5876_s21  ;;  %v2672_v47 = vsel %vm521_vm1, %v2661_v44, 0 }
 0x1db   : > { %4695 = vrot.lane.b32.xlu0 %v6259_v53, %s5876_s21  ;;  %5422 = vmatmul.mubr.msk.bf16.vlgmr.msra.gmra.mxu0 %vm517_vm2, %v5420_v42  ;;  %v2782_v46 = vpop.permute.xlu1 %2781 }
 0x1dc   : > { %2689 = vmatpush1.bf16.msra.mxu0 %v2666_v45  ;;  %2706 = vmatprep.mubr.bf16.mxu0 %v5851_v5  ;;  %v2787_v56 = vsel %vm736_vm12, %v2780_v43, %v2782_v46 }
 0x1dd   : > { %v2784_v48 = vpop.permute.xlu0 %2783  ;;  %4697 = vrot.lane.b32.xlu1 %v6275_v18, %s5876_s21  ;;  %5671 = vmatmul.mubr.msk.bf16.vlgmr.msra.gmra.mxu1 %vm517_vm2, %v5420_v42  ;;  %v2794_v1 = vsel %vm521_vm1, %v2787_v56, 0 }
 0x1de   : > { %v2788_v50 = vsel %vm736_vm12, %v2782_v46, %v2784_v48  ;;  %5675 = vmatpush3.bf16.msra.mxu1 %v2672_v47  ;;  %5676 = vmatprep.mubr.msk.bf16.mxu1 %vm5852_vm0, %v5850_v3  ;;  %v6448_v55 = vpop.f32.mrf.mxu0 }
 0x1df   : > { %4820 = vrot.lane.b32.xlu0 %v6241_v0, %s5859_s24  ;;  %5429 = vmatprep.subr.msk.bf16.mxu0 %vm521_vm1, %v2788_v50  ;;  %v2786_v54 = vpop.permute.xlu1 %2785 }
 0x1e0   : > { %5680 = vmatprep.subr.bf16.mxu1 %v5850_v3  ;;  %v6457_v49 = vpop.f32.mrf.mxu0  ;;  %v2789_v62 = vsel %vm736_vm12, %v2784_v48, %v2786_v54  ;;  %v6460_v63 = vpop.f32.mrf.mxu1  ;;  %vm3171_vm12 = vcmask 179200   ;;  %v5440_v48 = vld [vmem:[%s6879_s7 + $0x24] sm:$0xf] }
 0x1e1   : > { %v2908_v61 = vpop.permute.xlu0 %2907  ;;  %4822 = vrot.lane.b32.xlu1 %v6256_v8, %s5859_s24  ;;  %v2800_v6 = vsel %vm521_vm1, %v2789_v62, 0 }
 0x1e2   : > { %v790_v51 = vpop.f32.mrf.mxu0  ;;  %v5588_v52 = vpop.f32.mrf.mxu1 }
 0x1e3   : > { %4824 = vrot.lane.b32.xlu0 %v6259_v53, %s5859_s24  ;;  %5426 = vmatmul.mubr.msk.bf16.vlgmr.msra.gmra.mxu0 %vm517_vm2, %v5424_v59  ;;  %v2910_v2 = vpop.permute.xlu1 %2909 }
 0x1e4   : > { %2817 = vmatpush1.bf16.msra.mxu0 %v2794_v1  ;;  %2834 = vmatprep.mubr.bf16.mxu0 %v5851_v5  ;;  %v791_v12 = vpop.f32.mrf.mxu0  ;;  %v830_v14 = vpop.f32.mrf.mxu1  ;;  %v2915_v17 = vsel %vm907_vm13, %v2908_v61, %v2910_v2  ;;  %v3528_v61 = vld [vmem:[#allocation3 + $0x2] sm:$0x3f] }
 0x1e5   : > { %v2912_v11 = vpop.permute.xlu0 %2911  ;;  %4826 = vrot.lane.b32.xlu1 %v6275_v18, %s5859_s24  ;;  %5677 = vmatmul.mubr.msk.bf16.vlgmr.msra.gmra.mxu1 %vm517_vm2, %v5424_v59  ;;  %v2922_v22 = vsel %vm521_vm1, %v2915_v17, 0  ;;  %v3539_v52 = vrot.slane %v3528_v61, %v5969_v7 }
 0x1e6   : > { %v2916_v13 = vsel %vm907_vm13, %v2910_v2, %v2912_v11  ;;  %5681 = vmatpush3.bf16.msra.mxu1 %v2800_v6  ;;  %5682 = vmatprep.mubr.msk.bf16.mxu1 %vm5852_vm0, %v5850_v3  ;;  %v5589_v19 = vpop.f32.mrf.mxu1 }
 0x1e7   : > { %4948 = vrot.lane.b32.xlu0 %v6241_v0, %s6892_s19  ;;  %5433 = vmatprep.subr.msk.bf16.mxu0 %vm521_vm1, %v2916_v13  ;;  %v2914_v15 = vpop.permute.xlu1 %2913  ;;  %v3547_v17 = vcombine.high %v3539_v52, %v3539_v52 }
 0x1e8   : > { %5686 = vmatprep.subr.bf16.mxu1 %v5850_v3  ;;  %v2917_v21 = vsel %vm907_vm13, %v2912_v11, %v2914_v15  ;;  %vm3300_vm13 = vcmask 15360   ;;  %v5444_v11 = vld [vmem:[%s6879_s7 + $0x28] sm:$0xf] }
 0x1e9   : > { %v3036_v20 = vpop.permute.xlu0 %3035  ;;  %4950 = vrot.lane.b32.xlu1 %v6256_v8, %s6892_s19  ;;  %v2928_v24 = vsel %vm521_vm1, %v2917_v21, 0 }
 0x1eb   : > { %4952 = vrot.lane.b32.xlu0 %v6259_v53, %s6892_s19  ;;  %5430 = vmatmul.mubr.msk.bf16.vlgmr.msra.gmra.mxu0 %vm517_vm2, %v5428_v4  ;;  %v3038_v23 = vpop.permute.xlu1 %3037 }
 0x1ec   : > { %2945 = vmatpush1.bf16.msra.mxu0 %v2922_v22  ;;  %2962 = vmatprep.mubr.bf16.mxu0 %v5851_v5  ;;  %v3043_v28 = vsel %vm1137_vm14, %v3036_v20, %v3038_v23  ;;  %v3532_v20 = vcombine.high %v3528_v61, %v3528_v61  ;;  %v5448_v22 = vld [vmem:[%s6879_s7 + $0x2c] sm:$0xf] }
 0x1ed   : > { %v3040_v25 = vpop.permute.xlu0 %3039  ;;  %4954 = vrot.lane.b32.xlu1 %v6275_v18, %s6892_s19  ;;  %5683 = vmatmul.mubr.msk.bf16.vlgmr.msra.gmra.mxu1 %vm517_vm2, %v5428_v4  ;;  %v3050_v32 = vsel %vm521_vm1, %v3043_v28, 0 }
 0x1ee   : > { %v3044_v26 = vsel %vm1137_vm14, %v3038_v23, %v3040_v25  ;;  %5687 = vmatpush3.bf16.msra.mxu1 %v2928_v24  ;;  %5688 = vmatprep.mubr.msk.bf16.mxu1 %vm5852_vm0, %v5850_v3  ;;  %v3546_v24 = vrot.slane %v3532_v20, %v5969_v7 }
 0x1ef   : > { %5076 = vrot.lane.b32.xlu0 %v6241_v0, %s6893_s30  ;;  %5437 = vmatprep.subr.msk.bf16.mxu0 %vm521_vm1, %v3044_v26  ;;  %v3042_v27 = vpop.permute.xlu1 %3041 }
 0x1f0   : > { %5692 = vmatprep.subr.bf16.mxu1 %v5850_v3  ;;  %v3045_v31 = vsel %vm1137_vm14, %v3040_v25, %v3042_v27  ;;  %v3552_v25 = vsel %vm521_vm1, %v3539_v52, 0  ;;  %vm6897_vm14 = vcmask 637952  }
 0x1f1   : > { %v3164_v30 = vpop.permute.xlu0 %3163  ;;  %5078 = vrot.lane.b32.xlu1 %v6256_v8, %s6893_s30  ;;  %v3056_v34 = vsel %vm521_vm1, %v3045_v31, 0  ;;  %v5452_v31 = vld [vmem:[%s6879_s7 + $0x30] sm:$0xf] }
 0x1f3   : > { %5080 = vrot.lane.b32.xlu0 %v6259_v53, %s6893_s30  ;;  %5434 = vmatmul.mubr.msk.bf16.vlgmr.msra.gmra.mxu0 %vm517_vm2, %v5432_v29  ;;  %v3166_v0 = vpop.permute.xlu1 %3165 }
 0x1f4   : > { %3073 = vmatpush1.bf16.msra.mxu0 %v3050_v32  ;;  %3090 = vmatprep.mubr.bf16.mxu0 %v5851_v5  ;;  %v3172_v37 = vsel %vm3171_vm12, %v3164_v30, %v3166_v0 }
 0x1f5   : > { %v3168_v8 = vpop.permute.xlu0 %3167  ;;  %5082 = vrot.lane.b32.xlu1 %v6275_v18, %s6893_s30  ;;  %5689 = vmatmul.mubr.msk.bf16.vlgmr.msra.gmra.mxu1 %vm517_vm2, %v5432_v29  ;;  %v1995_v18 = vld [vmem:[%s6878_s6] sm:$0xff]  ;;  %v3179_v41 = vsel %vm521_vm1, %v3172_v37, 0  ;;  %v3558_v29 = vsel %vm521_vm1, %v3546_v24, 0  ;;  %s462_s30 = scalar_lea.vmem %s6882_s10, %s6815_s18 }
 0x1f6   : > { %v3173_v53 = vsel %vm3171_vm12, %v3166_v0, %v3168_v8  ;;  %5693 = vmatpush3.bf16.msra.mxu1 %v3056_v34  ;;  %5694 = vmatprep.mubr.msk.bf16.mxu1 %vm5852_vm0, %v5850_v3  ;;  %v5468_v24 = vld [vmem:[%s6879_s7 + $0x40] sm:$0xf] }
 0x1f7   : > { %487 = vperm.xlu0 %5832, %v483_v33   ;;  %5441 = vmatprep.subr.msk.bf16.mxu0 %vm521_vm1, %v3173_v53  ;;  %v3170_v36 = vpop.permute.xlu1 %3169 }
 0x1f8   : > { %5698 = vmatprep.subr.bf16.mxu1 %v5850_v3  ;;  %v3174_v40 = vsel %vm3171_vm12, %v3168_v8, %v3170_v36 }
 0x1f9   : > { %v3293_v39 = vpop.permute.xlu0 %3292  ;;  %707 = vperm.xlu1 %5833, %v704_v35   ;;  %v3185_v43 = vsel %vm521_vm1, %v3174_v40, 0 }
 0x1fb   : > { %1998 = vperm.xlu0 %5832, %v1995_v18   ;;  %5438 = vmatmul.mubr.msk.bf16.vlgmr.msra.gmra.mxu0 %vm517_vm2, %v5436_v38  ;;  %v3295_v42 = vpop.permute.xlu1 %3294  ;;  %v5456_v18 = vld [vmem:[%s6879_s7 + $0x34] sm:$0xf] }
 0x1fc   : > { %3202 = vmatpush1.bf16.msra.mxu0 %v3179_v41  ;;  %3219 = vmatprep.mubr.bf16.mxu0 %v5851_v5  ;;  %v3301_v47 = vsel %vm3300_vm13, %v3293_v39, %v3295_v42 }
 0x1fd   : > { %v3297_v44 = vpop.permute.xlu0 %3296  ;;  %5695 = vmatmul.mubr.msk.bf16.vlgmr.msra.gmra.mxu1 %vm517_vm2, %v5436_v38  ;;  %v3308_v56 = vsel %vm521_vm1, %v3301_v47, 0  ;;  %v5460_v47 = vld [vmem:[%s6879_s7 + $0x38] sm:$0xf] }
 0x1fe   : > { %v3302_v45 = vsel %vm3300_vm13, %v3295_v42, %v3297_v44  ;;  %5699 = vmatpush3.bf16.msra.mxu1 %v3185_v43  ;;  %5700 = vmatprep.mubr.msk.bf16.mxu1 %vm5852_vm0, %v5850_v3 }
 0x1ff   : > { %5445 = vmatprep.subr.msk.bf16.mxu0 %vm521_vm1, %v3302_v45  ;;  %v3299_v46 = vpop.permute.xlu1 %3298  ;;  %5704 = vmatprep.subr.bf16.mxu1 %v5850_v3 }
 0x200   : > { %v3303_v54 = vsel %vm3300_vm13, %v3297_v44, %v3299_v46 }
 0x201   : > { %v3422_v50 = vpop.permute.xlu0 %3421  ;;  %v3314_v62 = vsel %vm521_vm1, %v3303_v54, 0 }
 0x203   : > { %5442 = vmatmul.mubr.msk.bf16.vlgmr.msra.gmra.mxu0 %vm517_vm2, %v5440_v48  ;;  %v3424_v59 = vpop.permute.xlu1 %3423 }
 0x204   : > { %3331 = vmatpush1.bf16.msra.mxu0 %v3308_v56  ;;  %3348 = vmatprep.mubr.bf16.mxu0 %v5851_v5  ;;  %v3429_v6 = vsel %vm1266_vm15, %v3422_v50, %v3424_v59 }
 0x205   : > { %v3426_v1 = vpop.permute.xlu0 %3425  ;;  %5701 = vmatmul.mubr.msk.bf16.vlgmr.msra.gmra.mxu1 %vm517_vm2, %v5440_v48  ;;  %v3436_v14 = vsel %vm521_vm1, %v3429_v6, 0 }
 0x206   : > { %v3430_v2 = vsel %vm1266_vm15, %v3424_v59, %v3426_v1  ;;  %5705 = vmatpush3.bf16.msra.mxu1 %v3314_v62  ;;  %5706 = vmatprep.mubr.msk.bf16.mxu1 %vm5852_vm0, %v5850_v3 }
 0x207   : > { %5449 = vmatprep.subr.msk.bf16.mxu0 %vm521_vm1, %v3430_v2  ;;  %v3428_v51 = vpop.permute.xlu1 %3427  ;;  %5710 = vmatprep.subr.bf16.mxu1 %v5850_v3 }
 0x208   : > { %v3431_v13 = vsel %vm1266_vm15, %v3426_v1, %v3428_v51  ;;  %v5464_v51 = vld [vmem:[%s6879_s7 + $0x3c] sm:$0xf]  ;;  %vm6898_vm15 = vmmov %vm6897_vm14 }
 0x209   : > { %v3666_v12 = vpop.permute.xlu0 %3665  ;;  %v3442_v4 = vsel %vm521_vm1, %v3431_v13, 0 }
 0x20b   : > { %5446 = vmatmul.mubr.msk.bf16.vlgmr.msra.gmra.mxu0 %vm517_vm2, %v5444_v11  ;;  %v3668_v15 = vpop.permute.xlu1 %3667 }
 0x20c   : > { %3459 = vmatpush1.bf16.msra.mxu0 %v3436_v14  ;;  %3476 = vmatprep.mubr.bf16.mxu0 %v5851_v5  ;;  %v3673_v30 = vsel %vm648_vm4, %v3666_v12, %v3668_v15 }
 0x20d   : > { %5453 = vmatprep.subr.msk.bf16.mxu0 %vm521_vm1, %v3547_v17  ;;  %v3670_v19 = vpop.permute.xlu0 %3669  ;;  %5707 = vmatmul.mubr.msk.bf16.vlgmr.msra.gmra.mxu1 %vm517_vm2, %v5444_v11  ;;  %v3680_v33 = vsel %vm521_vm1, %v3673_v30, 0 }
 0x20e   : > { %5711 = vmatpush3.bf16.msra.mxu1 %v3442_v4  ;;  %5712 = vmatprep.mubr.msk.bf16.mxu1 %vm5852_vm0, %v5850_v3  ;;  %v3674_v27 = vsel %vm648_vm4, %v3668_v15, %v3670_v19 }
 0x20f   : > { %v3672_v21 = vpop.permute.xlu1 %3671  ;;  %5716 = vmatprep.subr.bf16.mxu1 %v5850_v3 }
 0x210   : > { %v3675_v0 = vsel %vm648_vm4, %v3670_v19, %v3672_v21  ;;  %vm3929_vm4 = vcmask 867328  }
 0x211   : > { %v3794_v23 = vpop.permute.xlu0 %3793  ;;  %v3686_v53 = vsel %vm521_vm1, %v3675_v0, 0 }
 0x213   : > { %5450 = vmatmul.mubr.msk.bf16.vlgmr.msra.gmra.mxu0 %vm517_vm2, %v5448_v22  ;;  %v3796_v26 = vpop.permute.xlu1 %3795 }
 0x214   : > { %3575 = vmatpush1.bf16.msra.mxu0 %v3552_v25  ;;  %3592 = vmatprep.mubr.bf16.mxu0 %v5851_v5  ;;  %v3801_v37 = vsel %vm655_vm5, %v3794_v23, %v3796_v26 }
 0x215   : > { %5457 = vmatprep.subr.msk.bf16.mxu0 %vm521_vm1, %v3674_v27  ;;  %v3798_v28 = vpop.permute.xlu0 %3797  ;;  %5713 = vmatmul.mubr.msk.bf16.vlgmr.msra.gmra.mxu1 %vm517_vm2, %v5448_v22  ;;  %v3808_v40 = vsel %vm521_vm1, %v3801_v37, 0 }
 0x216   : > { %5717 = vmatpush3.bf16.msra.mxu1 %v3558_v29  ;;  %5718 = vmatprep.mubr.msk.bf16.mxu1 %vm5852_vm0, %v5850_v3  ;;  %v3802_v8 = vsel %vm655_vm5, %v3796_v26, %v3798_v28 }
 0x217   : > { %v3800_v7 = vpop.permute.xlu1 %3799  ;;  %5722 = vmatprep.subr.bf16.mxu1 %v5850_v3 }
 0x218   : > { %v3803_v39 = vsel %vm655_vm5, %v3798_v28, %v3800_v7  ;;  %vm4570_vm5 = vcmask 670720  }
 0x219   : > { %v3922_v32 = vpop.permute.xlu0 %3921  ;;  %v3814_v43 = vsel %vm521_vm1, %v3803_v39, 0 }
 0x21b   : > { %5454 = vmatmul.mubr.msk.bf16.vlgmr.msra.gmra.mxu0 %vm517_vm2, %v5452_v31  ;;  %v3924_v34 = vpop.permute.xlu1 %3923 }
 0x21c   : > { %3703 = vmatpush1.bf16.msra.mxu0 %v3680_v33  ;;  %3720 = vmatprep.mubr.bf16.mxu0 %v5851_v5  ;;  %v3930_v46 = vsel %vm3929_vm4, %v3922_v32, %v3924_v34 }
 0x21d   : > { %5461 = vmatprep.subr.msk.bf16.mxu0 %vm521_vm1, %v3802_v8  ;;  %v3926_v35 = vpop.permute.xlu0 %3925  ;;  %5719 = vmatmul.mubr.msk.bf16.vlgmr.msra.gmra.mxu1 %vm517_vm2, %v5452_v31  ;;  %v3937_v54 = vsel %vm521_vm1, %v3930_v46, 0 }
 0x21e   : > { %5723 = vmatpush3.bf16.msra.mxu1 %v3686_v53  ;;  %5724 = vmatprep.mubr.msk.bf16.mxu1 %vm5852_vm0, %v5850_v3  ;;  %v3931_v42 = vsel %vm3929_vm4, %v3924_v34, %v3926_v35 }
 0x21f   : > { %v3928_v36 = vpop.permute.xlu1 %3927  ;;  %5728 = vmatprep.subr.bf16.mxu1 %v5850_v3 }
 0x220   : > { %v3932_v50 = vsel %vm3929_vm4, %v3926_v35, %v3928_v36 }
 0x221   : > { %v4051_v38 = vpop.permute.xlu0 %4050  ;;  %v3943_v61 = vsel %vm521_vm1, %v3932_v50, 0 }
 0x223   : > { %5458 = vmatmul.mubr.msk.bf16.vlgmr.msra.gmra.mxu0 %vm517_vm2, %v5456_v18  ;;  %v4053_v41 = vpop.permute.xlu1 %4052 }
 0x224   : > { %3831 = vmatpush1.bf16.msra.mxu0 %v3808_v40  ;;  %3848 = vmatprep.mubr.bf16.mxu0 %v5851_v5  ;;  %v4058_v2 = vsel %vm1639_vm3, %v4051_v38, %v4053_v41 }
 0x225   : > { %5465 = vmatprep.subr.msk.bf16.mxu0 %vm521_vm1, %v3931_v42  ;;  %v4055_v44 = vpop.permute.xlu0 %4054  ;;  %5725 = vmatmul.mubr.msk.bf16.vlgmr.msra.gmra.mxu1 %vm517_vm2, %v5456_v18  ;;  %v4065_v11 = vsel %vm521_vm1, %v4058_v2, 0  ;;  %v5472_v18 = vld [vmem:[%s6879_s7 + $0x44] sm:$0xf]  ;;  %v5476_v2 = vld [vmem:[%s6879_s7 + $0x48] sm:$0xf] }
 0x226   : > { %5729 = vmatpush3.bf16.msra.mxu1 %v3814_v43  ;;  %5730 = vmatprep.mubr.msk.bf16.mxu1 %vm5852_vm0, %v5850_v3  ;;  %v4059_v59 = vsel %vm1639_vm3, %v4053_v41, %v4055_v44  ;;  %v5183_v42 = vld [vmem:[%s6880_s8] sm:$0xff] }
 0x227   : > { %v4057_v45 = vpop.permute.xlu1 %4056  ;;  %5734 = vmatprep.subr.bf16.mxu1 %v5850_v3  ;;  %5186 = vperm.xlu1 %5833, %v5183_v42  }
 0x228   : > { %v4060_v6 = vsel %vm1639_vm3, %v4055_v44, %v4057_v45  ;;  %vm6899_vm3 = vmmov %vm6897_vm14 }
 0x229   : > { %v4179_v48 = vpop.permute.xlu0 %4178  ;;  %v4071_v15 = vsel %vm521_vm1, %v4060_v6, 0 }
 0x22b   : > { %5462 = vmatmul.mubr.msk.bf16.vlgmr.msra.gmra.mxu0 %vm517_vm2, %v5460_v47  ;;  %v4181_v56 = vpop.permute.xlu1 %4180 }
 0x22c   : > { %3960 = vmatpush1.bf16.msra.mxu0 %v3937_v54  ;;  %3977 = vmatprep.mubr.bf16.mxu0 %v5851_v5  ;;  %v4186_v22 = vsel %vm662_vm6, %v4179_v48, %v4181_v56 }
 0x22d   : > { %5469 = vmatprep.subr.msk.bf16.mxu0 %vm521_vm1, %v4059_v59  ;;  %v4183_v62 = vpop.permute.xlu0 %4182  ;;  %5731 = vmatmul.mubr.msk.bf16.vlgmr.msra.gmra.mxu1 %vm517_vm2, %v5460_v47  ;;  %v4193_v29 = vsel %vm521_vm1, %v4186_v22, 0 }
 0x22e   : > { %5735 = vmatpush3.bf16.msra.mxu1 %v3943_v61  ;;  %5736 = vmatprep.mubr.msk.bf16.mxu1 %vm5852_vm0, %v5850_v3  ;;  %v4187_v14 = vsel %vm662_vm6, %v4181_v56, %v4183_v62 }
 0x22f   : > { %v4185_v1 = vpop.permute.xlu1 %4184  ;;  %5740 = vmatprep.subr.bf16.mxu1 %v5850_v3 }
 0x230   : > { %v4188_v27 = vsel %vm662_vm6, %v4183_v62, %v4185_v1  ;;  %vm4699_vm6 = vcmask 662528  }
 0x231   : > { %v4307_v52 = vpop.permute.xlu0 %4306  ;;  %v4199_v0 = vsel %vm521_vm1, %v4188_v27, 0 }
 0x233   : > { %v6638_v12 = vpop.f32.mrf.mxu0  ;;  %5466 = vmatmul.mubr.msk.bf16.vlgmr.msra.gmra.mxu0 %vm517_vm2, %v5464_v51  ;;  %v4309_v13 = vpop.permute.xlu1 %4308 }
 0x234   : > { %4088 = vmatpush1.bf16.msra.mxu0 %v4065_v11  ;;  %4105 = vmatprep.mubr.bf16.mxu0 %v5851_v5  ;;  %v4314_v36 = vsel %vm669_vm7, %v4307_v52, %v4309_v13 }
 0x235   : > { %5473 = vmatprep.subr.msk.bf16.mxu0 %vm521_vm1, %v4187_v14  ;;  %v6645_v17 = vpop.f32.mrf.mxu0  ;;  %v4311_v4 = vpop.permute.xlu0 %4310  ;;  %5737 = vmatmul.mubr.msk.bf16.vlgmr.msra.gmra.mxu1 %vm517_vm2, %v5464_v51  ;;  %v4321_v43 = vsel %vm521_vm1, %v4314_v36, 0 }
 0x236   : > { %v6648_v19 = vpop.f32.mrf.mxu1  ;;  %5741 = vmatpush3.bf16.msra.mxu1 %v4071_v15  ;;  %5742 = vmatprep.mubr.msk.bf16.mxu1 %vm5852_vm0, %v5850_v3  ;;  %v4315_v31 = vsel %vm669_vm7, %v4309_v13, %v4311_v4 }
 0x237   : > { %v961_v20 = vpop.f32.mrf.mxu0  ;;  %v4313_v21 = vpop.permute.xlu1 %4312  ;;  %5746 = vmatprep.subr.bf16.mxu1 %v5850_v3 }
 0x238   : > { %v5594_v23 = vpop.f32.mrf.mxu1  ;;  %v4316_v40 = vsel %vm669_vm7, %v4311_v4, %v4313_v21  ;;  %vm6894_vm7 = vcmask 646144  }
 0x239   : > { %v962_v25 = vpop.f32.mrf.mxu0  ;;  %v4435_v26 = vpop.permute.xlu0 %4434  ;;  %v4327_v48 = vsel %vm521_vm1, %v4316_v40, 0 }
 0x23a   : > { %v1001_v28 = vpop.f32.mrf.mxu1 }
 0x23b   : > { %v6659_v7 = vpop.f32.mrf.mxu0  ;;  %5470 = vmatmul.mubr.msk.bf16.vlgmr.msra.gmra.mxu0 %vm517_vm2, %v5468_v24  ;;  %v4437_v30 = vpop.permute.xlu1 %4436 }
 0x23c   : > { %4216 = vmatpush1.bf16.msra.mxu0 %v4193_v29  ;;  %v5595_v32 = vpop.f32.mrf.mxu1  ;;  %4233 = vmatprep.mubr.bf16.mxu0 %v5851_v5  ;;  %v4442_v62 = vsel %vm678_vm8, %v4435_v26, %v4437_v30  ;;  %v5480_v29 = vld [vmem:[%s6879_s7 + $0x4c] sm:$0xf] }
 0x23d   : > { %5477 = vmatprep.subr.msk.bf16.mxu0 %vm521_vm1, %v4315_v31  ;;  %v4439_v33 = vpop.permute.xlu0 %4438  ;;  %v6666_v34 = vpop.f32.mrf.mxu0  ;;  %5743 = vmatmul.mubr.msk.bf16.vlgmr.msra.gmra.mxu1 %vm517_vm2, %v5468_v24  ;;  %v4449_v13 = vsel %vm521_vm1, %v4442_v62, 0 }
 0x23e   : > { %v6669_v8 = vpop.f32.mrf.mxu1  ;;  %5747 = vmatpush3.bf16.msra.mxu1 %v4199_v0  ;;  %5748 = vmatprep.mubr.msk.bf16.mxu1 %vm5852_vm0, %v5850_v3  ;;  %v4443_v46 = vsel %vm678_vm8, %v4437_v30, %v4439_v33 }
 0x23f   : > { %v1065_v53 = vpop.f32.mrf.mxu0  ;;  %v4441_v35 = vpop.permute.xlu1 %4440  ;;  %5752 = vmatprep.subr.bf16.mxu1 %v5850_v3 }
 0x240   : > { %v5600_v37 = vpop.f32.mrf.mxu1  ;;  %v4444_v6 = vsel %vm678_vm8, %v4439_v33, %v4441_v35  ;;  %vm6895_vm8 = vmmov %vm6894_vm7 }
 0x241   : > { %v4563_v38 = vpop.permute.xlu0 %4562  ;;  %v1066_v39 = vpop.f32.mrf.mxu0  ;;  %v4455_v21 = vsel %vm521_vm1, %v4444_v6, 0 }
 0x242   : > { %v1105_v41 = vpop.f32.mrf.mxu1 }
 0x243   : > { %v6683_v44 = vpop.f32.mrf.mxu0  ;;  %5474 = vmatmul.mubr.msk.bf16.vlgmr.msra.gmra.mxu0 %vm517_vm2, %v5472_v18  ;;  %v4565_v45 = vpop.permute.xlu1 %4564 }
 0x244   : > { %4344 = vmatpush1.bf16.msra.mxu0 %v4321_v43  ;;  %v5601_v47 = vpop.f32.mrf.mxu1  ;;  %4361 = vmatprep.mubr.bf16.mxu0 %v5851_v5  ;;  %v4571_v27 = vsel %vm4570_vm5, %v4563_v38, %v4565_v45 }
 0x245   : > { %5481 = vmatprep.subr.msk.bf16.mxu0 %vm521_vm1, %v4443_v46  ;;  %v4567_v50 = vpop.permute.xlu0 %4566  ;;  %v6690_v54 = vpop.f32.mrf.mxu0  ;;  %5749 = vmatmul.mubr.msk.bf16.vlgmr.msra.gmra.mxu1 %vm517_vm2, %v5472_v18  ;;  %v4578_v33 = vsel %vm521_vm1, %v4571_v27, 0  ;;  %v5484_v46 = vld [vmem:[%s6879_s7 + $0x50] sm:$0xf] }
 0x246   : > { %v6693_v56 = vpop.f32.mrf.mxu1  ;;  %5753 = vmatpush3.bf16.msra.mxu1 %v4327_v48  ;;  %5754 = vmatprep.mubr.msk.bf16.mxu1 %vm5852_vm0, %v5850_v3  ;;  %v4572_v4 = vsel %vm4570_vm5, %v4565_v45, %v4567_v50 }
 0x247   : > { %v1191_v59 = vpop.f32.mrf.mxu0  ;;  %v4569_v61 = vpop.permute.xlu1 %4568  ;;  %5758 = vmatprep.subr.bf16.mxu1 %v5850_v3 }
 0x248   : > { %v5606_v1 = vpop.f32.mrf.mxu1  ;;  %v4573_v32 = vsel %vm4570_vm5, %v4567_v50, %v4569_v61 }
 0x249   : > { %v4692_v51 = vpop.permute.xlu0 %4691  ;;  %v1192_v52 = vpop.f32.mrf.mxu0  ;;  %v4584_v18 = vsel %vm521_vm1, %v4573_v32, 0 }
 0x24a   : > { %v1231_v11 = vpop.f32.mrf.mxu1 }
 0x24b   : > { %v6704_v14 = vpop.f32.mrf.mxu0  ;;  %5478 = vmatmul.mubr.msk.bf16.vlgmr.msra.gmra.mxu0 %vm517_vm2, %v5476_v2  ;;  %v4694_v15 = vpop.permute.xlu1 %4693 }
 0x24c   : > { %4472 = vmatpush1.bf16.msra.mxu0 %v4449_v13  ;;  %v5607_v20 = vpop.f32.mrf.mxu1  ;;  %4489 = vmatprep.mubr.bf16.mxu0 %v5851_v5  ;;  %v4700_v43 = vsel %vm4699_vm6, %v4692_v51, %v4694_v15 }
 0x24d   : > { %5485 = vmatprep.subr.msk.bf16.mxu0 %vm521_vm1, %v4572_v4  ;;  %v4696_v22 = vpop.permute.xlu0 %4695  ;;  %v6711_v23 = vpop.f32.mrf.mxu0  ;;  %5755 = vmatmul.mubr.msk.bf16.vlgmr.msra.gmra.mxu1 %vm517_vm2, %v5476_v2  ;;  %v4707_v61 = vsel %vm521_vm1, %v4700_v43, 0 }
 0x24e   : > { %v6714_v24 = vpop.f32.mrf.mxu1  ;;  %5759 = vmatpush3.bf16.msra.mxu1 %v4455_v21  ;;  %5760 = vmatprep.mubr.msk.bf16.mxu1 %vm5852_vm0, %v5850_v3  ;;  %v4701_v36 = vsel %vm4699_vm6, %v4694_v15, %v4696_v22  ;;  %v5488_v21 = vld [vmem:[%s6879_s7 + $0x54] sm:$0xf] }
 0x24f   : > { %v1320_v25 = vpop.f32.mrf.mxu0  ;;  %v4698_v26 = vpop.permute.xlu1 %4697  ;;  %5764 = vmatprep.subr.bf16.mxu1 %v5850_v3 }
 0x250   : > { %v5612_v28 = vpop.f32.mrf.mxu1  ;;  %v4702_v50 = vsel %vm4699_vm6, %v4696_v22, %v4698_v26 }
 0x251   : > { %v4821_v30 = vpop.permute.xlu0 %4820  ;;  %v1321_v31 = vpop.f32.mrf.mxu0  ;;  %v4713_v52 = vsel %vm521_vm1, %v4702_v50, 0 }
 0x252   : > { %v1360_v0 = vpop.f32.mrf.mxu1 }
 0x253   : > { %v6725_v53 = vpop.f32.mrf.mxu0  ;;  %5482 = vmatmul.mubr.msk.bf16.vlgmr.msra.gmra.mxu0 %vm517_vm2, %v5480_v29  ;;  %v4823_v35 = vpop.permute.xlu1 %4822 }
 0x254   : > { %4601 = vmatpush1.bf16.msra.mxu0 %v4578_v33  ;;  %v5613_v37 = vpop.f32.mrf.mxu1  ;;  %4618 = vmatprep.mubr.bf16.mxu0 %v5851_v5  ;;  %v4828_v4 = vsel %vm685_vm9, %v4821_v30, %v4823_v35 }
 0x255   : > { %5489 = vmatprep.subr.msk.bf16.mxu0 %vm521_vm1, %v4701_v36  ;;  %v4825_v38 = vpop.permute.xlu0 %4824  ;;  %v6732_v39 = vpop.f32.mrf.mxu0  ;;  %5761 = vmatmul.mubr.msk.bf16.vlgmr.msra.gmra.mxu1 %vm517_vm2, %v5480_v29  ;;  %v4835_v28 = vsel %vm521_vm1, %v4828_v4, 0  ;;  %v1064_v37 = vadd.f32 %v6666_v34, %v6645_v17 }
 0x256   : > { %v6735_v40 = vpop.f32.mrf.mxu1  ;;  %5765 = vmatpush3.bf16.msra.mxu1 %v4584_v18  ;;  %5766 = vmatprep.mubr.msk.bf16.mxu1 %vm5852_vm0, %v5850_v3  ;;  %v4829_v1 = vsel %vm685_vm9, %v4823_v35, %v4825_v38  ;;  %v1062_v35 = vadd.f32 %v6659_v7, %v6638_v12  ;;  %v5492_v7 = vld [vmem:[%s6879_s7 + $0x58] sm:$0xf] }
 0x257   : > { %v1436_v41 = vpop.f32.mrf.mxu0  ;;  %v4827_v42 = vpop.permute.xlu1 %4826  ;;  %5770 = vmatprep.subr.bf16.mxu1 %v5850_v3 }
 0x258   : > { %v5618_v45 = vpop.f32.mrf.mxu1  ;;  %v4830_v25 = vsel %vm685_vm9, %v4825_v38, %v4827_v42  ;;  %v1103_v38 = vadd.f32 %v6669_v8, %v6648_v19  ;;  %v1234_v41 = vadd.f32 %v6683_v44, %v1062_v35  ;;  %vm6896_vm9 = vmmov %vm6894_vm7 }
 0x259   : > { %v4949_v47 = vpop.permute.xlu0 %4948  ;;  %v1437_v48 = vpop.f32.mrf.mxu0  ;;  %v4841_v0 = vsel %vm521_vm1, %v4830_v25, 0  ;;  %v1235_v45 = vadd.f32 %v6690_v54, %v1064_v37 }
 0x25a   : > { %v1476_v59 = vpop.f32.mrf.mxu1  ;;  %v1236_v34 = vadd.f32 %v6693_v56, %v1103_v38  ;;  %v1363_v48 = vadd.f32 %v6704_v14, %v1234_v41 }
 0x25b   : > { %v6746_v62 = vpop.f32.mrf.mxu0  ;;  %5486 = vmatmul.mubr.msk.bf16.vlgmr.msra.gmra.mxu0 %vm517_vm2, %v5484_v46  ;;  %v4951_v2 = vpop.permute.xlu1 %4950  ;;  %v1364_v44 = vadd.f32 %v6711_v23, %v1235_v45 }
 0x25c   : > { %4730 = vmatpush1.bf16.msra.mxu0 %v4707_v61  ;;  %v5619_v51 = vpop.f32.mrf.mxu1  ;;  %4747 = vmatprep.mubr.bf16.mxu0 %v5851_v5  ;;  %v4956_v42 = vsel %vm6895_vm8, %v4949_v47, %v4951_v2  ;;  %v1365_v59 = vadd.f32 %v6714_v24, %v1236_v34  ;;  %v1479_v54 = vadd.f32 %v6725_v53, %v1363_v48 }
 0x25d   : > { %5493 = vmatprep.subr.msk.bf16.mxu0 %vm521_vm1, %v4829_v1  ;;  %v4953_v6 = vpop.permute.xlu0 %4952  ;;  %v6753_v11 = vpop.f32.mrf.mxu0  ;;  %5767 = vmatmul.mubr.msk.bf16.vlgmr.msra.gmra.mxu1 %vm517_vm2, %v5484_v46  ;;  %v4963_v47 = vsel %vm521_vm1, %v4956_v42, 0  ;;  %v1480_v23 = vadd.f32 %v6732_v39, %v1364_v44 }
 0x25e   : > { %v6756_v13 = vpop.f32.mrf.mxu1  ;;  %5771 = vmatpush3.bf16.msra.mxu1 %v4713_v52  ;;  %5772 = vmatprep.mubr.msk.bf16.mxu1 %vm5852_vm0, %v5850_v3  ;;  %v4957_v32 = vsel %vm6894_vm7, %v4951_v2, %v4953_v6  ;;  %v1481_v2 = vadd.f32 %v6735_v40, %v1365_v59  ;;  %v1607_v24 = vadd.f32 %v6746_v62, %v1479_v54  ;;  %v5496_v62 = vld [vmem:[%s6879_s7 + $0x5c] sm:$0xf] }
 0x25f   : > { %v1564_v15 = vpop.f32.mrf.mxu0  ;;  %5776 = vmatprep.subr.bf16.mxu1 %v5850_v3  ;;  %v4955_v26 = vpop.permute.xlu1 %4954 }
 0x260   : > { %v5624_v20 = vpop.f32.mrf.mxu1  ;;  %v4958_v19 = vsel %vm6896_vm9, %v4953_v6, %v4955_v26  ;;  %v1608_v6 = vadd.f32 %v6753_v11, %v1480_v23  ;;  %v1609_v15 = vadd.f32 %v6756_v13, %v1481_v2 }
 0x261   : > { %v1565_v22 = vpop.f32.mrf.mxu0  ;;  %v5077_v29 = vpop.permute.xlu0 %5076  ;;  %v4969_v56 = vsel %vm521_vm1, %v4958_v19, 0 }
 0x262   : > { %v1604_v27 = vpop.f32.mrf.mxu1 }
 0x263   : > { %v1689_v31 = vpop.f32.mrf.mxu0  ;;  %5490 = vmatmul.mubr.msk.bf16.vlgmr.msra.gmra.mxu0 %vm517_vm2, %v5488_v21  ;;  %v5079_v43 = vpop.permute.xlu1 %5078 }
 0x264   : > { %4858 = vmatpush1.bf16.msra.mxu0 %v4835_v28  ;;  %v5625_v30 = vpop.f32.mrf.mxu1  ;;  %4875 = vmatprep.mubr.bf16.mxu0 %v5851_v5  ;;  %v1736_v4 = vadd.f32 %v1689_v31, %v1607_v24  ;;  %v5084_v39 = vsel %vm6898_vm15, %v5077_v29, %v5079_v43 }
 0x265   : > { %5497 = vmatprep.subr.msk.bf16.mxu0 %vm521_vm1, %v4957_v32  ;;  %v1691_v33 = vpop.f32.mrf.mxu0  ;;  %5773 = vmatmul.mubr.msk.bf16.vlgmr.msra.gmra.mxu1 %vm517_vm2, %v5488_v21  ;;  %v5081_v46 = vpop.permute.xlu0 %5080  ;;  %v5091_v13 = vsel %vm521_vm1, %v5084_v39, 0 }
 0x266   : > { %v1730_v36 = vpop.f32.mrf.mxu1  ;;  %5777 = vmatpush3.bf16.msra.mxu1 %v4841_v0  ;;  %5778 = vmatprep.mubr.msk.bf16.mxu1 %vm5852_vm0, %v5850_v3  ;;  %v5085_v61 = vsel %vm6897_vm14, %v5079_v43, %v5081_v46  ;;  %v1737_v22 = vadd.f32 %v1691_v33, %v1608_v6 }
 0x267   : > { %v1693_v18 = vpop.f32.mrf.mxu0  ;;  %5782 = vmatprep.subr.bf16.mxu1 %v5850_v3  ;;  %v5083_v53 = vpop.permute.xlu1 %5082  ;;  %v1738_v25 = vadd.f32 %v1730_v36, %v1609_v15 }
 0x268   : > { %v5630_v12 = vpop.f32.mrf.mxu1  ;;  %v5086_v20 = vsel %vm6899_vm3, %v5081_v46, %v5083_v53 }
 0x269   : > { %v1694_v17 = vpop.f32.mrf.mxu0  ;;  %v5097_v30 = vsel %vm521_vm1, %v5086_v20, 0 }
 0x26a   : > { %v1733_v8 = vpop.f32.mrf.mxu1 }
 0x26b   : > { %v1817_v50 = vpop.f32.mrf.mxu0  ;;  %5494 = vmatmul.mubr.msk.bf16.vlgmr.msra.gmra.mxu0 %vm517_vm2, %v5492_v7 }
 0x26c   : > { %v5631_v1 = vpop.f32.mrf.mxu1  ;;  %4986 = vmatpush1.bf16.msra.mxu0 %v4963_v47  ;;  %5003 = vmatprep.mubr.bf16.mxu0 %v5851_v5  ;;  %v1864_v26 = vadd.f32 %v1817_v50, %v1736_v4 }
 0x26d   : > { %5501 = vmatprep.subr.msk.bf16.mxu0 %vm521_vm1, %v5085_v61  ;;  %v1819_v14 = vpop.f32.mrf.mxu0  ;;  %5779 = vmatmul.mubr.msk.bf16.vlgmr.msra.gmra.mxu1 %vm517_vm2, %v5492_v7 }
 0x26e   : > { %v1858_v51 = vpop.f32.mrf.mxu1  ;;  %5783 = vmatpush3.bf16.msra.mxu1 %v4969_v56  ;;  %5784 = vmatprep.mubr.msk.bf16.mxu1 %vm5852_vm0, %v5850_v3  ;;  %v1865_v0 = vadd.f32 %v1819_v14, %v1737_v22 }
 0x26f   : > { %v1821_v52 = vpop.f32.mrf.mxu0  ;;  %5788 = vmatprep.subr.bf16.mxu1 %v5850_v3  ;;  %v1866_v33 = vadd.f32 %v1858_v51, %v1738_v25 }
 0x270   : > { %v5636_v40 = vpop.f32.mrf.mxu1 }
 0x271   : > { %v1822_v21 = vpop.f32.mrf.mxu0 }
 0x272   : > { %v1861_v27 = vpop.f32.mrf.mxu1  ;;  %v488_v11 = vpop.permute.xlu0 %487 }
 0x273   : > { %v566_v28 = vadd.f32 %v6015_v57, %v488_v11  ;;  %v568_v29 = vadd.f32 %v6020_v60, %v488_v11  ;;  %v609_v31 = vadd.f32 %v6017_v58, %v488_v11  ;;  %v1945_v32 = vpop.f32.mrf.mxu0  ;;  %5498 = vmatmul.mubr.msk.bf16.vlgmr.msra.gmra.mxu0 %vm517_vm2, %v5496_v62 }
 0x274   : > { %v5637_v35 = vpop.f32.mrf.mxu1  ;;  %v1992_v36 = vadd.f32 %v1945_v32, %v1864_v26  ;;  %5114 = vmatpush1.bf16.msra.mxu0 %v5091_v13  ;;  %v708_v37 = vpop.permute.xlu1 %707  ;;  %5131 = vmatprep.mubr.bf16.mxu0 %v5851_v5 }
 0x275   : > { %v615_v18 = vmax.f32 %v566_v28, 0.0  ;;  %v616_v57 = vmax.f32 %v568_v29, 0.0  ;;  %v617_v38 = vmax.f32 %v609_v31, 0.0  ;;  %v787_v60 = vadd.f32 %v6448_v55, %v708_v37  ;;  %v1947_v58 = vpop.f32.mrf.mxu0  ;;  %5785 = vmatmul.mubr.msk.bf16.vlgmr.msra.gmra.mxu1 %vm517_vm2, %v5496_v62 }
 0x276   : > { %v789_v41 = vadd.f32 %v6457_v49, %v708_v37  ;;  %v828_v42 = vadd.f32 %v6460_v63, %v708_v37  ;;  %v1993_v43 = vadd.f32 %v1947_v58, %v1865_v0  ;;  %v1986_v12 = vpop.f32.mrf.mxu1  ;;  %5789 = vmatpush3.bf16.msra.mxu1 %v5097_v30  ;;  %v1999_v5 = vpop.permute.xlu0 %1998  ;;  %5790 = vmatprep.mubr.msk.bf16.mxu1 %vm5852_vm0, %v5850_v3  ;;  %v5500_v3 = vld [vmem:[%s6879_s7 + $0x60] sm:$0xf] }
 0x277   : > { %v637_v55 = vmul.f32 %v6029_v10, %v615_v18  ;;  %v638_v7 = vmul.f32 %v6031_v16, %v616_v57  ;;  %v639_v45 = vmul.f32 %v6027_v9, %v617_v38  ;;  %v833_v46 = vmax.f32 %v787_v60, 0.0  ;;  %v1949_v17 = vpop.f32.mrf.mxu0 }
 0x278   : > { %v834_v49 = vmax.f32 %v789_v41, 0.0  ;;  %v835_v63 = vmax.f32 %v828_v42, 0.0  ;;  %v1994_v34 = vadd.f32 %v1986_v12, %v1866_v33  ;;  %v2001_v48 = vadd.f32 %v1999_v5, %v1992_v36  ;;  %v5642_v19 = vpop.f32.mrf.mxu1 }
 0x279   : > { %842 = vst [vmem:[%s462_s30] sm:$0xff] %v637_v55  ;;  %843 = vst [vmem:[%s462_s30 + $0x8] sm:$0xff] %v638_v7  ;;  %v836_v8 = vmul.f32 %v833_v46, %v6029_v10  ;;  %v2002_v44 = vadd.f32 %v1999_v5, %v1993_v43  ;;  %v1950_v47 = vpop.f32.mrf.mxu0 }
 0x27a   : > { %844 = vst [vmem:[%s462_s30 + $0x10] sm:$0xff] %v639_v45  ;;  %v837_v50 = vmul.f32 %v834_v49, %v6031_v16  ;;  %v838_v59 = vmul.f32 %v835_v63, %v6027_v9  ;;  %v2003_v54 = vadd.f32 %v1999_v5, %v1994_v34  ;;  %v2004_v61 = vmax.f32 %v2001_v48, 0.0  ;;  %v1989_v1 = vpop.f32.mrf.mxu1 }
 0x27b   : > { %839 = vst [vmem:[%s477_s17] sm:$0xff] %v836_v8  ;;  %v2005_v56 = vmax.f32 %v2002_v44, 0.0  ;;  %v2090_v14 = vpop.f32.mrf.mxu0  ;;  %5502 = vmatmul.mubr.msk.bf16.vlgmr.msra.gmra.mxu0 %vm517_vm2, %v5500_v3 }
 0x27c   : > { %840 = vst [vmem:[%s477_s17 + $0x8] sm:$0xff] %v837_v50  ;;  %841 = vst [vmem:[%s477_s17 + $0x10] sm:$0xff] %v838_v59  ;;  %v2006_v10 = vmax.f32 %v2003_v54, 0.0  ;;  %v5643_v23 = vpop.f32.mrf.mxu1 }
 0x27d   : > { %2007 = vst [vmem:[%s467_s27] sm:$0xff] %v2004_v61  ;;  %2008 = vst [vmem:[%s467_s27 + $0x8] sm:$0xff] %v2005_v56  ;;  %v2092_v2 = vpop.f32.mrf.mxu0  ;;  %5791 = vmatmul.mubr.msk.bf16.vlgmr.msra.gmra.mxu1 %vm517_vm2, %v5500_v3 }
 0x27e   : > { %2009 = vst [vmem:[%s467_s27 + $0x10] sm:$0xff] %v2006_v10  ;;  %v2131_v16 = vpop.f32.mrf.mxu1 }
 0x27f   : > { %v2094_v9 = vpop.f32.mrf.mxu0 }
 0x280   : > { %v5648_v24 = vpop.f32.mrf.mxu1 }
 0x281   : > { %v2095_v53 = vpop.f32.mrf.mxu0 }
 0x282   : > { %v2134_v51 = vpop.f32.mrf.mxu1 }
 0x283   : > { %v2195_v52 = vpop.f32.mrf.mxu0 }
 0x284   : > { %v5649_v6 = vpop.f32.mrf.mxu1  ;;  %v2196_v15 = vadd.f32 %v2195_v52, %v2090_v14 }
 0x285   : > { %v2197_v4 = vpop.f32.mrf.mxu0 }
 0x286   : > { %v2198_v39 = vadd.f32 %v2197_v4, %v2092_v2  ;;  %v2236_v40 = vpop.f32.mrf.mxu1 }
 0x287   : > { %v2237_v62 = vadd.f32 %v2236_v40, %v2131_v16  ;;  %v2199_v20 = vpop.f32.mrf.mxu0 }
 0x288   : > { %v5654_v21 = vpop.f32.mrf.mxu1 }
 0x289   : > { %v2200_v22 = vpop.f32.mrf.mxu0 }
 0x28a   : > { %v2239_v25 = vpop.f32.mrf.mxu1 }
 0x28b   : > { %v2321_v26 = vpop.f32.mrf.mxu0 }
 0x28c   : > { %v5655_v27 = vpop.f32.mrf.mxu1  ;;  %v2368_v11 = vadd.f32 %v2321_v26, %v2196_v15 }
 0x28d   : > { %v2323_v13 = vpop.f32.mrf.mxu0 }
 0x28e   : > { %v2369_v28 = vadd.f32 %v2323_v13, %v2198_v39  ;;  %v2362_v29 = vpop.f32.mrf.mxu1 }
 0x28f   : > { %v2370_v31 = vadd.f32 %v2362_v29, %v2237_v62  ;;  %v2325_v32 = vpop.f32.mrf.mxu0 }
 0x290   : > { %v5660_v30 = vpop.f32.mrf.mxu1 }
 0x291   : > { %v2326_v0 = vpop.f32.mrf.mxu0 }
 0x292   : > { %v2365_v33 = vpop.f32.mrf.mxu1 }
 0x293   : > { %v2450_v35 = vpop.f32.mrf.mxu0 }
 0x294   : > { %v5661_v36 = vpop.f32.mrf.mxu1  ;;  %v2497_v37 = vadd.f32 %v2450_v35, %v2368_v11 }
 0x295   : > { %v2452_v18 = vpop.f32.mrf.mxu0 }
 0x296   : > { %v2498_v57 = vadd.f32 %v2452_v18, %v2369_v28  ;;  %v2491_v38 = vpop.f32.mrf.mxu1 }
 0x297   : > { %v2499_v60 = vadd.f32 %v2491_v38, %v2370_v31  ;;  %v2454_v58 = vpop.f32.mrf.mxu0 }
 0x298   : > { %v5666_v41 = vpop.f32.mrf.mxu1 }
 0x299   : > { %v2455_v42 = vpop.f32.mrf.mxu0 }
 0x29a   : > { %v2494_v43 = vpop.f32.mrf.mxu1 }
 0x29b   : > { %v2579_v12 = vpop.f32.mrf.mxu0 }
 0x29c   : > { %v5667_v5 = vpop.f32.mrf.mxu1  ;;  %v2626_v55 = vadd.f32 %v2579_v12, %v2497_v37 }
 0x29d   : > { %v2581_v7 = vpop.f32.mrf.mxu0 }
 0x29e   : > { %v2627_v45 = vadd.f32 %v2581_v7, %v2498_v57  ;;  %v2620_v46 = vpop.f32.mrf.mxu1 }
 0x29f   : > { %v2628_v17 = vadd.f32 %v2620_v46, %v2499_v60  ;;  %v2583_v49 = vpop.f32.mrf.mxu0 }
 0x2a0   : > { %v5672_v63 = vpop.f32.mrf.mxu1 }
 0x2a1   : > { %v2584_v34 = vpop.f32.mrf.mxu0 }
 0x2a2   : > { %v2623_v48 = vpop.f32.mrf.mxu1 }
 0x2a3   : > { %v2708_v19 = vpop.f32.mrf.mxu0 }
 0x2a4   : > { %v5673_v3 = vpop.f32.mrf.mxu1  ;;  %v2755_v8 = vadd.f32 %v2708_v19, %v2626_v55 }
 0x2a5   : > { %v2710_v44 = vpop.f32.mrf.mxu0 }
 0x2a6   : > { %v2756_v47 = vadd.f32 %v2710_v44, %v2627_v45  ;;  %v2749_v50 = vpop.f32.mrf.mxu1 }
 0x2a7   : > { %v2757_v59 = vadd.f32 %v2749_v50, %v2628_v17  ;;  %v2712_v54 = vpop.f32.mrf.mxu0 }
 0x2a8   : > { %v5678_v61 = vpop.f32.mrf.mxu1 }
 0x2a9   : > { %v2713_v1 = vpop.f32.mrf.mxu0 }
 0x2aa   : > { %v2752_v56 = vpop.f32.mrf.mxu1 }
 0x2ab   : > { %v2836_v14 = vpop.f32.mrf.mxu0 }
 0x2ac   : > { %v5679_v10 = vpop.f32.mrf.mxu1  ;;  %v2883_v23 = vadd.f32 %v2836_v14, %v2755_v8 }
 0x2ad   : > { %v2838_v2 = vpop.f32.mrf.mxu0 }
 0x2ae   : > { %v2884_v16 = vadd.f32 %v2838_v2, %v2756_v47  ;;  %v2877_v9 = vpop.f32.mrf.mxu1 }
 0x2af   : > { %v2885_v24 = vadd.f32 %v2877_v9, %v2757_v59  ;;  %v2840_v53 = vpop.f32.mrf.mxu0 }
 0x2b0   : > { %v5684_v51 = vpop.f32.mrf.mxu1 }
 0x2b1   : > { %v2841_v52 = vpop.f32.mrf.mxu0 }
 0x2b2   : > { %v2880_v6 = vpop.f32.mrf.mxu1 }
 0x2b3   : > { %v2964_v15 = vpop.f32.mrf.mxu0 }
 0x2b4   : > { %v5685_v4 = vpop.f32.mrf.mxu1  ;;  %v3011_v39 = vadd.f32 %v2964_v15, %v2883_v23 }
 0x2b5   : > { %v2966_v40 = vpop.f32.mrf.mxu0 }
 0x2b6   : > { %v3012_v62 = vadd.f32 %v2966_v40, %v2884_v16  ;;  %v3005_v20 = vpop.f32.mrf.mxu1 }
 0x2b7   : > { %v3013_v21 = vadd.f32 %v3005_v20, %v2885_v24  ;;  %v2968_v22 = vpop.f32.mrf.mxu0 }
 0x2b8   : > { %v5690_v25 = vpop.f32.mrf.mxu1 }
 0x2b9   : > { %v2969_v26 = vpop.f32.mrf.mxu0 }
 0x2ba   : > { %v3008_v27 = vpop.f32.mrf.mxu1 }
 0x2bb   : > { %v3092_v11 = vpop.f32.mrf.mxu0 }
 0x2bc   : > { %v5691_v13 = vpop.f32.mrf.mxu1  ;;  %v3139_v28 = vadd.f32 %v3092_v11, %v3011_v39 }
 0x2bd   : > { %v3094_v29 = vpop.f32.mrf.mxu0 }
 0x2be   : > { %v3140_v31 = vadd.f32 %v3094_v29, %v3012_v62  ;;  %v3133_v32 = vpop.f32.mrf.mxu1 }
 0x2bf   : > { %v3141_v30 = vadd.f32 %v3133_v32, %v3013_v21  ;;  %v3096_v0 = vpop.f32.mrf.mxu0 }
 0x2c0   : > { %v5696_v33 = vpop.f32.mrf.mxu1 }
 0x2c1   : > { %v3097_v35 = vpop.f32.mrf.mxu0 }
 0x2c2   : > { %v3136_v36 = vpop.f32.mrf.mxu1 }
 0x2c3   : > { %v3221_v37 = vpop.f32.mrf.mxu0 }
 0x2c4   : > { %v5697_v18 = vpop.f32.mrf.mxu1  ;;  %v3268_v57 = vadd.f32 %v3221_v37, %v3139_v28 }
 0x2c5   : > { %v3223_v38 = vpop.f32.mrf.mxu0 }
 0x2c6   : > { %v3269_v60 = vadd.f32 %v3223_v38, %v3140_v31  ;;  %v3262_v58 = vpop.f32.mrf.mxu1 }
 0x2c7   : > { %v3270_v41 = vadd.f32 %v3262_v58, %v3141_v30  ;;  %v3225_v42 = vpop.f32.mrf.mxu0 }
 0x2c8   : > { %v5702_v43 = vpop.f32.mrf.mxu1 }
 0x2c9   : > { %v3226_v12 = vpop.f32.mrf.mxu0 }
 0x2ca   : > { %v3265_v5 = vpop.f32.mrf.mxu1 }
 0x2cb   : > { %v3350_v55 = vpop.f32.mrf.mxu0 }
 0x2cc   : > { %v5703_v7 = vpop.f32.mrf.mxu1  ;;  %v3397_v45 = vadd.f32 %v3350_v55, %v3268_v57 }
 0x2cd   : > { %v3352_v46 = vpop.f32.mrf.mxu0 }
 0x2ce   : > { %v3398_v17 = vadd.f32 %v3352_v46, %v3269_v60  ;;  %v3391_v49 = vpop.f32.mrf.mxu1 }
 0x2cf   : > { %v3399_v63 = vadd.f32 %v3391_v49, %v3270_v41  ;;  %v3354_v34 = vpop.f32.mrf.mxu0 }
 0x2d0   : > { %v5708_v48 = vpop.f32.mrf.mxu1 }
 0x2d1   : > { %v3355_v19 = vpop.f32.mrf.mxu0 }
 0x2d2   : > { %v3394_v3 = vpop.f32.mrf.mxu1 }
 0x2d3   : > { %v3478_v8 = vpop.f32.mrf.mxu0 }
 0x2d4   : > { %v5709_v44 = vpop.f32.mrf.mxu1  ;;  %v3525_v47 = vadd.f32 %v3478_v8, %v3397_v45 }
 0x2d5   : > { %v3480_v50 = vpop.f32.mrf.mxu0 }
 0x2d6   : > { %v3526_v59 = vadd.f32 %v3480_v50, %v3398_v17  ;;  %v3519_v54 = vpop.f32.mrf.mxu1 }
 0x2d7   : > { %v3527_v61 = vadd.f32 %v3519_v54, %v3399_v63  ;;  %v3482_v1 = vpop.f32.mrf.mxu0 }
 0x2d8   : > { %v5714_v56 = vpop.f32.mrf.mxu1 }
 0x2d9   : > { %v3483_v14 = vpop.f32.mrf.mxu0 }
 0x2da   : > { %v3522_v10 = vpop.f32.mrf.mxu1 }
 0x2db   : > { %v3594_v23 = vpop.f32.mrf.mxu0 }
 0x2dc   : > { %v5715_v2 = vpop.f32.mrf.mxu1  ;;  %v3641_v16 = vadd.f32 %v3594_v23, %v3525_v47 }
 0x2dd   : > { %v3596_v9 = vpop.f32.mrf.mxu0 }
 0x2de   : > { %v3642_v24 = vadd.f32 %v3596_v9, %v3526_v59  ;;  %v3635_v53 = vpop.f32.mrf.mxu1 }
 0x2df   : > { %v3643_v51 = vadd.f32 %v3635_v53, %v3527_v61  ;;  %v3598_v52 = vpop.f32.mrf.mxu0 }
 0x2e0   : > { %v5720_v6 = vpop.f32.mrf.mxu1 }
 0x2e1   : > { %v3599_v15 = vpop.f32.mrf.mxu0 }
 0x2e2   : > { %v3638_v4 = vpop.f32.mrf.mxu1 }
 0x2e3   : > { %v3722_v39 = vpop.f32.mrf.mxu0 }
 0x2e4   : > { %v5721_v40 = vpop.f32.mrf.mxu1  ;;  %v6853_v62 = vadd.f32 %v3722_v39, %v3641_v16 }
 0x2e5   : > { %v3724_v20 = vpop.f32.mrf.mxu0 }
 0x2e6   : > { %v6855_v21 = vadd.f32 %v3724_v20, %v3642_v24  ;;  %v3763_v22 = vpop.f32.mrf.mxu1 }
 0x2e7   : > { %v6857_v25 = vadd.f32 %v3763_v22, %v3643_v51  ;;  %v3726_v26 = vpop.f32.mrf.mxu0 }
 0x2e8   : > { %v5726_v27 = vpop.f32.mrf.mxu1 }
 0x2e9   : > { %v3727_v11 = vpop.f32.mrf.mxu0 }
 0x2ea   : > { %v3766_v13 = vpop.f32.mrf.mxu1 }
 0x2eb   : > { %v3850_v28 = vpop.f32.mrf.mxu0 }
 0x2ec   : > { %v5727_v29 = vpop.f32.mrf.mxu1 }
 0x2ed   : > { %v3852_v31 = vpop.f32.mrf.mxu0  ;;  %v3897_v29 = vadd.f32 %v3850_v28, %v6853_v62 }
 0x2ee   : > { %v6859_v32 = vpop.f32.mrf.mxu1 }
 0x2ef   : > { %v3854_v30 = vpop.f32.mrf.mxu0 }
 0x2f0   : > { %v5732_v0 = vpop.f32.mrf.mxu1 }
 0x2f1   : > { %v3855_v33 = vpop.f32.mrf.mxu0 }
 0x2f2   : > { %v3894_v35 = vpop.f32.mrf.mxu1  ;;  %v3898_v33 = vadd.f32 %v3852_v31, %v6855_v21 }
 0x2f3   : > { %v3979_v36 = vpop.f32.mrf.mxu0 }
 0x2f4   : > { %v5733_v37 = vpop.f32.mrf.mxu1  ;;  %v4026_v35 = vadd.f32 %v3979_v36, %v3897_v29 }
 0x2f5   : > { %v3981_v18 = vpop.f32.mrf.mxu0 }
 0x2f6   : > { %v4020_v57 = vpop.f32.mrf.mxu1 }
 0x2f7   : > { %v3983_v38 = vpop.f32.mrf.mxu0 }
 0x2f8   : > { %v5738_v60 = vpop.f32.mrf.mxu1  ;;  %v3899_v38 = vadd.f32 %v6859_v32, %v6857_v25 }
 0x2f9   : > { %v3984_v58 = vpop.f32.mrf.mxu0 }
 0x2fa   : > { %v4023_v41 = vpop.f32.mrf.mxu1  ;;  %v4027_v58 = vadd.f32 %v3981_v18, %v3898_v33 }
 0x2fb   : > { %v4107_v42 = vpop.f32.mrf.mxu0 }
 0x2fc   : > { %v5739_v43 = vpop.f32.mrf.mxu1  ;;  %v4154_v41 = vadd.f32 %v4107_v42, %v4026_v35 }
 0x2fd   : > { %v4109_v12 = vpop.f32.mrf.mxu0 }
 0x2fe   : > { %v4148_v5 = vpop.f32.mrf.mxu1 }
 0x2ff   : > { %v4111_v55 = vpop.f32.mrf.mxu0 }
 0x300   : > { %v5744_v7 = vpop.f32.mrf.mxu1  ;;  %v4028_v55 = vadd.f32 %v4020_v57, %v3899_v38 }
 0x301   : > { %v4112_v45 = vpop.f32.mrf.mxu0 }
 0x302   : > { %v4151_v46 = vpop.f32.mrf.mxu1  ;;  %v4155_v45 = vadd.f32 %v4109_v12, %v4027_v58 }
 0x303   : > { %v4235_v17 = vpop.f32.mrf.mxu0 }
 0x304   : > { %v5745_v49 = vpop.f32.mrf.mxu1  ;;  %v4282_v46 = vadd.f32 %v4235_v17, %v4154_v41 }
 0x305   : > { %v4237_v63 = vpop.f32.mrf.mxu0 }
 0x306   : > { %v4276_v34 = vpop.f32.mrf.mxu1  ;;  %v4283_v28 = vadd.f32 %v4237_v63, %v4155_v45 }
 0x307   : > { %v4239_v48 = vpop.f32.mrf.mxu0 }
 0x308   : > { %v5750_v19 = vpop.f32.mrf.mxu1  ;;  %v4156_v48 = vadd.f32 %v4148_v5, %v4028_v55 }
 0x309   : > { %v4240_v3 = vpop.f32.mrf.mxu0 }
 0x30a   : > { %v4279_v8 = vpop.f32.mrf.mxu1  ;;  %v4284_v21 = vadd.f32 %v4276_v34, %v4156_v48 }
 0x30b   : > { %v4363_v44 = vpop.f32.mrf.mxu0 }
 0x30c   : > { %v5751_v47 = vpop.f32.mrf.mxu1  ;;  %v4410_v19 = vadd.f32 %v4363_v44, %v4282_v46 }
 0x30d   : > { %v4365_v50 = vpop.f32.mrf.mxu0 }
 0x30e   : > { %v4404_v59 = vpop.f32.mrf.mxu1  ;;  %v4411_v36 = vadd.f32 %v4365_v50, %v4283_v28 }
 0x30f   : > { %v4367_v54 = vpop.f32.mrf.mxu0  ;;  %v4412_v25 = vadd.f32 %v4404_v59, %v4284_v21 }
 0x310   : > { %v5756_v61 = vpop.f32.mrf.mxu1 }
 0x311   : > { %v4368_v1 = vpop.f32.mrf.mxu0 }
 0x312   : > { %v4407_v56 = vpop.f32.mrf.mxu1 }
 0x313   : > { %v4491_v14 = vpop.f32.mrf.mxu0 }
 0x314   : > { %v5757_v10 = vpop.f32.mrf.mxu1  ;;  %v4538_v8 = vadd.f32 %v4491_v14, %v4410_v19 }
 0x315   : > { %v4493_v23 = vpop.f32.mrf.mxu0 }
 0x316   : > { %v4532_v2 = vpop.f32.mrf.mxu1  ;;  %v4539_v18 = vadd.f32 %v4493_v23, %v4411_v36 }
 0x317   : > { %v4495_v16 = vpop.f32.mrf.mxu0  ;;  %v4540_v57 = vadd.f32 %v4532_v2, %v4412_v25 }
 0x318   : > { %v5762_v9 = vpop.f32.mrf.mxu1 }
 0x319   : > { %v4496_v24 = vpop.f32.mrf.mxu0 }
 0x31a   : > { %v4535_v53 = vpop.f32.mrf.mxu1 }
 0x31b   : > { %v4620_v51 = vpop.f32.mrf.mxu0 }
 0x31c   : > { %v5763_v52 = vpop.f32.mrf.mxu1  ;;  %v4667_v42 = vadd.f32 %v4620_v51, %v4538_v8 }
 0x31d   : > { %v4622_v6 = vpop.f32.mrf.mxu0 }
 0x31e   : > { %v4661_v15 = vpop.f32.mrf.mxu1  ;;  %v4668_v12 = vadd.f32 %v4622_v6, %v4539_v18  ;;  %v5187_v6 = vpop.permute.xlu1 %5186 }
 0x31f   : > { %v4624_v4 = vpop.f32.mrf.mxu0  ;;  %v4669_v5 = vadd.f32 %v4661_v15, %v4540_v57 }
 0x320   : > { %v5768_v39 = vpop.f32.mrf.mxu1 }
 0x321   : > { %v4625_v40 = vpop.f32.mrf.mxu0 }
 0x322   : > { %v4664_v20 = vpop.f32.mrf.mxu1 }
 0x323   : > { %v4749_v22 = vpop.f32.mrf.mxu0 }
 0x324   : > { %v5769_v26 = vpop.f32.mrf.mxu1  ;;  %v4796_v17 = vadd.f32 %v4749_v22, %v4667_v42 }
 0x325   : > { %v4751_v27 = vpop.f32.mrf.mxu0 }
 0x326   : > { %v4790_v11 = vpop.f32.mrf.mxu1  ;;  %v4797_v63 = vadd.f32 %v4751_v27, %v4668_v12 }
 0x327   : > { %v4753_v13 = vpop.f32.mrf.mxu0  ;;  %v4798_v34 = vadd.f32 %v4790_v11, %v4669_v5 }
 0x328   : > { %v5774_v30 = vpop.f32.mrf.mxu1 }
 0x329   : > { %v4754_v0 = vpop.f32.mrf.mxu0 }
 0x32a   : > { %v4793_v37 = vpop.f32.mrf.mxu1 }
 0x32b   : > { %v4877_v60 = vpop.f32.mrf.mxu0 }
 0x32c   : > { %v5775_v43 = vpop.f32.mrf.mxu1  ;;  %v4924_v44 = vadd.f32 %v4877_v60, %v4796_v17 }
 0x32d   : > { %v4879_v7 = vpop.f32.mrf.mxu0 }
 0x32e   : > { %v4918_v49 = vpop.f32.mrf.mxu1  ;;  %v4925_v14 = vadd.f32 %v4879_v7, %v4797_v63 }
 0x32f   : > { %v4881_v62 = vpop.f32.mrf.mxu0  ;;  %v4926_v9 = vadd.f32 %v4918_v49, %v4798_v34 }
 0x330   : > { %v5780_v3 = vpop.f32.mrf.mxu1 }
 0x331   : > { %v4882_v31 = vpop.f32.mrf.mxu0 }
 0x332   : > { %v4921_v47 = vpop.f32.mrf.mxu1 }
 0x333   : > { %v5005_v32 = vpop.f32.mrf.mxu0 }
 0x334   : > { %v5781_v54 = vpop.f32.mrf.mxu1  ;;  %v5052_v16 = vadd.f32 %v5005_v32, %v4924_v44 }
 0x335   : > { %v5007_v61 = vpop.f32.mrf.mxu0 }
 0x336   : > { %v5046_v1 = vpop.f32.mrf.mxu1  ;;  %v5053_v24 = vadd.f32 %v5007_v61, %v4925_v14 }
 0x337   : > { %v5009_v56 = vpop.f32.mrf.mxu0  ;;  %v5054_v51 = vadd.f32 %v5046_v1, %v4926_v9 }
 0x338   : > { %v5786_v10 = vpop.f32.mrf.mxu1 }
 0x339   : > { %v5010_v50 = vpop.f32.mrf.mxu0 }
 0x33a   : > { %v5049_v59 = vpop.f32.mrf.mxu1 }
 0x33b   : > { %v5133_v23 = vpop.f32.mrf.mxu0 }
 0x33c   : > { %v5787_v53 = vpop.f32.mrf.mxu1  ;;  %v5180_v2 = vadd.f32 %v5133_v23, %v5052_v16 }
 0x33d   : > { %v5135_v52 = vpop.f32.mrf.mxu0 }
 0x33e   : > { %v5181_v4 = vadd.f32 %v5135_v52, %v5053_v24  ;;  %v5189_v15 = vadd.f32 %v5187_v6, %v5180_v2  ;;  %v5174_v39 = vpop.f32.mrf.mxu1 }
 0x33f   : > { %v5182_v40 = vadd.f32 %v5174_v39, %v5054_v51  ;;  %v5137_v20 = vpop.f32.mrf.mxu0 }
 0x340   : > { %v5190_v22 = vadd.f32 %v5187_v6, %v5181_v4  ;;  %v5192_v26 = vmax.f32 %v5189_v15, 0.0  ;;  %v5792_v27 = vpop.f32.mrf.mxu1 }
 0x341   : > { %v5191_v11 = vadd.f32 %v5187_v6, %v5182_v40  ;;  %v5138_v13 = vpop.f32.mrf.mxu0 }
 0x342   : > { %v5193_v29 = vmax.f32 %v5190_v22, 0.0  ;;  %5195 = vst [vmem:[%s472_s16] sm:$0xff] %v5192_v26  ;;  %v5177_v30 = vpop.f32.mrf.mxu1 }
 0x343   : > { %v5194_v0 = vmax.f32 %v5191_v11, 0.0 }
 0x344   : > { %5196 = vst [vmem:[%s472_s16 + $0x8] sm:$0xff] %v5193_v29  ;;  %v5793_v33 = vpop.f32.mrf.mxu1 }
 0x345   : > { %5197 = vst [vmem:[%s472_s16 + $0x10] sm:$0xff] %v5194_v0 }
 0x346 PF: > { %s24_s25 = sadd.s32 1, %s5847_s25  }
 0x347   : > { %p21_p4 = scmp.ge.s32.totalorder %s24_s25, 4  }
 0x349   :  { %23 = sbr.rel (!%p21_p4) target bundleno = 1 (0x1), region = 158 }

</bundles_post_ra>
